<compile_context>
chip_gen: v6e
topology: v6e:2x2x1
jax: 0.10.0
libtpu: 0.0.40
codegen_flags: <defaults>
</compile_context>

<pallas_src>
from functools import partial

import numpy as np
import jax
import jax.numpy as jnp
from jax import lax
from jax.experimental import pallas as pl
from jax.experimental.pallas import tpu as pltpu


def _lstm_cell(xg, h, c, w_hh, H):
  """One LSTM step.  PyTorch gate order i, f, g, o.

  `xg` already holds x @ W_ih^T + (b_ih + b_hh) (hoisted input projection), so
  the recurrent step is gates = xg + h @ W_hh^T.  State and nonlinearities stay
  f32; only the matmul operands follow w_hh's dtype (bf16 opt-in).
  """
  gates = xg + jnp.dot(h.astype(w_hh.dtype), w_hh,
                       preferred_element_type=jnp.float32)
  if H % 128 == 0:
    # Lane-aligned slices: sigmoid only on i/f/o lanes, tanh only on g lanes
    # (halves EUP work per step on the serial critical path at H >= 128).
    sg_if = jax.nn.sigmoid(gates[:, :2 * H])
    i_g, f_g = sg_if[:, :H], sg_if[:, H:]
    g_g = jnp.tanh(gates[:, 2 * H:3 * H])
    o_g = jax.nn.sigmoid(gates[:, 3 * H:])
  else:
    # 4H <= 128 lanes: two full-vreg EUP pushes, slice afterwards.
    sg = jax.nn.sigmoid(gates)
    tg = jnp.tanh(gates)
    i_g, f_g = sg[:, 0 * H:1 * H], sg[:, 1 * H:2 * H]
    g_g, o_g = tg[:, 2 * H:3 * H], sg[:, 3 * H:4 * H]
  c_new = f_g * c + i_g * g_g
  h_new = o_g * jnp.tanh(c_new)
  return h_new, c_new


def _hier_rnn_relational_kernel(
    tok_ref,                          # (1, T*S*BB, E)  rows ordered (t, s, b)
    wih_t_ref, whh_t_ref, bt_ref,     # token LSTM:       (E,4H), (H,4H), (1,4H)
    wih_i_ref, whh_i_ref, bi_ref,     # instruction LSTM: (H,4H), (H,4H), (1,4H)
    w1ab_ref, b1_ref,                 # linearg1 fused:   (H,2H), (1,H)
    w2_ref, b2_ref,                   # linearg2:         (H,H), (1,H)
    mask_ref,                         # (BB, S*S*BB)  block-diag upper-tri mask
    out_ref,                          # (1, BB, H)  per-block relational sum
    *, T, S, BB):
  H = whh_t_ref.shape[0]

  # ---- token-level LSTM, batched over S instructions x BB blocks ------------
  # Every instruction's token LSTM starts from the SAME zero state in the
  # PyTorch forward, so all S*BB token sequences run as one batch on the MXU.
  # The input projection has no serial dependency: hoist it as one well-shaped
  # (T*S*BB, E) @ (E, 4H) matmul.
  tok = tok_ref[0]                                            # (T*S*BB, E)
  wih_t = wih_t_ref[...]
  xg_tok = (jnp.dot(tok.astype(wih_t.dtype), wih_t,
                    preferred_element_type=jnp.float32)
            + bt_ref[...])                                    # (T*S*BB, 4H)
  xg_tok = xg_tok.reshape(T, S * BB, 4 * H)                   # leading-axis idx
  whh_t = whh_t_ref[...]

  h = jnp.zeros((S * BB, H), jnp.float32)
  c = jnp.zeros((S * BB, H), jnp.float32)
  for t in range(T):          # static unroll; switch to fori_loop if T >> 32
    h, c = _lstm_cell(xg_tok[t], h, c, whh_t, H)
  # h == ins_embeds, (S*BB, H), rows ordered (s, b).

  # ---- instruction-level LSTM: serial over S, batched over BB blocks --------
  wih_i = wih_i_ref[...]
  xg_ins = (jnp.dot(h.astype(wih_i.dtype), wih_i,
                    preferred_element_type=jnp.float32)
            + bi_ref[...])                                    # (S*BB, 4H)
  xg_ins = xg_ins.reshape(S, BB, 4 * H)
  whh_i = whh_i_ref[...]

  hi = jnp.zeros((BB, H), jnp.float32)
  ci = jnp.zeros((BB, H), jnp.float32)
  outs = []
  for s in range(S):          # static unroll
    hi, ci = _lstm_cell(xg_ins[s], hi, ci, whh_i, H)
    outs.append(hi)
  out_ins = jnp.concatenate(outs, axis=0)                     # (S*BB, H) (s, b)

  # ---- relational aggregation: all S*S*BB pairs in one slab -----------------
  # linearg1([out_i ; out_j]) = out_i @ W1a^T + out_j @ W1b^T + b1, with
  # W1a^T | W1b^T fused into one (H, 2H) weight -> single MXU push.
  w1ab = w1ab_ref[...]
  ab = jnp.dot(out_ins.astype(w1ab.dtype), w1ab,
               preferred_element_type=jnp.float32)            # (S*BB, 2H)
  a_part = ab[:, :H].reshape(S, BB, H)
  b_part = (ab[:, H:] + b1_ref[...]).reshape(S, BB, H)        # bias added once
  g1 = jnp.maximum(a_part[:, None, :, :] + b_part[None, :, :, :], 0.0)
  g1 = g1.reshape(S * S * BB, H)                              # rows (i, j, b)

  w2 = w2_ref[...]
  g2 = jnp.maximum(
      jnp.dot(g1.astype(w2.dtype), w2, preferred_element_type=jnp.float32)
      + b2_ref[...], 0.0)                                     # (S*S*BB, H)

  # Per-block sum over pairs j >= i as ONE MXU dot against the precomputed
  # block-diagonal upper-triangular mask: (BB, S*S*BB) @ (S*S*BB, H).
  # TODO(synk): for very large S, replace the block-diag mask with a per-block
  # masked reduce to keep the mask O(S*S) instead of O(BB*S*S*BB).
  out_ref[0] = jnp.dot(mask_ref[...], g2,
                       preferred_element_type=jnp.float32)    # (BB, H)


def _full_spec(shape):
  """Whole-array VMEM block, identical at every grid point (weights / consts)."""
  n = len(shape)
  return pl.BlockSpec(shape, lambda g, _n=n: (0,) * _n)


def hier_rnn_relational_forward(token_ids, params, *, block_batch=8,
                                matmul_dtype=jnp.float32):
  """token_ids: (B, S, T) int32 — B basic blocks of S instructions, T tokens each.

  block_batch (BB) basic blocks are folded into each grid step; keep
  B // block_batch >= 2 so both v7x TensorCores are used.  Set
  matmul_dtype=jnp.bfloat16 on v6e/v7x for 2x MXU rate (state / gate math and
  accumulation stay f32).
  """
  B, S, T = token_ids.shape
  E = params['embedding'].shape[1]
  H = params['w_hh_tok'].shape[1]
  BB = block_batch
  assert B % BB == 0, "batch must be divisible by block_batch"
  G = B // BB

  # --- glue in plain JAX: id-side transpose (cheap, 4-byte ids) then gather --
  # Per grid step the token rows are ordered (t, s, b_local) so that per-t
  # slices (token LSTM) and per-s slices (instruction LSTM) are contiguous and
  # sublane aligned.
  ids = token_ids.reshape(G, BB, S, T)
  ids = jnp.transpose(ids, (0, 3, 2, 1))                      # (G, T, S, BB)
  emb = params['embedding'].astype(matmul_dtype)
  tok = emb[ids].reshape(G, T * S * BB, E)                    # (G, T*S*BB, E)

  wih_t = params['w_ih_tok'].T.astype(matmul_dtype)           # (E, 4H)
  whh_t = params['w_hh_tok'].T.astype(matmul_dtype)           # (H, 4H)
  bt = (params['b_ih_tok'] + params['b_hh_tok']).reshape(1, 4 * H)
  wih_i = params['w_ih_ins'].T.astype(matmul_dtype)
  whh_i = params['w_hh_ins'].T.astype(matmul_dtype)
  bi = (params['b_ih_ins'] + params['b_hh_ins']).reshape(1, 4 * H)
  # Fused linearg1 weight: [W1a^T | W1b^T] -> (H, 2H).
  w1ab = jnp.concatenate([params['w_g1'][:, :H].T,
                          params['w_g1'][:, H:].T], axis=1).astype(matmul_dtype)
  b1 = params['b_g1'].reshape(1, H)
  w2 = params['w_g2'].T.astype(matmul_dtype)                  # (H, H)
  b2 = params['b_g2'].reshape(1, H)

  # Block-diagonal upper-triangular pair mask: rows = block b, cols = pair rows
  # ordered (i, j, b'); mask[b, (i*S + j)*BB + b'] = (j >= i) * (b == b').
  ii = np.arange(S)[:, None]
  jj = np.arange(S)[None, :]
  tri = (jj >= ii).astype(np.float32).reshape(S * S)
  eye = np.eye(BB, dtype=np.float32)
  mask = jnp.asarray((tri[None, :, None] * eye[:, None, :]).reshape(BB, S * S * BB))

  weights = (wih_t, whh_t, bt, wih_i, whh_i, bi, w1ab, b1, w2, b2, mask)
  in_specs = ([pl.BlockSpec((1, T * S * BB, E), lambda g: (g, 0, 0))]
              + [_full_spec(w.shape) for w in weights])

  g_var = pl.pallas_call(
      partial(_hier_rnn_relational_kernel, T=T, S=S, BB=BB),
      grid=(G,),
      out_shape=jax.ShapeDtypeStruct((G, BB, H), jnp.float32),
      in_specs=in_specs,
      out_specs=pl.BlockSpec((1, BB, H), lambda g: (g, 0, 0)),
      compiler_params=pltpu.CompilerParams(
          dimension_semantics=("parallel",)),
  )(tok, *weights)

  g_var = g_var.reshape(B, H)
  # Final (H -> num_classes) projection hoisted out of the kernel.
  return g_var @ params['w_out'].T + params['b_out']          # (B, C)


def init_params(key, vocab, E, H, C):
  """Deterministic synthetic parameters matching the PyTorch module's shapes."""
  ks = jax.random.split(key, 15)
  u = lambda k, shape, bound: jax.random.uniform(
      k, shape, jnp.float32, -bound, bound)
  kH = 1.0 / np.sqrt(H)
  k2H = 1.0 / np.sqrt(2 * H)
  return dict(
      embedding=u(ks[0], (vocab, E), 0.5 / E),          # mode='none' init range
      # nn.LSTM(embedding_size, hidden_size)
      w_ih_tok=u(ks[1], (4 * H, E), kH),
      w_hh_tok=u(ks[2], (4 * H, H), kH),
      b_ih_tok=u(ks[3], (4 * H,), kH),
      b_hh_tok=u(ks[4], (4 * H,), kH),
      # nn.LSTM(hidden_size, hidden_size)
      w_ih_ins=u(ks[5], (4 * H, H), kH),
      w_hh_ins=u(ks[6], (4 * H, H), kH),
      b_ih_ins=u(ks[7], (4 * H,), kH),
      b_hh_ins=u(ks[8], (4 * H,), kH),
      # nn.Linear(2*hidden_size, hidden_size)
      w_g1=u(ks[9], (H, 2 * H), k2H),
      b_g1=u(ks[10], (H,), k2H),
      # nn.Linear(hidden_size, hidden_size)
      w_g2=u(ks[11], (H, H), kH),
      b_g2=u(ks[12], (H,), kH),
      # nn.Linear(hidden_size, num_classes)
      w_out=u(ks[13], (C, H), kH),
      b_out=u(ks[14], (C,), kH),
  )


def reference_forward(token_ids, params):
  """Pure-JAX reference for ONE basic block, mirroring the PyTorch forward."""
  S, T = token_ids.shape
  H = params['w_hh_tok'].shape[1]
  emb = params['embedding'][token_ids]                        # (S, T, E)

  def run_lstm(x_seq, w_ih, w_hh, b_ih, b_hh):
    def cell(carry, x):
      h, c = carry
      gates = x @ w_ih.T + b_ih + h @ w_hh.T + b_hh
      i = jax.nn.sigmoid(gates[0:H])
      f = jax.nn.sigmoid(gates[H:2 * H])
      g = jnp.tanh(gates[2 * H:3 * H])
      o = jax.nn.sigmoid(gates[3 * H:4 * H])
      c = f * c + i * g
      h = o * jnp.tanh(c)
      return (h, c), h
    (h, _), hs = lax.scan(cell, (jnp.zeros(H), jnp.zeros(H)), x_seq)
    return hs, h

  ins_embeds = []
  for i in range(S):
    _, h_last = run_lstm(emb[i], params['w_ih_tok'], params['w_hh_tok'],
                         params['b_ih_tok'], params['b_hh_tok'])
    ins_embeds.append(h_last)
  ins_embeds = jnp.stack(ins_embeds)                          # (S, H)
  out_ins, _ = run_lstm(ins_embeds, params['w_ih_ins'], params['w_hh_ins'],
                        params['b_ih_ins'], params['b_hh_ins'])

  g_var = jnp.zeros(H)
  for i in range(S):
    for j in range(i, S):
      concat = jnp.concatenate([out_ins[i], out_ins[j]])
      g1 = jax.nn.relu(params['w_g1'] @ concat + params['b_g1'])
      g2 = jax.nn.relu(params['w_g2'] @ g1 + params['b_g2'])
      g_var = g_var + g2
  return params['w_out'] @ g_var + params['b_out']


if __name__ == "__main__":
  # B basic blocks, S instructions each, T tokens per instruction; E == H tied.
  # B=16 with block_batch=8 gives grid=(2,) so both v7x TensorCores are used.
  B, S, T, E, H, C, VOCAB = 16, 8, 6, 32, 32, 1, 64
  key = jax.random.PRNGKey(0)
  k_ids, k_params = jax.random.split(key)
  token_ids = jax.random.randint(k_ids, (B, S, T), 0, VOCAB, dtype=jnp.int32)
  params = init_params(k_params, VOCAB, E, H, C)

  out = hier_rnn_relational_forward(token_ids, params, block_batch=8)
  out = jax.block_until_ready(out)

  ref_fn = jax.jit(jax.vmap(reference_forward, in_axes=(0, None)))
  ref = jax.block_until_ready(ref_fn(token_ids, params))
  np.testing.assert_allclose(np.asarray(out), np.asarray(ref),
                             rtol=1e-3, atol=1e-3)
  print("KERNEL_OK")
</pallas_src>

<mosaic_0001>
module attributes {stable_mosaic.version = 11 : i64} {
  func.func @_hier_rnn_relational_kernel(%arg0: i32, %arg1: memref<1x384x32xf32, #tpu.memory_space<vmem>>, %arg2: memref<32x128xf32, #tpu.memory_space<vmem>>, %arg3: memref<32x128xf32, #tpu.memory_space<vmem>>, %arg4: memref<1x128xf32, #tpu.memory_space<vmem>>, %arg5: memref<32x128xf32, #tpu.memory_space<vmem>>, %arg6: memref<32x128xf32, #tpu.memory_space<vmem>>, %arg7: memref<1x128xf32, #tpu.memory_space<vmem>>, %arg8: memref<32x64xf32, #tpu.memory_space<vmem>>, %arg9: memref<1x32xf32, #tpu.memory_space<vmem>>, %arg10: memref<32x32xf32, #tpu.memory_space<vmem>>, %arg11: memref<1x32xf32, #tpu.memory_space<vmem>>, %arg12: memref<8x512xf32, #tpu.memory_space<vmem>>, %arg13: memref<1x8x32xf32, #tpu.memory_space<vmem>>) attributes {dimension_semantics = [#tpu.dimension_semantics<parallel>], iteration_bounds = array<i64: 2>, scalar_prefetch = 0 : i64, scratch_operands = 0 : i64, tpu.core_type = #tpu.core_type<tc>, window_params = [{transform_indices = @transform_0, window_bounds = array<i64: 1, 384, 32>}, {pipeline_mode = #tpu.pipeline_mode<synchronous>, transform_indices = @transform_1, window_bounds = array<i64: 32, 128>}, {pipeline_mode = #tpu.pipeline_mode<synchronous>, transform_indices = @transform_2, window_bounds = array<i64: 32, 128>}, {pipeline_mode = #tpu.pipeline_mode<synchronous>, transform_indices = @transform_3, window_bounds = array<i64: 1, 128>}, {pipeline_mode = #tpu.pipeline_mode<synchronous>, transform_indices = @transform_4, window_bounds = array<i64: 32, 128>}, {pipeline_mode = #tpu.pipeline_mode<synchronous>, transform_indices = @transform_5, window_bounds = array<i64: 32, 128>}, {pipeline_mode = #tpu.pipeline_mode<synchronous>, transform_indices = @transform_6, window_bounds = array<i64: 1, 128>}, {pipeline_mode = #tpu.pipeline_mode<synchronous>, transform_indices = @transform_7, window_bounds = array<i64: 32, 64>}, {pipeline_mode = #tpu.pipeline_mode<synchronous>, transform_indices = @transform_8, window_bounds = array<i64: 1, 32>}, {pipeline_mode = #tpu.pipeline_mode<synchronous>, transform_indices = @transform_9, window_bounds = array<i64: 32, 32>}, {pipeline_mode = #tpu.pipeline_mode<synchronous>, transform_indices = @transform_10, window_bounds = array<i64: 1, 32>}, {pipeline_mode = #tpu.pipeline_mode<synchronous>, transform_indices = @transform_11, window_bounds = array<i64: 8, 512>}, {transform_indices = @transform_12, window_bounds = array<i64: 1, 8, 32>}]} {
    %c0 = arith.constant 0 : index
    %c0_0 = arith.constant 0 : index
    %c0_1 = arith.constant 0 : index
    %0 = vector.load %arg1[%c0, %c0_0, %c0_1] : memref<1x384x32xf32, #tpu.memory_space<vmem>>, vector<1x384x32xf32>
    %1 = vector.shape_cast %0 : vector<1x384x32xf32> to vector<384x32xf32>
    %c0_2 = arith.constant 0 : index
    %c0_3 = arith.constant 0 : index
    %2 = vector.load %arg2[%c0_2, %c0_3] : memref<32x128xf32, #tpu.memory_space<vmem>>, vector<32x128xf32>
    %cst = arith.constant dense<0.000000e+00> : vector<384x128xf32>
    %3 = tpu.matmul %1, %2, %cst {dimension_numbers = #tpu.dot_dimension_numbers<[1], [0], [0], [1], [0, 0, 1, 1], [], []>} : vector<384x32xf32>, vector<32x128xf32>, vector<384x128xf32> -> vector<384x128xf32>
    %c0_4 = arith.constant 0 : index
    %c0_5 = arith.constant 0 : index
    %4 = vector.load %arg4[%c0_4, %c0_5] : memref<1x128xf32, #tpu.memory_space<vmem>>, vector<1x128xf32>
    %5 = vector.broadcast %4 : vector<1x128xf32> to vector<384x128xf32>
    %6 = arith.addf %3, %5 : vector<384x128xf32>
    %7 = vector.shape_cast %6 : vector<384x128xf32> to vector<6x64x128xf32>
    %c0_6 = arith.constant 0 : index
    %c0_7 = arith.constant 0 : index
    %8 = vector.load %arg3[%c0_6, %c0_7] : memref<32x128xf32, #tpu.memory_space<vmem>>, vector<32x128xf32>
    %cst_8 = arith.constant 0.000000e+00 : f32
    %9 = vector.broadcast %cst_8 : f32 to vector<64x32xf32>
    %cst_9 = arith.constant 0.000000e+00 : f32
    %10 = vector.broadcast %cst_9 : f32 to vector<64x32xf32>
    %11 = vector.extract_strided_slice %7 {offsets = [0, 0, 0], sizes = [1, 64, 128], strides = [1, 1, 1]} : vector<6x64x128xf32> to vector<1x64x128xf32>
    %12 = vector.shape_cast %11 : vector<1x64x128xf32> to vector<64x128xf32>
    %cst_10 = arith.constant dense<0.000000e+00> : vector<64x128xf32>
    %13 = tpu.matmul %9, %8, %cst_10 {dimension_numbers = #tpu.dot_dimension_numbers<[1], [0], [0], [1], [0, 0, 1, 1], [], []>} : vector<64x32xf32>, vector<32x128xf32>, vector<64x128xf32> -> vector<64x128xf32>
    %14 = arith.addf %12, %13 : vector<64x128xf32>
    %15 = arith.negf %14 : vector<64x128xf32>
    %16 = math.exp %15 : vector<64x128xf32>
    %cst_11 = arith.constant 1.000000e+00 : f32
    %17 = vector.broadcast %cst_11 : f32 to vector<64x128xf32>
    %18 = arith.addf %17, %16 : vector<64x128xf32>
    %19 = arith.divf %17, %18 : vector<64x128xf32>
    %20 = math.tanh %14 : vector<64x128xf32>
    %21 = vector.extract_strided_slice %19 {offsets = [0, 0], sizes = [64, 32], strides = [1, 1]} : vector<64x128xf32> to vector<64x32xf32>
    %22 = vector.extract_strided_slice %19 {offsets = [0, 32], sizes = [64, 32], strides = [1, 1]} : vector<64x128xf32> to vector<64x32xf32>
    %23 = vector.extract_strided_slice %20 {offsets = [0, 64], sizes = [64, 32], strides = [1, 1]} : vector<64x128xf32> to vector<64x32xf32>
    %24 = vector.extract_strided_slice %19 {offsets = [0, 96], sizes = [64, 32], strides = [1, 1]} : vector<64x128xf32> to vector<64x32xf32>
    %25 = arith.mulf %22, %10 : vector<64x32xf32>
    %26 = arith.mulf %21, %23 : vector<64x32xf32>
    %27 = arith.addf %25, %26 : vector<64x32xf32>
    %28 = math.tanh %27 : vector<64x32xf32>
    %29 = arith.mulf %24, %28 : vector<64x32xf32>
    %30 = vector.extract_strided_slice %7 {offsets = [1, 0, 0], sizes = [1, 64, 128], strides = [1, 1, 1]} : vector<6x64x128xf32> to vector<1x64x128xf32>
    %31 = vector.shape_cast %30 : vector<1x64x128xf32> to vector<64x128xf32>
    %cst_12 = arith.constant dense<0.000000e+00> : vector<64x128xf32>
    %32 = tpu.matmul %29, %8, %cst_12 {dimension_numbers = #tpu.dot_dimension_numbers<[1], [0], [0], [1], [0, 0, 1, 1], [], []>} : vector<64x32xf32>, vector<32x128xf32>, vector<64x128xf32> -> vector<64x128xf32>
    %33 = arith.addf %31, %32 : vector<64x128xf32>
    %34 = arith.negf %33 : vector<64x128xf32>
    %35 = math.exp %34 : vector<64x128xf32>
    %cst_13 = arith.constant 1.000000e+00 : f32
    %36 = vector.broadcast %cst_13 : f32 to vector<64x128xf32>
    %37 = arith.addf %36, %35 : vector<64x128xf32>
    %38 = arith.divf %36, %37 : vector<64x128xf32>
    %39 = math.tanh %33 : vector<64x128xf32>
    %40 = vector.extract_strided_slice %38 {offsets = [0, 0], sizes = [64, 32], strides = [1, 1]} : vector<64x128xf32> to vector<64x32xf32>
    %41 = vector.extract_strided_slice %38 {offsets = [0, 32], sizes = [64, 32], strides = [1, 1]} : vector<64x128xf32> to vector<64x32xf32>
    %42 = vector.extract_strided_slice %39 {offsets = [0, 64], sizes = [64, 32], strides = [1, 1]} : vector<64x128xf32> to vector<64x32xf32>
    %43 = vector.extract_strided_slice %38 {offsets = [0, 96], sizes = [64, 32], strides = [1, 1]} : vector<64x128xf32> to vector<64x32xf32>
    %44 = arith.mulf %41, %27 : vector<64x32xf32>
    %45 = arith.mulf %40, %42 : vector<64x32xf32>
    %46 = arith.addf %44, %45 : vector<64x32xf32>
    %47 = math.tanh %46 : vector<64x32xf32>
    %48 = arith.mulf %43, %47 : vector<64x32xf32>
    %49 = vector.extract_strided_slice %7 {offsets = [2, 0, 0], sizes = [1, 64, 128], strides = [1, 1, 1]} : vector<6x64x128xf32> to vector<1x64x128xf32>
    %50 = vector.shape_cast %49 : vector<1x64x128xf32> to vector<64x128xf32>
    %cst_14 = arith.constant dense<0.000000e+00> : vector<64x128xf32>
    %51 = tpu.matmul %48, %8, %cst_14 {dimension_numbers = #tpu.dot_dimension_numbers<[1], [0], [0], [1], [0, 0, 1, 1], [], []>} : vector<64x32xf32>, vector<32x128xf32>, vector<64x128xf32> -> vector<64x128xf32>
    %52 = arith.addf %50, %51 : vector<64x128xf32>
    %53 = arith.negf %52 : vector<64x128xf32>
    %54 = math.exp %53 : vector<64x128xf32>
    %cst_15 = arith.constant 1.000000e+00 : f32
    %55 = vector.broadcast %cst_15 : f32 to vector<64x128xf32>
    %56 = arith.addf %55, %54 : vector<64x128xf32>
    %57 = arith.divf %55, %56 : vector<64x128xf32>
    %58 = math.tanh %52 : vector<64x128xf32>
    %59 = vector.extract_strided_slice %57 {offsets = [0, 0], sizes = [64, 32], strides = [1, 1]} : vector<64x128xf32> to vector<64x32xf32>
    %60 = vector.extract_strided_slice %57 {offsets = [0, 32], sizes = [64, 32], strides = [1, 1]} : vector<64x128xf32> to vector<64x32xf32>
    %61 = vector.extract_strided_slice %58 {offsets = [0, 64], sizes = [64, 32], strides = [1, 1]} : vector<64x128xf32> to vector<64x32xf32>
    %62 = vector.extract_strided_slice %57 {offsets = [0, 96], sizes = [64, 32], strides = [1, 1]} : vector<64x128xf32> to vector<64x32xf32>
    %63 = arith.mulf %60, %46 : vector<64x32xf32>
    %64 = arith.mulf %59, %61 : vector<64x32xf32>
    %65 = arith.addf %63, %64 : vector<64x32xf32>
    %66 = math.tanh %65 : vector<64x32xf32>
    %67 = arith.mulf %62, %66 : vector<64x32xf32>
    %68 = vector.extract_strided_slice %7 {offsets = [3, 0, 0], sizes = [1, 64, 128], strides = [1, 1, 1]} : vector<6x64x128xf32> to vector<1x64x128xf32>
    %69 = vector.shape_cast %68 : vector<1x64x128xf32> to vector<64x128xf32>
    %cst_16 = arith.constant dense<0.000000e+00> : vector<64x128xf32>
    %70 = tpu.matmul %67, %8, %cst_16 {dimension_numbers = #tpu.dot_dimension_numbers<[1], [0], [0], [1], [0, 0, 1, 1], [], []>} : vector<64x32xf32>, vector<32x128xf32>, vector<64x128xf32> -> vector<64x128xf32>
    %71 = arith.addf %69, %70 : vector<64x128xf32>
    %72 = arith.negf %71 : vector<64x128xf32>
    %73 = math.exp %72 : vector<64x128xf32>
    %cst_17 = arith.constant 1.000000e+00 : f32
    %74 = vector.broadcast %cst_17 : f32 to vector<64x128xf32>
    %75 = arith.addf %74, %73 : vector<64x128xf32>
    %76 = arith.divf %74, %75 : vector<64x128xf32>
    %77 = math.tanh %71 : vector<64x128xf32>
    %78 = vector.extract_strided_slice %76 {offsets = [0, 0], sizes = [64, 32], strides = [1, 1]} : vector<64x128xf32> to vector<64x32xf32>
    %79 = vector.extract_strided_slice %76 {offsets = [0, 32], sizes = [64, 32], strides = [1, 1]} : vector<64x128xf32> to vector<64x32xf32>
    %80 = vector.extract_strided_slice %77 {offsets = [0, 64], sizes = [64, 32], strides = [1, 1]} : vector<64x128xf32> to vector<64x32xf32>
    %81 = vector.extract_strided_slice %76 {offsets = [0, 96], sizes = [64, 32], strides = [1, 1]} : vector<64x128xf32> to vector<64x32xf32>
    %82 = arith.mulf %79, %65 : vector<64x32xf32>
    %83 = arith.mulf %78, %80 : vector<64x32xf32>
    %84 = arith.addf %82, %83 : vector<64x32xf32>
    %85 = math.tanh %84 : vector<64x32xf32>
    %86 = arith.mulf %81, %85 : vector<64x32xf32>
    %87 = vector.extract_strided_slice %7 {offsets = [4, 0, 0], sizes = [1, 64, 128], strides = [1, 1, 1]} : vector<6x64x128xf32> to vector<1x64x128xf32>
    %88 = vector.shape_cast %87 : vector<1x64x128xf32> to vector<64x128xf32>
    %cst_18 = arith.constant dense<0.000000e+00> : vector<64x128xf32>
    %89 = tpu.matmul %86, %8, %cst_18 {dimension_numbers = #tpu.dot_dimension_numbers<[1], [0], [0], [1], [0, 0, 1, 1], [], []>} : vector<64x32xf32>, vector<32x128xf32>, vector<64x128xf32> -> vector<64x128xf32>
    %90 = arith.addf %88, %89 : vector<64x128xf32>
    %91 = arith.negf %90 : vector<64x128xf32>
    %92 = math.exp %91 : vector<64x128xf32>
    %cst_19 = arith.constant 1.000000e+00 : f32
    %93 = vector.broadcast %cst_19 : f32 to vector<64x128xf32>
    %94 = arith.addf %93, %92 : vector<64x128xf32>
    %95 = arith.divf %93, %94 : vector<64x128xf32>
    %96 = math.tanh %90 : vector<64x128xf32>
    %97 = vector.extract_strided_slice %95 {offsets = [0, 0], sizes = [64, 32], strides = [1, 1]} : vector<64x128xf32> to vector<64x32xf32>
    %98 = vector.extract_strided_slice %95 {offsets = [0, 32], sizes = [64, 32], strides = [1, 1]} : vector<64x128xf32> to vector<64x32xf32>
    %99 = vector.extract_strided_slice %96 {offsets = [0, 64], sizes = [64, 32], strides = [1, 1]} : vector<64x128xf32> to vector<64x32xf32>
    %100 = vector.extract_strided_slice %95 {offsets = [0, 96], sizes = [64, 32], strides = [1, 1]} : vector<64x128xf32> to vector<64x32xf32>
    %101 = arith.mulf %98, %84 : vector<64x32xf32>
    %102 = arith.mulf %97, %99 : vector<64x32xf32>
    %103 = arith.addf %101, %102 : vector<64x32xf32>
    %104 = math.tanh %103 : vector<64x32xf32>
    %105 = arith.mulf %100, %104 : vector<64x32xf32>
    %106 = vector.extract_strided_slice %7 {offsets = [5, 0, 0], sizes = [1, 64, 128], strides = [1, 1, 1]} : vector<6x64x128xf32> to vector<1x64x128xf32>
    %107 = vector.shape_cast %106 : vector<1x64x128xf32> to vector<64x128xf32>
    %cst_20 = arith.constant dense<0.000000e+00> : vector<64x128xf32>
    %108 = tpu.matmul %105, %8, %cst_20 {dimension_numbers = #tpu.dot_dimension_numbers<[1], [0], [0], [1], [0, 0, 1, 1], [], []>} : vector<64x32xf32>, vector<32x128xf32>, vector<64x128xf32> -> vector<64x128xf32>
    %109 = arith.addf %107, %108 : vector<64x128xf32>
    %110 = arith.negf %109 : vector<64x128xf32>
    %111 = math.exp %110 : vector<64x128xf32>
    %cst_21 = arith.constant 1.000000e+00 : f32
    %112 = vector.broadcast %cst_21 : f32 to vector<64x128xf32>
    %113 = arith.addf %112, %111 : vector<64x128xf32>
    %114 = arith.divf %112, %113 : vector<64x128xf32>
    %115 = math.tanh %109 : vector<64x128xf32>
    %116 = vector.extract_strided_slice %114 {offsets = [0, 0], sizes = [64, 32], strides = [1, 1]} : vector<64x128xf32> to vector<64x32xf32>
    %117 = vector.extract_strided_slice %114 {offsets = [0, 32], sizes = [64, 32], strides = [1, 1]} : vector<64x128xf32> to vector<64x32xf32>
    %118 = vector.extract_strided_slice %115 {offsets = [0, 64], sizes = [64, 32], strides = [1, 1]} : vector<64x128xf32> to vector<64x32xf32>
    %119 = vector.extract_strided_slice %114 {offsets = [0, 96], sizes = [64, 32], strides = [1, 1]} : vector<64x128xf32> to vector<64x32xf32>
    %120 = arith.mulf %117, %103 : vector<64x32xf32>
    %121 = arith.mulf %116, %118 : vector<64x32xf32>
    %122 = arith.addf %120, %121 : vector<64x32xf32>
    %123 = math.tanh %122 : vector<64x32xf32>
    %124 = arith.mulf %119, %123 : vector<64x32xf32>
    %c0_22 = arith.constant 0 : index
    %c0_23 = arith.constant 0 : index
    %125 = vector.load %arg5[%c0_22, %c0_23] : memref<32x128xf32, #tpu.memory_space<vmem>>, vector<32x128xf32>
    %cst_24 = arith.constant dense<0.000000e+00> : vector<64x128xf32>
    %126 = tpu.matmul %124, %125, %cst_24 {dimension_numbers = #tpu.dot_dimension_numbers<[1], [0], [0], [1], [0, 0, 1, 1], [], []>} : vector<64x32xf32>, vector<32x128xf32>, vector<64x128xf32> -> vector<64x128xf32>
    %c0_25 = arith.constant 0 : index
    %c0_26 = arith.constant 0 : index
    %127 = vector.load %arg7[%c0_25, %c0_26] : memref<1x128xf32, #tpu.memory_space<vmem>>, vector<1x128xf32>
    %128 = vector.broadcast %127 : vector<1x128xf32> to vector<64x128xf32>
    %129 = arith.addf %126, %128 : vector<64x128xf32>
    %130 = vector.shape_cast %129 : vector<64x128xf32> to vector<8x8x128xf32>
    %c0_27 = arith.constant 0 : index
    %c0_28 = arith.constant 0 : index
    %131 = vector.load %arg6[%c0_27, %c0_28] : memref<32x128xf32, #tpu.memory_space<vmem>>, vector<32x128xf32>
    %cst_29 = arith.constant 0.000000e+00 : f32
    %132 = vector.broadcast %cst_29 : f32 to vector<8x32xf32>
    %cst_30 = arith.constant 0.000000e+00 : f32
    %133 = vector.broadcast %cst_30 : f32 to vector<8x32xf32>
    %134 = vector.extract_strided_slice %130 {offsets = [0, 0, 0], sizes = [1, 8, 128], strides = [1, 1, 1]} : vector<8x8x128xf32> to vector<1x8x128xf32>
    %135 = vector.shape_cast %134 : vector<1x8x128xf32> to vector<8x128xf32>
    %cst_31 = arith.constant dense<0.000000e+00> : vector<8x128xf32>
    %136 = tpu.matmul %132, %131, %cst_31 {dimension_numbers = #tpu.dot_dimension_numbers<[1], [0], [0], [1], [0, 0, 1, 1], [], []>} : vector<8x32xf32>, vector<32x128xf32>, vector<8x128xf32> -> vector<8x128xf32>
    %137 = arith.addf %135, %136 : vector<8x128xf32>
    %138 = arith.negf %137 : vector<8x128xf32>
    %139 = math.exp %138 : vector<8x128xf32>
    %cst_32 = arith.constant 1.000000e+00 : f32
    %140 = vector.broadcast %cst_32 : f32 to vector<8x128xf32>
    %141 = arith.addf %140, %139 : vector<8x128xf32>
    %142 = arith.divf %140, %141 : vector<8x128xf32>
    %143 = math.tanh %137 : vector<8x128xf32>
    %144 = vector.extract_strided_slice %142 {offsets = [0, 0], sizes = [8, 32], strides = [1, 1]} : vector<8x128xf32> to vector<8x32xf32>
    %145 = vector.extract_strided_slice %142 {offsets = [0, 32], sizes = [8, 32], strides = [1, 1]} : vector<8x128xf32> to vector<8x32xf32>
    %146 = vector.extract_strided_slice %143 {offsets = [0, 64], sizes = [8, 32], strides = [1, 1]} : vector<8x128xf32> to vector<8x32xf32>
    %147 = vector.extract_strided_slice %142 {offsets = [0, 96], sizes = [8, 32], strides = [1, 1]} : vector<8x128xf32> to vector<8x32xf32>
    %148 = arith.mulf %145, %133 : vector<8x32xf32>
    %149 = arith.mulf %144, %146 : vector<8x32xf32>
    %150 = arith.addf %148, %149 : vector<8x32xf32>
    %151 = math.tanh %150 : vector<8x32xf32>
    %152 = arith.mulf %147, %151 : vector<8x32xf32>
    %153 = vector.extract_strided_slice %130 {offsets = [1, 0, 0], sizes = [1, 8, 128], strides = [1, 1, 1]} : vector<8x8x128xf32> to vector<1x8x128xf32>
    %154 = vector.shape_cast %153 : vector<1x8x128xf32> to vector<8x128xf32>
    %cst_33 = arith.constant dense<0.000000e+00> : vector<8x128xf32>
    %155 = tpu.matmul %152, %131, %cst_33 {dimension_numbers = #tpu.dot_dimension_numbers<[1], [0], [0], [1], [0, 0, 1, 1], [], []>} : vector<8x32xf32>, vector<32x128xf32>, vector<8x128xf32> -> vector<8x128xf32>
    %156 = arith.addf %154, %155 : vector<8x128xf32>
    %157 = arith.negf %156 : vector<8x128xf32>
    %158 = math.exp %157 : vector<8x128xf32>
    %cst_34 = arith.constant 1.000000e+00 : f32
    %159 = vector.broadcast %cst_34 : f32 to vector<8x128xf32>
    %160 = arith.addf %159, %158 : vector<8x128xf32>
    %161 = arith.divf %159, %160 : vector<8x128xf32>
    %162 = math.tanh %156 : vector<8x128xf32>
    %163 = vector.extract_strided_slice %161 {offsets = [0, 0], sizes = [8, 32], strides = [1, 1]} : vector<8x128xf32> to vector<8x32xf32>
    %164 = vector.extract_strided_slice %161 {offsets = [0, 32], sizes = [8, 32], strides = [1, 1]} : vector<8x128xf32> to vector<8x32xf32>
    %165 = vector.extract_strided_slice %162 {offsets = [0, 64], sizes = [8, 32], strides = [1, 1]} : vector<8x128xf32> to vector<8x32xf32>
    %166 = vector.extract_strided_slice %161 {offsets = [0, 96], sizes = [8, 32], strides = [1, 1]} : vector<8x128xf32> to vector<8x32xf32>
    %167 = arith.mulf %164, %150 : vector<8x32xf32>
    %168 = arith.mulf %163, %165 : vector<8x32xf32>
    %169 = arith.addf %167, %168 : vector<8x32xf32>
    %170 = math.tanh %169 : vector<8x32xf32>
    %171 = arith.mulf %166, %170 : vector<8x32xf32>
    %172 = vector.extract_strided_slice %130 {offsets = [2, 0, 0], sizes = [1, 8, 128], strides = [1, 1, 1]} : vector<8x8x128xf32> to vector<1x8x128xf32>
    %173 = vector.shape_cast %172 : vector<1x8x128xf32> to vector<8x128xf32>
    %cst_35 = arith.constant dense<0.000000e+00> : vector<8x128xf32>
    %174 = tpu.matmul %171, %131, %cst_35 {dimension_numbers = #tpu.dot_dimension_numbers<[1], [0], [0], [1], [0, 0, 1, 1], [], []>} : vector<8x32xf32>, vector<32x128xf32>, vector<8x128xf32> -> vector<8x128xf32>
    %175 = arith.addf %173, %174 : vector<8x128xf32>
    %176 = arith.negf %175 : vector<8x128xf32>
    %177 = math.exp %176 : vector<8x128xf32>
    %cst_36 = arith.constant 1.000000e+00 : f32
    %178 = vector.broadcast %cst_36 : f32 to vector<8x128xf32>
    %179 = arith.addf %178, %177 : vector<8x128xf32>
    %180 = arith.divf %178, %179 : vector<8x128xf32>
    %181 = math.tanh %175 : vector<8x128xf32>
    %182 = vector.extract_strided_slice %180 {offsets = [0, 0], sizes = [8, 32], strides = [1, 1]} : vector<8x128xf32> to vector<8x32xf32>
    %183 = vector.extract_strided_slice %180 {offsets = [0, 32], sizes = [8, 32], strides = [1, 1]} : vector<8x128xf32> to vector<8x32xf32>
    %184 = vector.extract_strided_slice %181 {offsets = [0, 64], sizes = [8, 32], strides = [1, 1]} : vector<8x128xf32> to vector<8x32xf32>
    %185 = vector.extract_strided_slice %180 {offsets = [0, 96], sizes = [8, 32], strides = [1, 1]} : vector<8x128xf32> to vector<8x32xf32>
    %186 = arith.mulf %183, %169 : vector<8x32xf32>
    %187 = arith.mulf %182, %184 : vector<8x32xf32>
    %188 = arith.addf %186, %187 : vector<8x32xf32>
    %189 = math.tanh %188 : vector<8x32xf32>
    %190 = arith.mulf %185, %189 : vector<8x32xf32>
    %191 = vector.extract_strided_slice %130 {offsets = [3, 0, 0], sizes = [1, 8, 128], strides = [1, 1, 1]} : vector<8x8x128xf32> to vector<1x8x128xf32>
    %192 = vector.shape_cast %191 : vector<1x8x128xf32> to vector<8x128xf32>
    %cst_37 = arith.constant dense<0.000000e+00> : vector<8x128xf32>
    %193 = tpu.matmul %190, %131, %cst_37 {dimension_numbers = #tpu.dot_dimension_numbers<[1], [0], [0], [1], [0, 0, 1, 1], [], []>} : vector<8x32xf32>, vector<32x128xf32>, vector<8x128xf32> -> vector<8x128xf32>
    %194 = arith.addf %192, %193 : vector<8x128xf32>
    %195 = arith.negf %194 : vector<8x128xf32>
    %196 = math.exp %195 : vector<8x128xf32>
    %cst_38 = arith.constant 1.000000e+00 : f32
    %197 = vector.broadcast %cst_38 : f32 to vector<8x128xf32>
    %198 = arith.addf %197, %196 : vector<8x128xf32>
    %199 = arith.divf %197, %198 : vector<8x128xf32>
    %200 = math.tanh %194 : vector<8x128xf32>
    %201 = vector.extract_strided_slice %199 {offsets = [0, 0], sizes = [8, 32], strides = [1, 1]} : vector<8x128xf32> to vector<8x32xf32>
    %202 = vector.extract_strided_slice %199 {offsets = [0, 32], sizes = [8, 32], strides = [1, 1]} : vector<8x128xf32> to vector<8x32xf32>
    %203 = vector.extract_strided_slice %200 {offsets = [0, 64], sizes = [8, 32], strides = [1, 1]} : vector<8x128xf32> to vector<8x32xf32>
    %204 = vector.extract_strided_slice %199 {offsets = [0, 96], sizes = [8, 32], strides = [1, 1]} : vector<8x128xf32> to vector<8x32xf32>
    %205 = arith.mulf %202, %188 : vector<8x32xf32>
    %206 = arith.mulf %201, %203 : vector<8x32xf32>
    %207 = arith.addf %205, %206 : vector<8x32xf32>
    %208 = math.tanh %207 : vector<8x32xf32>
    %209 = arith.mulf %204, %208 : vector<8x32xf32>
    %210 = vector.extract_strided_slice %130 {offsets = [4, 0, 0], sizes = [1, 8, 128], strides = [1, 1, 1]} : vector<8x8x128xf32> to vector<1x8x128xf32>
    %211 = vector.shape_cast %210 : vector<1x8x128xf32> to vector<8x128xf32>
    %cst_39 = arith.constant dense<0.000000e+00> : vector<8x128xf32>
    %212 = tpu.matmul %209, %131, %cst_39 {dimension_numbers = #tpu.dot_dimension_numbers<[1], [0], [0], [1], [0, 0, 1, 1], [], []>} : vector<8x32xf32>, vector<32x128xf32>, vector<8x128xf32> -> vector<8x128xf32>
    %213 = arith.addf %211, %212 : vector<8x128xf32>
    %214 = arith.negf %213 : vector<8x128xf32>
    %215 = math.exp %214 : vector<8x128xf32>
    %cst_40 = arith.constant 1.000000e+00 : f32
    %216 = vector.broadcast %cst_40 : f32 to vector<8x128xf32>
    %217 = arith.addf %216, %215 : vector<8x128xf32>
    %218 = arith.divf %216, %217 : vector<8x128xf32>
    %219 = math.tanh %213 : vector<8x128xf32>
    %220 = vector.extract_strided_slice %218 {offsets = [0, 0], sizes = [8, 32], strides = [1, 1]} : vector<8x128xf32> to vector<8x32xf32>
    %221 = vector.extract_strided_slice %218 {offsets = [0, 32], sizes = [8, 32], strides = [1, 1]} : vector<8x128xf32> to vector<8x32xf32>
    %222 = vector.extract_strided_slice %219 {offsets = [0, 64], sizes = [8, 32], strides = [1, 1]} : vector<8x128xf32> to vector<8x32xf32>
    %223 = vector.extract_strided_slice %218 {offsets = [0, 96], sizes = [8, 32], strides = [1, 1]} : vector<8x128xf32> to vector<8x32xf32>
    %224 = arith.mulf %221, %207 : vector<8x32xf32>
    %225 = arith.mulf %220, %222 : vector<8x32xf32>
    %226 = arith.addf %224, %225 : vector<8x32xf32>
    %227 = math.tanh %226 : vector<8x32xf32>
    %228 = arith.mulf %223, %227 : vector<8x32xf32>
    %229 = vector.extract_strided_slice %130 {offsets = [5, 0, 0], sizes = [1, 8, 128], strides = [1, 1, 1]} : vector<8x8x128xf32> to vector<1x8x128xf32>
    %230 = vector.shape_cast %229 : vector<1x8x128xf32> to vector<8x128xf32>
    %cst_41 = arith.constant dense<0.000000e+00> : vector<8x128xf32>
    %231 = tpu.matmul %228, %131, %cst_41 {dimension_numbers = #tpu.dot_dimension_numbers<[1], [0], [0], [1], [0, 0, 1, 1], [], []>} : vector<8x32xf32>, vector<32x128xf32>, vector<8x128xf32> -> vector<8x128xf32>
    %232 = arith.addf %230, %231 : vector<8x128xf32>
    %233 = arith.negf %232 : vector<8x128xf32>
    %234 = math.exp %233 : vector<8x128xf32>
    %cst_42 = arith.constant 1.000000e+00 : f32
    %235 = vector.broadcast %cst_42 : f32 to vector<8x128xf32>
    %236 = arith.addf %235, %234 : vector<8x128xf32>
    %237 = arith.divf %235, %236 : vector<8x128xf32>
    %238 = math.tanh %232 : vector<8x128xf32>
    %239 = vector.extract_strided_slice %237 {offsets = [0, 0], sizes = [8, 32], strides = [1, 1]} : vector<8x128xf32> to vector<8x32xf32>
    %240 = vector.extract_strided_slice %237 {offsets = [0, 32], sizes = [8, 32], strides = [1, 1]} : vector<8x128xf32> to vector<8x32xf32>
    %241 = vector.extract_strided_slice %238 {offsets = [0, 64], sizes = [8, 32], strides = [1, 1]} : vector<8x128xf32> to vector<8x32xf32>
    %242 = vector.extract_strided_slice %237 {offsets = [0, 96], sizes = [8, 32], strides = [1, 1]} : vector<8x128xf32> to vector<8x32xf32>
    %243 = arith.mulf %240, %226 : vector<8x32xf32>
    %244 = arith.mulf %239, %241 : vector<8x32xf32>
    %245 = arith.addf %243, %244 : vector<8x32xf32>
    %246 = math.tanh %245 : vector<8x32xf32>
    %247 = arith.mulf %242, %246 : vector<8x32xf32>
    %248 = vector.extract_strided_slice %130 {offsets = [6, 0, 0], sizes = [1, 8, 128], strides = [1, 1, 1]} : vector<8x8x128xf32> to vector<1x8x128xf32>
    %249 = vector.shape_cast %248 : vector<1x8x128xf32> to vector<8x128xf32>
    %cst_43 = arith.constant dense<0.000000e+00> : vector<8x128xf32>
    %250 = tpu.matmul %247, %131, %cst_43 {dimension_numbers = #tpu.dot_dimension_numbers<[1], [0], [0], [1], [0, 0, 1, 1], [], []>} : vector<8x32xf32>, vector<32x128xf32>, vector<8x128xf32> -> vector<8x128xf32>
    %251 = arith.addf %249, %250 : vector<8x128xf32>
    %252 = arith.negf %251 : vector<8x128xf32>
    %253 = math.exp %252 : vector<8x128xf32>
    %cst_44 = arith.constant 1.000000e+00 : f32
    %254 = vector.broadcast %cst_44 : f32 to vector<8x128xf32>
    %255 = arith.addf %254, %253 : vector<8x128xf32>
    %256 = arith.divf %254, %255 : vector<8x128xf32>
    %257 = math.tanh %251 : vector<8x128xf32>
    %258 = vector.extract_strided_slice %256 {offsets = [0, 0], sizes = [8, 32], strides = [1, 1]} : vector<8x128xf32> to vector<8x32xf32>
    %259 = vector.extract_strided_slice %256 {offsets = [0, 32], sizes = [8, 32], strides = [1, 1]} : vector<8x128xf32> to vector<8x32xf32>
    %260 = vector.extract_strided_slice %257 {offsets = [0, 64], sizes = [8, 32], strides = [1, 1]} : vector<8x128xf32> to vector<8x32xf32>
    %261 = vector.extract_strided_slice %256 {offsets = [0, 96], sizes = [8, 32], strides = [1, 1]} : vector<8x128xf32> to vector<8x32xf32>
    %262 = arith.mulf %259, %245 : vector<8x32xf32>
    %263 = arith.mulf %258, %260 : vector<8x32xf32>
    %264 = arith.addf %262, %263 : vector<8x32xf32>
    %265 = math.tanh %264 : vector<8x32xf32>
    %266 = arith.mulf %261, %265 : vector<8x32xf32>
    %267 = vector.extract_strided_slice %130 {offsets = [7, 0, 0], sizes = [1, 8, 128], strides = [1, 1, 1]} : vector<8x8x128xf32> to vector<1x8x128xf32>
    %268 = vector.shape_cast %267 : vector<1x8x128xf32> to vector<8x128xf32>
    %cst_45 = arith.constant dense<0.000000e+00> : vector<8x128xf32>
    %269 = tpu.matmul %266, %131, %cst_45 {dimension_numbers = #tpu.dot_dimension_numbers<[1], [0], [0], [1], [0, 0, 1, 1], [], []>} : vector<8x32xf32>, vector<32x128xf32>, vector<8x128xf32> -> vector<8x128xf32>
    %270 = arith.addf %268, %269 : vector<8x128xf32>
    %271 = arith.negf %270 : vector<8x128xf32>
    %272 = math.exp %271 : vector<8x128xf32>
    %cst_46 = arith.constant 1.000000e+00 : f32
    %273 = vector.broadcast %cst_46 : f32 to vector<8x128xf32>
    %274 = arith.addf %273, %272 : vector<8x128xf32>
    %275 = arith.divf %273, %274 : vector<8x128xf32>
    %276 = math.tanh %270 : vector<8x128xf32>
    %277 = vector.extract_strided_slice %275 {offsets = [0, 0], sizes = [8, 32], strides = [1, 1]} : vector<8x128xf32> to vector<8x32xf32>
    %278 = vector.extract_strided_slice %275 {offsets = [0, 32], sizes = [8, 32], strides = [1, 1]} : vector<8x128xf32> to vector<8x32xf32>
    %279 = vector.extract_strided_slice %276 {offsets = [0, 64], sizes = [8, 32], strides = [1, 1]} : vector<8x128xf32> to vector<8x32xf32>
    %280 = vector.extract_strided_slice %275 {offsets = [0, 96], sizes = [8, 32], strides = [1, 1]} : vector<8x128xf32> to vector<8x32xf32>
    %281 = arith.mulf %278, %264 : vector<8x32xf32>
    %282 = arith.mulf %277, %279 : vector<8x32xf32>
    %283 = arith.addf %281, %282 : vector<8x32xf32>
    %284 = math.tanh %283 : vector<8x32xf32>
    %285 = arith.mulf %280, %284 : vector<8x32xf32>
    %286 = tpu.concatenate %152, %171, %190, %209, %228, %247, %266, %285 in 0 : vector<8x32xf32>, vector<8x32xf32>, vector<8x32xf32>, vector<8x32xf32>, vector<8x32xf32>, vector<8x32xf32>, vector<8x32xf32>, vector<8x32xf32> -> vector<64x32xf32>
    %c0_47 = arith.constant 0 : index
    %c0_48 = arith.constant 0 : index
    %287 = vector.load %arg8[%c0_47, %c0_48] : memref<32x64xf32, #tpu.memory_space<vmem>>, vector<32x64xf32>
    %cst_49 = arith.constant dense<0.000000e+00> : vector<64x64xf32>
    %288 = tpu.matmul %286, %287, %cst_49 {dimension_numbers = #tpu.dot_dimension_numbers<[1], [0], [0], [1], [0, 0, 1, 1], [], []>} : vector<64x32xf32>, vector<32x64xf32>, vector<64x64xf32> -> vector<64x64xf32>
    %289 = vector.extract_strided_slice %288 {offsets = [0, 0], sizes = [64, 32], strides = [1, 1]} : vector<64x64xf32> to vector<64x32xf32>
    %290 = vector.shape_cast %289 : vector<64x32xf32> to vector<8x8x32xf32>
    %291 = vector.extract_strided_slice %288 {offsets = [0, 32], sizes = [64, 32], strides = [1, 1]} : vector<64x64xf32> to vector<64x32xf32>
    %c0_50 = arith.constant 0 : index
    %c0_51 = arith.constant 0 : index
    %292 = vector.load %arg9[%c0_50, %c0_51] : memref<1x32xf32, #tpu.memory_space<vmem>>, vector<1x32xf32>
    %293 = vector.broadcast %292 : vector<1x32xf32> to vector<64x32xf32>
    %294 = arith.addf %291, %293 : vector<64x32xf32>
    %295 = vector.shape_cast %294 : vector<64x32xf32> to vector<8x8x32xf32>
    %296 = vector.shape_cast %290 : vector<8x8x32xf32> to vector<8x1x8x32xf32>
    %297 = vector.shape_cast %295 : vector<8x8x32xf32> to vector<1x8x8x32xf32>
    %298 = vector.broadcast %296 : vector<8x1x8x32xf32> to vector<8x8x8x32xf32>
    %299 = vector.broadcast %297 : vector<1x8x8x32xf32> to vector<8x8x8x32xf32>
    %300 = arith.addf %298, %299 : vector<8x8x8x32xf32>
    %cst_52 = arith.constant 0.000000e+00 : f32
    %301 = vector.broadcast %cst_52 : f32 to vector<8x8x8x32xf32>
    %302 = arith.maximumf %300, %301 : vector<8x8x8x32xf32>
    %303 = vector.shape_cast %302 : vector<8x8x8x32xf32> to vector<512x32xf32>
    %c0_53 = arith.constant 0 : index
    %c0_54 = arith.constant 0 : index
    %304 = vector.load %arg10[%c0_53, %c0_54] : memref<32x32xf32, #tpu.memory_space<vmem>>, vector<32x32xf32>
    %cst_55 = arith.constant dense<0.000000e+00> : vector<512x32xf32>
    %305 = tpu.matmul %303, %304, %cst_55 {dimension_numbers = #tpu.dot_dimension_numbers<[1], [0], [0], [1], [0, 0, 1, 1], [], []>} : vector<512x32xf32>, vector<32x32xf32>, vector<512x32xf32> -> vector<512x32xf32>
    %c0_56 = arith.constant 0 : index
    %c0_57 = arith.constant 0 : index
    %306 = vector.load %arg11[%c0_56, %c0_57] : memref<1x32xf32, #tpu.memory_space<vmem>>, vector<1x32xf32>
    %307 = vector.broadcast %306 : vector<1x32xf32> to vector<512x32xf32>
    %308 = arith.addf %305, %307 : vector<512x32xf32>
    %cst_58 = arith.constant 0.000000e+00 : f32
    %309 = vector.broadcast %cst_58 : f32 to vector<512x32xf32>
    %310 = arith.maximumf %308, %309 : vector<512x32xf32>
    %c0_59 = arith.constant 0 : index
    %c0_60 = arith.constant 0 : index
    %311 = vector.load %arg12[%c0_59, %c0_60] : memref<8x512xf32, #tpu.memory_space<vmem>>, vector<8x512xf32>
    %cst_61 = arith.constant dense<0.000000e+00> : vector<8x32xf32>
    %312 = tpu.matmul %311, %310, %cst_61 {dimension_numbers = #tpu.dot_dimension_numbers<[1], [0], [0], [1], [0, 0, 1, 1], [], []>} : vector<8x512xf32>, vector<512x32xf32>, vector<8x32xf32> -> vector<8x32xf32>
    %c0_62 = arith.constant 0 : index
    %c0_63 = arith.constant 0 : index
    %c0_64 = arith.constant 0 : index
    %313 = vector.load %arg13[%c0_62, %c0_63, %c0_64] : memref<1x8x32xf32, #tpu.memory_space<vmem>>, vector<1x8x32xf32>
    %314 = vector.shape_cast %313 : vector<1x8x32xf32> to vector<8x32xf32>
    %315 = vector.shape_cast %312 : vector<8x32xf32> to vector<1x8x32xf32>
    tpu.vector_store %arg13[%c0_62, %c0_63, %c0_64], %315 {strides = array<i32>} : memref<1x8x32xf32, #tpu.memory_space<vmem>>, vector<1x8x32xf32>,
    return
  }
  func.func @transform_0(%arg0: i32) -> (i32, i32, i32) {
    %c0_i32 = arith.constant 0 : i32
    %c0_i32_0 = arith.constant 0 : i32
    %c0_i32_1 = arith.constant 0 : i32
    return %arg0, %c0_i32, %c0_i32_0 : i32, i32, i32
  }
  func.func @transform_1(%arg0: i32) -> (i32, i32) {
    %c0_i32 = arith.constant 0 : i32
    %c0_i32_0 = arith.constant 0 : i32
    %c0_i32_1 = arith.constant 0 : i32
    return %c0_i32, %c0_i32_0 : i32, i32
  }
  func.func @transform_2(%arg0: i32) -> (i32, i32) {
    %c0_i32 = arith.constant 0 : i32
    %c0_i32_0 = arith.constant 0 : i32
    %c0_i32_1 = arith.constant 0 : i32
    return %c0_i32, %c0_i32_0 : i32, i32
  }
  func.func @transform_3(%arg0: i32) -> (i32, i32) {
    %c0_i32 = arith.constant 0 : i32
    %c0_i32_0 = arith.constant 0 : i32
    %c0_i32_1 = arith.constant 0 : i32
    return %c0_i32, %c0_i32_0 : i32, i32
  }
  func.func @transform_4(%arg0: i32) -> (i32, i32) {
    %c0_i32 = arith.constant 0 : i32
    %c0_i32_0 = arith.constant 0 : i32
    %c0_i32_1 = arith.constant 0 : i32
    return %c0_i32, %c0_i32_0 : i32, i32
  }
  func.func @transform_5(%arg0: i32) -> (i32, i32) {
    %c0_i32 = arith.constant 0 : i32
    %c0_i32_0 = arith.constant 0 : i32
    %c0_i32_1 = arith.constant 0 : i32
    return %c0_i32, %c0_i32_0 : i32, i32
  }
  func.func @transform_6(%arg0: i32) -> (i32, i32) {
    %c0_i32 = arith.constant 0 : i32
    %c0_i32_0 = arith.constant 0 : i32
    %c0_i32_1 = arith.constant 0 : i32
    return %c0_i32, %c0_i32_0 : i32, i32
  }
  func.func @transform_7(%arg0: i32) -> (i32, i32) {
    %c0_i32 = arith.constant 0 : i32
    %c0_i32_0 = arith.constant 0 : i32
    %c0_i32_1 = arith.constant 0 : i32
    return %c0_i32, %c0_i32_0 : i32, i32
  }
  func.func @transform_8(%arg0: i32) -> (i32, i32) {
    %c0_i32 = arith.constant 0 : i32
    %c0_i32_0 = arith.constant 0 : i32
    %c0_i32_1 = arith.constant 0 : i32
    return %c0_i32, %c0_i32_0 : i32, i32
  }
  func.func @transform_9(%arg0: i32) -> (i32, i32) {
    %c0_i32 = arith.constant 0 : i32
    %c0_i32_0 = arith.constant 0 : i32
    %c0_i32_1 = arith.constant 0 : i32
    return %c0_i32, %c0_i32_0 : i32, i32
  }
  func.func @transform_10(%arg0: i32) -> (i32, i32) {
    %c0_i32 = arith.constant 0 : i32
    %c0_i32_0 = arith.constant 0 : i32
    %c0_i32_1 = arith.constant 0 : i32
    return %c0_i32, %c0_i32_0 : i32, i32
  }
  func.func @transform_11(%arg0: i32) -> (i32, i32) {
    %c0_i32 = arith.constant 0 : i32
    %c0_i32_0 = arith.constant 0 : i32
    %c0_i32_1 = arith.constant 0 : i32
    return %c0_i32, %c0_i32_0 : i32, i32
  }
  func.func @transform_12(%arg0: i32) -> (i32, i32, i32) {
    %c0_i32 = arith.constant 0 : i32
    %c0_i32_0 = arith.constant 0 : i32
    %c0_i32_1 = arith.constant 0 : i32
    return %arg0, %c0_i32, %c0_i32_0 : i32, i32, i32
  }
}

</mosaic_0001>

<bundles_post_ra>
// kernel: tpu_custom_call.1
= control target key start
LH: loop header
LB: loop body
LE: loop exit
PB: predicated region body
PF: predicated region fallthrough
CT: control target
= control target key end

     0   :  { %s8374_s0 = inlined_call_operand.vmem [shape: f32[2,384,32], index: 0, kind: input, shape index: {}]   ;;  %s8375_s1 = inlined_call_operand.vmem [shape: f32[32,128], index: 1, kind: input, shape index: {}]   ;;  %s8376_s2 = inlined_call_operand.vmem [shape: f32[32,128], index: 2, kind: input, shape index: {}]   ;;  %s8377_s3 = inlined_call_operand.vmem [shape: f32[1,128], index: 3, kind: input, shape index: {}]   ;;  %s8378_s4 = inlined_call_operand.vmem [shape: f32[32,128], index: 4, kind: input, shape index: {}]   ;;  %s8379_s5 = inlined_call_operand.vmem [shape: f32[32,128], index: 5, kind: input, shape index: {}]   ;;  %s8380_s6 = inlined_call_operand.vmem [shape: f32[1,128], index: 6, kind: input, shape index: {}]   ;;  %s8381_s7 = inlined_call_operand.vmem [shape: f32[32,64], index: 7, kind: input, shape index: {}]   ;;  %s8382_s8 = inlined_call_operand.vmem [shape: f32[1,32], index: 8, kind: input, shape index: {}]   ;;  %s8383_s9 = inlined_call_operand.vmem [shape: f32[32,32], index: 9, kind: input, shape index: {}]   ;;  %s8384_s10 = inlined_call_operand.vmem [shape: f32[1,32], index: 10, kind: input, shape index: {}]   ;;  %s8385_s11 = inlined_call_operand.vmem [shape: f32[8,512], index: 11, kind: input, shape index: {}]   ;;  %s8386_s12 = inlined_call_operand.hbm [shape: f32[2,8,32], index: 12, kind: output, shape index: {}]  }
   0x1   :  { %8389 = sst [smem:[#allocation5_spill]] %s8374_s0 }
   0x2   :  { %8390 = sst [smem:[#allocation6_spill]] %s8375_s1 }
   0x3   :  { %8391 = sst [smem:[#allocation7_spill]] %s8376_s2 }
   0x4   :  { %17 = vsyncpa [#allocation3], 0 }
   0x5   :  { %19 = vsyncpa [#allocation3 + $0x1], 0  ;;  %s6717_s21 = smov 0   ;;  %s6719_s22 = smov 0  }
   0x6   :  { %s6721_s23 = smov 0   ;;  %s6723_s24 = smov 0  }
   0x7 LB: > { %s6738_s25 = sadd.s32 4294967295, %s6644_s24   ;;  %s5074_s26 = sadd.s32 4294967294, %s6644_s24   ;;  %s6644_s24 = sphi %s6723_s24, %s8401_s24   ;;  %s6640_s23 = sphi %s6721_s23, %s8400_s23   ;;  %s6636_s22 = sphi %s6719_s22, %s8399_s22   ;;  %s6632_s21 = sphi %s6717_s21, %s8398_s21  }
   0x8   : > { %s6742_s27 = sadd.s32 1, %s6644_s24   ;;  %s289_s28 = sadd.s32 1, %s6640_s23 }
   0x9   : > { %s286_s29 = ssub.s32 %s6644_s24, %s6742_s27  ;;  %p299_p0 = scmp.ne.s32.totalorder %s6640_s23, %s6636_s22 }
   0xa   : > { %p287_p1 = scmp.eq.s32.totalorder %s286_s29, 0  ;;  %p300_p2 = scmp.eq.s32.totalorder %s6738_s25, 1 }
   0xb   : > { %p305_p3 = scmp.ne.s32.totalorder %s6636_s22, %s6632_s21  ;;  %p306_p4 = scmp.eq.s32.totalorder %s5074_s26, 1 }
   0xc   : > { %s6753_s30 = scalar_select %p287_p1, %s6640_s23, %s289_s28  }
   0xd   : > { %p6755_p5 = por %p300_p2, %p299_p0  ;;  %p6759_p6 = por %p306_p4, %p305_p3 }
   0xe   : > { %p5077_p7 = scmp.ge.s32.totalorder %s6644_s24, 1  ;;  %p365_p8 = scmp.lt.s32.totalorder %s6644_s24, 3 }
  0x10   : > { %p366_p9 = pnand %p5077_p7, %p365_p8 }
  0x11   : > { %s8394_s1 = sld [smem:[#allocation6_spill]] (!%p366_p9)  ;;  %p407_p10 = scmp.lt.s32.totalorder (!%p366_p9), %s6738_s25, 1 }
  0x12   : > { %369 = sbr.rel (%p366_p9) target bundleno = 10548 (0x2934), region = 68  ;;  %s8395_s2 = sld [smem:[#allocation7_spill]] (!%p366_p9) }
  0x13   : > { %s8396_s0 = sld [smem:[#allocation5_spill]] (!%p366_p9)  ;;  %s8387_s20 = smov (!%p366_p9), 64  }
  0x14   : > { %s6648_s26 = smov (!%p366_p9), 32   ;;  %s8397_s15 = smov (!%p366_p9), 64  }
  0x15   : > { %s404_s19 = sand.u32 (!%p366_p9), 1, %s6636_s22  }
  0x16   : > { %s5078_s28 = sshll.u32 (!%p366_p9), %s404_s19, 3 }
  0x17   : > { %v463_v0 = vld [vmem:[%s8394_s1 + $0x18] sm:$0xff]  ;;  %v462_v2 = vld [vmem:[%s8394_s1 + $0x10] sm:$0xff]  ;;  %v461_v4 = vld [vmem:[%s8394_s1 + $0x8] sm:$0xff]  ;;  %s408_s18 = scalar_select %p407_p10, %s6738_s25, 1  ;;  %vm471_vm0 = vcmask 261120   ;;  %v6646_v10 = vmov 0.0  }
  0x18   : > { %v6771_v1 = vld [vmem:[%s8395_s2 + $0x18] sm:$0xff]  ;;  %5645 = vmatprep.subr.mxu0 %v463_v0  ;;  %v6781_v3 = vld [vmem:[%s8395_s2 + $0x10] sm:$0xff]  ;;  %v6790_v5 = vld [vmem:[%s8395_s2 + $0x8] sm:$0xff]  ;;  %5733 = vmatprep.mubr.f32.mxu1 %v6646_v10  ;;  %vm6649_vm1 = vmmov 0  }
  0x19   : > { %5725 = vmatprep.subr.mxu1 %v6771_v1  ;;  %5646 = vmatpush3.msra.mxu0 %v463_v0  ;;  %v460_v6 = vld [vmem:[%s8394_s1] sm:$0xff]  ;;  %s6085_s29 = smul.u32 384, %s408_s18  ;;  %s6650_s18 = smov 96  }
  0x1a   : > { %5726 = vmatpush3.msra.mxu1 %v6771_v1  ;;  %5647 = vmatprep.subr.mxu0 %v462_v2  ;;  %v6801_v7 = vld [vmem:[%s8395_s2] sm:$0xff]  ;;  %s6651_s1 = smov [#allocation2]  }
  0x1b   : > { %5727 = vmatprep.subr.mxu1 %v6781_v3  ;;  %5648 = vmatpush3.msra.mxu0 %v462_v2  ;;  %s6808_s17 = scalar_lea.vmem %s8396_s0, %s6085_s29  ;;  %v6836_v13 = vld [vmem:[%s8377_s3] ss:$0 sm:$0xff]  ;;  %s5316_s29 = sshll.u32 %s6738_s25, 7 }
  0x1c   : > { %5728 = vmatpush3.msra.mxu1 %v6781_v3  ;;  %5649 = vmatprep.subr.mxu0 %v461_v4  ;;  %v412_v8 = vld [vmem:[%s6808_s17] sm:$0xff]  ;;  %v413_v9 = vld [vmem:[%s6808_s17 + $0x8] sm:$0xff]  ;;  %v414_v40 = vld [vmem:[%s6808_s17 + $0x10] sm:$0xff]  ;;  %s6588_s25 = sshll.u32 %s6651_s1, 4  ;;  %s6589_s25 = int_to_ptr.vmem [resolvable:$false] %s6588_s25 }
  0x1d   : > { %5729 = vmatprep.subr.mxu1 %v6790_v5  ;;  %5650 = vmatpush3.msra.mxu0 %v461_v4  ;;  %v415_v41 = vld [vmem:[%s6808_s17 + $0x18] sm:$0xff]  ;;  %v416_v42 = vld [vmem:[%s6808_s17 + $0x20] sm:$0xff]  ;;  %v417_v43 = vld [vmem:[%s6808_s17 + $0x28] sm:$0xff] }
  0x1e   : > { %5730 = vmatpush3.msra.mxu1 %v6790_v5  ;;  %5651 = vmatprep.subr.mxu0 %v460_v6  ;;  %v418_v44 = vld [vmem:[%s6808_s17 + $0x30] sm:$0xff]  ;;  %v419_v45 = vld [vmem:[%s6808_s17 + $0x38] sm:$0xff]  ;;  %v420_v47 = vld [vmem:[%s6808_s17 + $0x40] sm:$0xff] }
  0x1f   : > { %5731 = vmatprep.subr.mxu1 %v6801_v7  ;;  %5652 = vmatpush3.msra.mxu0 %v460_v6  ;;  %v421_v49 = vld [vmem:[%s6808_s17 + $0x48] sm:$0xff] }
  0x20   : > { %5653 = vmatprep.mubr.msk.f32.mxu0 %vm471_vm0, %v412_v8  ;;  %5732 = vmatpush3.msra.mxu1 %v6801_v7 }
  0x21   : > { %5654 = vmatmul.mubr.msk.f32.vlgmr.msra.gmra.mxu0 %vm471_vm0, %v413_v9  ;;  %5734 = vmatmul.mubr.f32.vlgmr.msra.gmra.mxu1 %v6646_v10 }
  0x22   : > { %5736 = vmatprep.mubr.f32.mxu1 %v6646_v10  ;;  %5745 = vmatprep.subr.mxu1 %v6771_v1 }
  0x23   : > { %5746 = vmatpush3.msra.mxu1 %v6771_v1  ;;  %5656 = vmatprep.mubr.msk.f32.mxu0 %vm471_vm0, %v414_v40 }
  0x24   : > { %5747 = vmatprep.subr.mxu1 %v6781_v3 }
  0x25   : > { %5737 = vmatmul.mubr.f32.gmra.mxu1 %v6646_v10  ;;  %5657 = vmatmul.mubr.msk.f32.gmra.mxu0 %vm471_vm0, %v415_v41 }
  0x26   : > { %5739 = vmatprep.mubr.f32.mxu1 %v6646_v10  ;;  %5748 = vmatpush3.msra.mxu1 %v6781_v3 }
  0x27   : > { %5749 = vmatprep.subr.mxu1 %v6790_v5  ;;  %5659 = vmatprep.mubr.msk.f32.mxu0 %vm471_vm0, %v416_v42 }
  0x28   : > { %5750 = vmatpush3.msra.mxu1 %v6790_v5 }
  0x29   : > { %5740 = vmatmul.mubr.f32.gmra.mxu1 %v6646_v10  ;;  %5751 = vmatprep.subr.mxu1 %v6801_v7 }
  0x2a   : > { %5742 = vmatprep.mubr.f32.mxu1 %v6646_v10  ;;  %5752 = vmatpush3.msra.mxu1 %v6801_v7 }
  0x2b   : > { %5765 = vmatprep.subr.mxu1 %v6771_v1  ;;  %5660 = vmatmul.mubr.msk.f32.gmra.mxu0 %vm471_vm0, %v417_v43 }
  0x2c   : > { %5662 = vmatprep.mubr.msk.f32.mxu0 %vm471_vm0, %v418_v44 }
  0x2d   : > { %5743 = vmatmul.mubr.f32.gmra.mxu1 %v6646_v10 }
  0x2f   : > { %5663 = vmatmul.mubr.msk.f32.gmra.mxu0 %vm471_vm0, %v419_v45 }
  0x30   : > { %5665 = vmatprep.mubr.msk.f32.mxu0 %vm471_vm0, %v420_v47 }
  0x33   : > { %5666 = vmatmul.mubr.msk.f32.gmra.mxu0 %vm471_vm0, %v421_v49 }
  0xe1   : > { %v5655_v11 = vpop.f32.mrf.mxu0  ;;  %v5735_v12 = vpop.f32.mrf.mxu1 }
  0xe2   : > { %v688_v16 = vadd.f32 %v5655_v11, %v6836_v13 }
  0xe3   : > { %v682_v14 = vpop.f32.mrf.mxu0  ;;  %v994_v17 = vpop.f32.mrf.mxu1 }
  0xe4   : > { %v683_v15 = vadd.f32 %v6836_v13, %v682_v14  ;;  %v1034_v19 = vadd.f32 %v5735_v12, %v688_v16 }
  0xe5   : > { %v5738_v54 = vpop.f32.mrf.mxu1  ;;  %v5658_v57 = vpop.f32.mrf.mxu0 }
  0xe6   : > { %v1033_v18 = vadd.f32 %v994_v17, %v683_v15  ;;  %v5130_v23 = vmul.f32 -1.442695, %v1034_v19  ;;  %v698_v58 = vadd.f32 %v5658_v57, %v6836_v13 }
  0xe7   : > { %v1004_v55 = vpop.f32.mrf.mxu1  ;;  %v692_v59 = vpop.f32.mrf.mxu0 }
  0xe8   : > { %6130 = vtanh.f32 %v1033_v18  ;;  %v5129_v22 = vmul.f32 -1.442695, %v1033_v18  ;;  %v693_v61 = vadd.f32 %v6836_v13, %v692_v59  ;;  %v1036_v62 = vadd.f32 %v5738_v54, %v698_v58 }
  0xe9   : > { %6132 = vtanh.f32 %v1034_v19  ;;  %v5741_v56 = vpop.f32.mrf.mxu1 }
  0xea   : > { %6134 = vpow2.f32 %v5129_v22  ;;  %v1035_v2 = vadd.f32 %v1004_v55, %v693_v61 }
  0xeb   : > { %6136 = vpow2.f32 %v5130_v23  ;;  %v1014_v60 = vpop.f32.mrf.mxu1  ;;  %v5661_v63 = vpop.f32.mrf.mxu0 }
  0xec   : > { %v708_v0 = vadd.f32 %v5661_v63, %v6836_v13 }
  0xed   : > { %v702_v4 = vpop.f32.mrf.mxu0  ;;  %v5744_v6 = vpop.f32.mrf.mxu1 }
  0xee   : > { %v703_v8 = vadd.f32 %v6836_v13, %v702_v4  ;;  %v1038_v9 = vadd.f32 %v5741_v56, %v708_v0 }
  0xef   : > { %v5664_v11 = vpop.f32.mrf.mxu0  ;;  %v1024_v16 = vpop.f32.mrf.mxu1 }
  0xf0   : > { %v718_v12 = vadd.f32 %v5664_v11, %v6836_v13  ;;  %v1037_v14 = vadd.f32 %v1014_v60, %v703_v8 }
  0xf1   : > { %v712_v15 = vpop.f32.mrf.mxu0 }
  0xf2   : > { %v713_v17 = vadd.f32 %v6836_v13, %v712_v15  ;;  %v1040_v18 = vadd.f32 %v5744_v6, %v718_v12 }
  0xf4   : > { %v1039_v19 = vadd.f32 %v1024_v16, %v713_v17 }
  0xf5   : > { %v6131_v20 = vpop.eup %6130 }
  0xf6   : > { %1113 = vrot.lane.b32.xlu0 %v6131_v20, %s8387_s20  ;;  %v6133_v21 = vpop.eup %6132 }
  0xf7   : > { %v6135_v24 = vpop.eup %6134 }
  0xf8   : > { %v1065_v25 = vadd.f32 1.0, %v6135_v24  ;;  %v6137_v26 = vpop.eup %6136 }
  0xf9   : > { %v1066_v27 = vadd.f32 1.0, %v6137_v26 }
  0xfa   : > { %1115 = vrot.lane.b32.xlu0 %v6133_v21, %s8387_s20  ;;  %6138 = vrcp.f32 %v1065_v25 }
  0xfb   : > { %6140 = vrcp.f32 %v1066_v27 }
 0x107   : > { %v6139_v28 = vpop.eup %6138 }
 0x108   : > { %v6141_v31 = vpop.eup %6140  ;;  %v1097_v34 = vmul.f32 0.0, %v6139_v28 }
 0x109   : > { %v1098_v37 = vmul.f32 0.0, %v6141_v31 }
 0x168   : > { %v1114_v29 = vpop.permute.xlu0 %1113 }
 0x169   : > { %v1137_v30 = vmul.f32 %v6139_v28, %v1114_v29  ;;  %v5131_v29 = vmul.f32 -1.442695, %v1035_v2 }
 0x16b   : > { %1153 = vrot.lane.b32.xlu1 %v1137_v30, %s6648_s26  ;;  %v5134_v30 = vmul.f32 -1.442695, %v1038_v9 }
 0x16c   : > { %v1116_v32 = vpop.permute.xlu0 %1115 }
 0x16d   : > { %v1138_v33 = vmul.f32 %v6141_v31, %v1116_v32  ;;  %v5136_v32 = vmul.f32 -1.442695, %v1040_v18 }
 0x16f   : > { %1155 = vrot.lane.b32.xlu1 %v1138_v33, %s6648_s26  ;;  %v5135_v33 = vmul.f32 -1.442695, %v1039_v19 }
 0x1dd   : > { %v1154_v35 = vpop.permute.xlu1 %1153 }
 0x1de   : > { %v6844_v36 = vadd.f32 %v1154_v35, %v1097_v34  ;;  %v5667_v35 = vpop.f32.mrf.mxu0 }
 0x1df   : > { %v728_v40 = vadd.f32 %v5667_v35, %v6836_v13 }
 0x1e0   : > { %6142 = vtanh.f32 %v6844_v36  ;;  %v722_v42 = vpop.f32.mrf.mxu0 }
 0x1e1   : > { %v1156_v38 = vpop.permute.xlu1 %1155  ;;  %v723_v47 = vadd.f32 %v6836_v13, %v722_v42 }
 0x1e2   : > { %v6847_v39 = vadd.f32 %v1156_v38, %v1098_v37 }
 0x1e4   : > { %6144 = vtanh.f32 %v6847_v39 }
 0x1e5   : > { %6146 = vtanh.f32 %v1036_v62 }
 0x1e6   : > { %6148 = vtanh.f32 %v1035_v2 }
 0x1e7   : > { %6150 = vtanh.f32 %v1038_v9 }
 0x1e8   : > { %6152 = vtanh.f32 %v1037_v14 }
 0x1e9   : > { %6154 = vtanh.f32 %v1040_v18 }
 0x1ea   : > { %6156 = vtanh.f32 %v1039_v19 }
 0x1ed   : > { %v6143_v46 = vpop.eup %6142 }
 0x1ee   : > { %1201 = vrot.lane.b32.xlu0 %v6143_v46, %s8387_s20 }
 0x1f1   : > { %v6145_v48 = vpop.eup %6144 }
 0x1f2   : > { %1203 = vrot.lane.b32.xlu1 %v6145_v48, %s8387_s20  ;;  %v6147_v20 = vpop.eup %6146 }
 0x1f3   : > { %v6149_v21 = vpop.eup %6148 }
 0x1f4   : > { %v6151_v22 = vpop.eup %6150 }
 0x1f5   : > { %v6153_v23 = vpop.eup %6152 }
 0x1f6   : > { %v6155_v24 = vpop.eup %6154 }
 0x1f7   : > { %v6157_v25 = vpop.eup %6156 }
 0x260   : > { %v1202_v50 = vpop.permute.xlu0 %1201 }
 0x261   : > { %v1225_v51 = vmul.f32 %v6139_v28, %v1202_v50  ;;  %v5132_v28 = vmul.f32 -1.442695, %v1036_v62 }
 0x263   : > { %1241 = vrot.lane.b32.xlu0 %v1225_v51, %s6648_s26  ;;  %6158 = vpow2.f32 %v5132_v28 }
 0x264   : > { %v1204_v52 = vpop.permute.xlu1 %1203  ;;  %6160 = vpow2.f32 %v5131_v29 }
 0x265   : > { %v1226_v53 = vmul.f32 %v6141_v31, %v1204_v52  ;;  %v5133_v31 = vmul.f32 -1.442695, %v1037_v14  ;;  %6162 = vpow2.f32 %v5134_v30 }
 0x267   : > { %1243 = vrot.lane.b32.xlu1 %v1226_v53, %s6648_s26  ;;  %1117 = vrot.lane.b32.xlu0 %v6149_v21, %s8387_s20  ;;  %6164 = vpow2.f32 %v5133_v31 }
 0x268   : > { %6166 = vpow2.f32 %v5136_v32 }
 0x269   : > { %6168 = vpow2.f32 %v5135_v33 }
 0x26b   : > { %1119 = vrot.lane.b32.xlu1 %v6147_v20, %s8387_s20  ;;  %1121 = vrot.lane.b32.xlu0 %v6153_v23, %s8387_s20 }
 0x26f   : > { %1123 = vrot.lane.b32.xlu1 %v6151_v22, %s8387_s20  ;;  %1125 = vrot.lane.b32.xlu0 %v6157_v25, %s8387_s20 }
 0x270   : > { %v6159_v34 = vpop.eup %6158 }
 0x271   : > { %v6161_v37 = vpop.eup %6160  ;;  %v1068_v38 = vadd.f32 1.0, %v6159_v34 }
 0x272   : > { %v6163_v41 = vpop.eup %6162  ;;  %v1067_v43 = vadd.f32 1.0, %v6161_v37 }
 0x273   : > { %1127 = vrot.lane.b32.xlu1 %v6155_v24, %s8387_s20  ;;  %6170 = vrcp.f32 %v1068_v38  ;;  %v1070_v46 = vadd.f32 1.0, %v6163_v41 }
 0x274   : > { %v6165_v45 = vpop.eup %6164 }
 0x275   : > { %v6167_v49 = vpop.eup %6166  ;;  %v1069_v52 = vadd.f32 1.0, %v6165_v45 }
 0x276   : > { %v6169_v53 = vpop.eup %6168  ;;  %v1072_v54 = vadd.f32 1.0, %v6167_v49 }
 0x277   : > { %v1071_v55 = vadd.f32 1.0, %v6169_v53 }
 0x280   : > { %v6894_v58 = vpop.eup %6170 }
 0x281   : > { %v1100_v29 = vmul.f32 0.0, %v6894_v58 }
 0x2d5   : > { %v1242_v26 = vpop.permute.xlu0 %1241 }
 0x2d6   : > { %5753 = vmatprep.mubr.msk.f32.mxu1 %vm471_vm0, %v1242_v26 }
 0x2d9   : > { %v1244_v27 = vpop.permute.xlu1 %1243  ;;  %v1118_v57 = vpop.permute.xlu0 %1117 }
 0x2da   : > { %5754 = vmatmul.mubr.msk.f32.vlgmr.msra.gmra.mxu1 %vm471_vm0, %v1244_v27 }
 0x2db   : > { %5766 = vmatpush3.msra.mxu1 %v6771_v1 }
 0x2dc   : > { %5767 = vmatprep.subr.mxu1 %v6781_v3 }
 0x2dd   : > { %5768 = vmatpush3.msra.mxu1 %v6781_v3  ;;  %v1120_v56 = vpop.permute.xlu1 %1119  ;;  %v1122_v2 = vpop.permute.xlu0 %1121 }
 0x2de   : > { %5769 = vmatprep.subr.mxu1 %v6790_v5  ;;  %v1140_v62 = vmul.f32 %v6894_v58, %v1120_v56 }
 0x2df   : > { %5770 = vmatpush3.msra.mxu1 %v6790_v5 }
 0x2e0   : > { %5771 = vmatprep.subr.mxu1 %v6801_v7 }
 0x2e1   : > { %5772 = vmatpush3.msra.mxu1 %v6801_v7  ;;  %v1124_v60 = vpop.permute.xlu1 %1123  ;;  %v1126_v16 = vpop.permute.xlu0 %1125 }
 0x2e2   : > { %5785 = vmatprep.subr.mxu1 %v6771_v1 }
 0x2e5   : > { %v1128_v11 = vpop.permute.xlu1 %1127 }
 0x39a   : > { %v5755_v44 = vpop.f32.mrf.mxu1 }
 0x39b   : > { %v1379_v48 = vadd.f32 %v5755_v44, %v728_v40 }
 0x39c   : > { %v1339_v50 = vpop.f32.mrf.mxu1 }
 0x39d   : > { %6172 = vtanh.f32 %v1379_v48  ;;  %v1378_v51 = vadd.f32 %v1339_v50, %v723_v47  ;;  %v5146_v18 = vmul.f32 -1.442695, %v1379_v48 }
 0x39e   : > { %6174 = vrcp.f32 %v1067_v43 }
 0x39f   : > { %6176 = vrcp.f32 %v1070_v46  ;;  %v5145_v19 = vmul.f32 -1.442695, %v1378_v51 }
 0x3a0   : > { %6178 = vtanh.f32 %v1378_v51 }
 0x3a1   : > { %6180 = vrcp.f32 %v1069_v52 }
 0x3a2   : > { %6182 = vrcp.f32 %v1072_v54 }
 0x3a3   : > { %6184 = vrcp.f32 %v1071_v55 }
 0x3a4   : > { %6186 = vpow2.f32 %v5146_v18  ;;  %v428_v18 = vld [vmem:[%s6808_s17 + $0x80] sm:$0xff] }
 0x3a5   : > { %6188 = vpow2.f32 %v5145_v19  ;;  %v429_v19 = vld [vmem:[%s6808_s17 + $0x88] sm:$0xff] }
 0x3aa   : > { %v6173_v59 = vpop.eup %6172 }
 0x3ab   : > { %v6896_v61 = vpop.eup %6174  ;;  %1460 = vrot.lane.b32.xlu1 %v6173_v59, %s8387_s20 }
 0x3ac   : > { %v6900_v63 = vpop.eup %6176  ;;  %v1139_v4 = vmul.f32 %v6896_v61, %v1118_v57  ;;  %v1099_v33 = vmul.f32 0.0, %v6896_v61 }
 0x3ad   : > { %v6179_v0 = vpop.eup %6178  ;;  %v1142_v8 = vmul.f32 %v6900_v63, %v1124_v60  ;;  %v1102_v35 = vmul.f32 0.0, %v6900_v63 }
 0x3ae   : > { %1458 = vrot.lane.b32.xlu0 %v6179_v0, %s8387_s20  ;;  %v6904_v6 = vpop.eup %6180 }
 0x3af   : > { %1159 = vrot.lane.b32.xlu1 %v1140_v62, %s6648_s26  ;;  %v6908_v9 = vpop.eup %6182  ;;  %v1141_v12 = vmul.f32 %v6904_v6, %v1122_v2  ;;  %v1101_v41 = vmul.f32 0.0, %v6904_v6  ;;  %v422_v2 = vld [vmem:[%s6808_s17 + $0x50] sm:$0xff] }
 0x3b0   : > { %v6912_v14 = vpop.eup %6184  ;;  %v1144_v15 = vmul.f32 %v6908_v9, %v1128_v11  ;;  %v1104_v43 = vmul.f32 0.0, %v6908_v9  ;;  %5668 = vmatprep.mubr.msk.f32.mxu0 %vm471_vm0, %v422_v2  ;;  %v426_v11 = vld [vmem:[%s6808_s17 + $0x70] sm:$0xff] }
 0x3b1   : > { %v1143_v17 = vmul.f32 %v6912_v14, %v1126_v16  ;;  %v6187_v20 = vpop.eup %6186  ;;  %v1103_v47 = vmul.f32 0.0, %v6912_v14 }
 0x3b2   : > { %1157 = vrot.lane.b32.xlu0 %v1139_v4, %s6648_s26  ;;  %v6189_v21 = vpop.eup %6188  ;;  %v1411_v22 = vadd.f32 1.0, %v6187_v20  ;;  %v423_v4 = vld [vmem:[%s6808_s17 + $0x58] sm:$0xff] }
 0x3b3   : > { %1163 = vrot.lane.b32.xlu1 %v1142_v8, %s6648_s26  ;;  %v1410_v23 = vadd.f32 1.0, %v6189_v21  ;;  %5669 = vmatmul.mubr.msk.f32.gmra.mxu0 %vm471_vm0, %v423_v4  ;;  %v425_v8 = vld [vmem:[%s6808_s17 + $0x68] sm:$0xff] }
 0x3b4   : > { %6190 = vrcp.f32 %v1411_v22 }
 0x3b5   : > { %6192 = vrcp.f32 %v1410_v23 }
 0x3b6   : > { %1161 = vrot.lane.b32.xlu0 %v1141_v12, %s6648_s26  ;;  %v427_v12 = vld [vmem:[%s6808_s17 + $0x78] sm:$0xff] }
 0x3b7   : > { %1167 = vrot.lane.b32.xlu1 %v1144_v15, %s6648_s26 }
 0x3ba   : > { %1165 = vrot.lane.b32.xlu0 %v1143_v17, %s6648_s26 }
 0x3c1   : > { %v6920_v24 = vpop.eup %6190 }
 0x3c2   : > { %v6923_v27 = vpop.eup %6192  ;;  %v1443_v56 = vmul.f32 %v6920_v24, %v6847_v39  ;;  %v424_v39 = vld [vmem:[%s6808_s17 + $0x60] sm:$0xff] }
 0x3c3   : > { %v1442_v60 = vmul.f32 %v6923_v27, %v6844_v36  ;;  %5671 = vmatprep.mubr.msk.f32.mxu0 %vm471_vm0, %v424_v39 }
 0x3c4   : > { %5672 = vmatmul.mubr.msk.f32.gmra.mxu0 %vm471_vm0, %v425_v8 }
 0x3c5   : > { %5674 = vmatprep.mubr.msk.f32.mxu0 %vm471_vm0, %v426_v11 }
 0x3c8   : > { %5675 = vmatmul.mubr.msk.f32.gmra.mxu0 %vm471_vm0, %v427_v12 }
 0x3c9   : > { %5677 = vmatprep.mubr.msk.f32.mxu0 %vm471_vm0, %v428_v18 }
 0x3cc   : > { %5678 = vmatmul.mubr.msk.f32.gmra.mxu0 %vm471_vm0, %v429_v19 }
 0x41d   : > { %v1461_v25 = vpop.permute.xlu1 %1460 }
 0x41e   : > { %v1483_v26 = vmul.f32 %v6920_v24, %v1461_v25 }
 0x420   : > { %v1459_v28 = vpop.permute.xlu0 %1458  ;;  %1500 = vrot.lane.b32.xlu1 %v1483_v26, %s6648_s26 }
 0x421   : > { %v1482_v30 = vmul.f32 %v6923_v27, %v1459_v28  ;;  %v1160_v31 = vpop.permute.xlu1 %1159 }
 0x422   : > { %v6928_v32 = vadd.f32 %v1160_v31, %v1100_v29 }
 0x423   : > { %1498 = vrot.lane.b32.xlu0 %v1482_v30, %s6648_s26 }
 0x424   : > { %6194 = vtanh.f32 %v6928_v32  ;;  %v1158_v34 = vpop.permute.xlu0 %1157 }
 0x425   : > { %v6934_v37 = vadd.f32 %v1158_v34, %v1099_v33  ;;  %v1164_v38 = vpop.permute.xlu1 %1163 }
 0x426   : > { %v6936_v40 = vadd.f32 %v1164_v38, %v1102_v35 }
 0x427   : > { %6196 = vtanh.f32 %v6934_v37 }
 0x428   : > { %6198 = vtanh.f32 %v6936_v40  ;;  %v1162_v42 = vpop.permute.xlu0 %1161 }
 0x429   : > { %v6942_v44 = vadd.f32 %v1162_v42, %v1101_v41  ;;  %v1168_v45 = vpop.permute.xlu1 %1167 }
 0x42a   : > { %v6944_v46 = vadd.f32 %v1168_v45, %v1104_v43 }
 0x42b   : > { %6200 = vtanh.f32 %v6942_v44 }
 0x42c   : > { %6202 = vtanh.f32 %v6944_v46  ;;  %v1166_v48 = vpop.permute.xlu0 %1165 }
 0x42d   : > { %v6949_v49 = vadd.f32 %v1166_v48, %v1103_v47 }
 0x42f   : > { %6204 = vtanh.f32 %v6949_v49 }
 0x431   : > { %v6195_v50 = vpop.eup %6194 }
 0x432   : > { %1207 = vrot.lane.b32.xlu1 %v6195_v50, %s8387_s20 }
 0x434   : > { %v6197_v51 = vpop.eup %6196 }
 0x435   : > { %v6199_v52 = vpop.eup %6198  ;;  %1205 = vrot.lane.b32.xlu0 %v6197_v51, %s8387_s20 }
 0x436   : > { %1211 = vrot.lane.b32.xlu1 %v6199_v52, %s8387_s20 }
 0x438   : > { %v6201_v53 = vpop.eup %6200 }
 0x439   : > { %v6203_v54 = vpop.eup %6202  ;;  %1209 = vrot.lane.b32.xlu0 %v6201_v53, %s8387_s20 }
 0x43a   : > { %1215 = vrot.lane.b32.xlu1 %v6203_v54, %s8387_s20 }
 0x43c   : > { %v6205_v55 = vpop.eup %6204 }
 0x43d   : > { %1213 = vrot.lane.b32.xlu0 %v6205_v55, %s8387_s20 }
 0x473   : > { %v5670_v41 = vpop.f32.mrf.mxu0 }
 0x474   : > { %v738_v47 = vadd.f32 %v5670_v41, %v6836_v13 }
 0x475   : > { %v732_v42 = vpop.f32.mrf.mxu0 }
 0x476   : > { %v733_v48 = vadd.f32 %v6836_v13, %v732_v42 }
 0x484   : > { %v5673_v43 = vpop.f32.mrf.mxu0 }
 0x485   : > { %v748_v52 = vadd.f32 %v5673_v43, %v6836_v13 }
 0x486   : > { %v742_v45 = vpop.f32.mrf.mxu0 }
 0x492   : > { %v1501_v57 = vpop.permute.xlu1 %1500 }
 0x493   : > { %v6960_v59 = vadd.f32 %v1501_v57, %v1443_v56 }
 0x495   : > { %6206 = vtanh.f32 %v6960_v59  ;;  %v1499_v62 = vpop.permute.xlu0 %1498 }
 0x496   : > { %v6965_v0 = vadd.f32 %v1499_v62, %v1442_v60 }
 0x498   : > { %6208 = vtanh.f32 %v6965_v0 }
 0x4a2   : > { %v6207_v36 = vpop.eup %6206 }
 0x4a3   : > { %1548 = vrot.lane.b32.xlu1 %v6207_v36, %s8387_s20 }
 0x4a4   : > { %v1208_v15 = vpop.permute.xlu1 %1207 }
 0x4a5   : > { %v6209_v16 = vpop.eup %6208  ;;  %v1228_v17 = vmul.f32 %v6894_v58, %v1208_v15 }
 0x4a6   : > { %1546 = vrot.lane.b32.xlu0 %v6209_v16, %s8387_s20 }
 0x4a7   : > { %v1206_v20 = vpop.permute.xlu0 %1205  ;;  %1247 = vrot.lane.b32.xlu1 %v1228_v17, %s6648_s26 }
 0x4a8   : > { %v1227_v21 = vmul.f32 %v6896_v61, %v1206_v20  ;;  %v1212_v22 = vpop.permute.xlu1 %1211 }
 0x4a9   : > { %v1230_v23 = vmul.f32 %v6900_v63, %v1212_v22 }
 0x4aa   : > { %1245 = vrot.lane.b32.xlu0 %v1227_v21, %s6648_s26 }
 0x4ab   : > { %v1210_v25 = vpop.permute.xlu0 %1209  ;;  %1251 = vrot.lane.b32.xlu1 %v1230_v23, %s6648_s26 }
 0x4ac   : > { %v1229_v58 = vmul.f32 %v6904_v6, %v1210_v25  ;;  %v1216_v26 = vpop.permute.xlu1 %1215 }
 0x4ad   : > { %v1232_v28 = vmul.f32 %v6908_v9, %v1216_v26 }
 0x4ae   : > { %1249 = vrot.lane.b32.xlu0 %v1229_v58, %s6648_s26 }
 0x4af   : > { %v1214_v29 = vpop.permute.xlu0 %1213  ;;  %1255 = vrot.lane.b32.xlu1 %v1232_v28, %s6648_s26 }
 0x4b0   : > { %v1231_v61 = vmul.f32 %v6912_v14, %v1214_v29 }
 0x4b2   : > { %1253 = vrot.lane.b32.xlu0 %v1231_v61, %s6648_s26 }
 0x515   : > { %v1549_v63 = vpop.permute.xlu1 %1548 }
 0x516   : > { %v1571_v30 = vmul.f32 %v6920_v24, %v1549_v63 }
 0x518   : > { %v1547_v31 = vpop.permute.xlu0 %1546  ;;  %1588 = vrot.lane.b32.xlu1 %v1571_v30, %s6648_s26 }
 0x519   : > { %v1570_v6 = vmul.f32 %v6923_v27, %v1547_v31  ;;  %v1248_v33 = vpop.permute.xlu1 %1247 }
 0x51b   : > { %1586 = vrot.lane.b32.xlu0 %v1570_v6, %s6648_s26 }
 0x51c   : > { %v1246_v9 = vpop.permute.xlu0 %1245 }
 0x51d   : > { %5756 = vmatprep.mubr.msk.f32.mxu1 %vm471_vm0, %v1246_v9  ;;  %v1252_v34 = vpop.permute.xlu1 %1251 }
 0x51e   : > { %5757 = vmatmul.mubr.msk.f32.gmra.mxu1 %vm471_vm0, %v1248_v33 }
 0x520   : > { %v1250_v14 = vpop.permute.xlu0 %1249 }
 0x521   : > { %5759 = vmatprep.mubr.msk.f32.mxu1 %vm471_vm0, %v1250_v14  ;;  %v1256_v35 = vpop.permute.xlu1 %1255 }
 0x522   : > { %5760 = vmatmul.mubr.msk.f32.gmra.mxu1 %vm471_vm0, %v1252_v34 }
 0x524   : > { %v1254_v24 = vpop.permute.xlu0 %1253 }
 0x525   : > { %5762 = vmatprep.mubr.msk.f32.mxu1 %vm471_vm0, %v1254_v24 }
 0x526   : > { %5763 = vmatmul.mubr.msk.f32.gmra.mxu1 %vm471_vm0, %v1256_v35 }
 0x58a   : > { %v1589_v38 = vpop.permute.xlu1 %1588 }
 0x58d   : > { %v1587_v27 = vpop.permute.xlu0 %1586 }
 0x58e   : > { %5773 = vmatprep.mubr.msk.f32.mxu1 %vm471_vm0, %v1587_v27 }
 0x58f   : > { %5774 = vmatmul.mubr.msk.f32.vlgmr.msra.gmra.mxu1 %vm471_vm0, %v1589_v38 }
 0x590   : > { %5786 = vmatpush3.msra.mxu1 %v6771_v1 }
 0x591   : > { %5787 = vmatprep.subr.mxu1 %v6781_v3 }
 0x592   : > { %5788 = vmatpush3.msra.mxu1 %v6781_v3  ;;  %v5676_v3 = vpop.f32.mrf.mxu0 }
 0x593   : > { %5789 = vmatprep.subr.mxu1 %v6790_v5  ;;  %v758_v56 = vadd.f32 %v5676_v3, %v6836_v13 }
 0x594   : > { %5790 = vmatpush3.msra.mxu1 %v6790_v5 }
 0x595   : > { %5791 = vmatprep.subr.mxu1 %v6801_v7 }
 0x596   : > { %5792 = vmatpush3.msra.mxu1 %v6801_v7  ;;  %v743_v7 = vadd.f32 %v6836_v13, %v742_v45 }
 0x597   : > { %5805 = vmatprep.subr.mxu1 %v6771_v1  ;;  %v752_v1 = vpop.f32.mrf.mxu0 }
 0x598   : > { %v753_v62 = vadd.f32 %v6836_v13, %v752_v1 }
 0x599   : > { %v5679_v25 = vpop.f32.mrf.mxu0 }
 0x59a   : > { %v768_v58 = vadd.f32 %v5679_v25, %v6836_v13 }
 0x59b   : > { %v762_v28 = vpop.f32.mrf.mxu0 }
 0x59c   : > { %v763_v30 = vadd.f32 %v6836_v13, %v762_v28 }
 0x5de   : > { %v5758_v50 = vpop.f32.mrf.mxu1 }
 0x5df   : > { %v1381_v51 = vadd.f32 %v5758_v50, %v738_v47 }
 0x5e0   : > { %v1349_v5 = vpop.f32.mrf.mxu1 }
 0x5e1   : > { %6210 = vtanh.f32 %v1381_v51  ;;  %v1380_v53 = vadd.f32 %v1349_v5, %v733_v48  ;;  %v5148_v18 = vmul.f32 -1.442695, %v1381_v51 }
 0x5e2   : > { %v5761_v54 = vpop.f32.mrf.mxu1 }
 0x5e3   : > { %v1383_v55 = vadd.f32 %v5761_v54, %v748_v52  ;;  %6212 = vtanh.f32 %v1380_v53  ;;  %v5147_v19 = vmul.f32 -1.442695, %v1380_v53 }
 0x5e4   : > { %v1359_v57 = vpop.f32.mrf.mxu1 }
 0x5e5   : > { %v1382_v60 = vadd.f32 %v1359_v57, %v743_v7  ;;  %6214 = vtanh.f32 %v1383_v55  ;;  %v5150_v20 = vmul.f32 -1.442695, %v1383_v55 }
 0x5e6   : > { %v5764_v2 = vpop.f32.mrf.mxu1 }
 0x5e7   : > { %v1385_v4 = vadd.f32 %v5764_v2, %v758_v56  ;;  %6216 = vtanh.f32 %v1382_v60  ;;  %v5149_v21 = vmul.f32 -1.442695, %v1382_v60 }
 0x5e8   : > { %v1369_v39 = vpop.f32.mrf.mxu1 }
 0x5e9   : > { %v1384_v8 = vadd.f32 %v1369_v39, %v753_v62  ;;  %6218 = vtanh.f32 %v1385_v4  ;;  %v5152_v22 = vmul.f32 -1.442695, %v1385_v4 }
 0x5eb   : > { %6220 = vtanh.f32 %v1384_v8  ;;  %v5151_v23 = vmul.f32 -1.442695, %v1384_v8 }
 0x5ec   : > { %6222 = vpow2.f32 %v5148_v18 }
 0x5ed   : > { %6224 = vpow2.f32 %v5147_v19 }
 0x5ee   : > { %v6211_v36 = vpop.eup %6210  ;;  %6226 = vpow2.f32 %v5150_v20 }
 0x5ef   : > { %1464 = vrot.lane.b32.xlu1 %v6211_v36, %s8387_s20  ;;  %6228 = vpow2.f32 %v5149_v21 }
 0x5f0   : > { %v6213_v11 = vpop.eup %6212  ;;  %6230 = vpow2.f32 %v5152_v22 }
 0x5f1   : > { %1462 = vrot.lane.b32.xlu0 %v6213_v11, %s8387_s20  ;;  %6232 = vpow2.f32 %v5151_v23 }
 0x5f2   : > { %v6215_v12 = vpop.eup %6214 }
 0x5f3   : > { %1468 = vrot.lane.b32.xlu1 %v6215_v12, %s8387_s20 }
 0x5f4   : > { %v6217_v15 = vpop.eup %6216 }
 0x5f5   : > { %1466 = vrot.lane.b32.xlu0 %v6217_v15, %s8387_s20 }
 0x5f6   : > { %v6219_v16 = vpop.eup %6218 }
 0x5f7   : > { %1472 = vrot.lane.b32.xlu1 %v6219_v16, %s8387_s20 }
 0x5f8   : > { %v6221_v17 = vpop.eup %6220 }
 0x5f9   : > { %1470 = vrot.lane.b32.xlu0 %v6221_v17, %s8387_s20  ;;  %v6223_v26 = vpop.eup %6222 }
 0x5fa   : > { %v6225_v61 = vpop.eup %6224  ;;  %v1413_v63 = vadd.f32 1.0, %v6223_v26 }
 0x5fb   : > { %v6227_v33 = vpop.eup %6226  ;;  %v1412_v34 = vadd.f32 1.0, %v6225_v61 }
 0x5fc   : > { %v6229_v14 = vpop.eup %6228  ;;  %v1415_v24 = vadd.f32 1.0, %v6227_v33 }
 0x5fd   : > { %v6231_v35 = vpop.eup %6230  ;;  %v1414_v27 = vadd.f32 1.0, %v6229_v14 }
 0x5fe   : > { %v6233_v38 = vpop.eup %6232  ;;  %v1417_v41 = vadd.f32 1.0, %v6231_v35 }
 0x5ff   : > { %v1416_v42 = vadd.f32 1.0, %v6233_v38 }
 0x64f   : > { %v5775_v29 = vpop.f32.mrf.mxu1 }
 0x650   : > { %v1724_v31 = vadd.f32 %v5775_v29, %v768_v58 }
 0x651   : > { %v1684_v6 = vpop.f32.mrf.mxu1 }
 0x652   : > { %6234 = vtanh.f32 %v1724_v31  ;;  %v1723_v9 = vadd.f32 %v1684_v6, %v763_v30  ;;  %v5162_v4 = vmul.f32 -1.442695, %v1724_v31 }
 0x653   : > { %6236 = vrcp.f32 %v1413_v63 }
 0x654   : > { %6238 = vtanh.f32 %v1723_v9  ;;  %v5161_v39 = vmul.f32 -1.442695, %v1723_v9 }
 0x655   : > { %6240 = vrcp.f32 %v1412_v34 }
 0x656   : > { %6242 = vrcp.f32 %v1415_v24 }
 0x657   : > { %6244 = vrcp.f32 %v1414_v27 }
 0x658   : > { %6246 = vrcp.f32 %v1417_v41 }
 0x659   : > { %6248 = vrcp.f32 %v1416_v42 }
 0x65a   : > { %6250 = vpow2.f32 %v5162_v4 }
 0x65b   : > { %6252 = vpow2.f32 %v5161_v39 }
 0x65f   : > { %v6235_v13 = vpop.eup %6234 }
 0x660   : > { %1805 = vrot.lane.b32.xlu1 %v6235_v13, %s8387_s20  ;;  %v7033_v43 = vpop.eup %6236 }
 0x661   : > { %v1465_v45 = vpop.permute.xlu1 %1464  ;;  %v6239_v47 = vpop.eup %6238  ;;  %v1445_v20 = vmul.f32 %v7033_v43, %v6928_v32 }
 0x662   : > { %v1485_v48 = vmul.f32 %v7033_v43, %v1465_v45  ;;  %1803 = vrot.lane.b32.xlu0 %v6239_v47, %s8387_s20  ;;  %v7037_v50 = vpop.eup %6240  ;;  %v430_v45 = vld [vmem:[%s6808_s17 + $0x90] sm:$0xff]  ;;  %v431_v47 = vld [vmem:[%s6808_s17 + $0x98] sm:$0xff] }
 0x663   : > { %v1463_v3 = vpop.permute.xlu0 %1462  ;;  %v7041_v52 = vpop.eup %6242  ;;  %v1444_v25 = vmul.f32 %v7037_v50, %v6934_v37  ;;  %5680 = vmatprep.mubr.msk.f32.mxu0 %vm471_vm0, %v430_v45 }
 0x664   : > { %1504 = vrot.lane.b32.xlu1 %v1485_v48, %s6648_s26  ;;  %v1484_v51 = vmul.f32 %v7037_v50, %v1463_v3  ;;  %v7045_v7 = vpop.eup %6244  ;;  %v1447_v28 = vmul.f32 %v7041_v52, %v6936_v40  ;;  %5681 = vmatmul.mubr.msk.f32.gmra.mxu0 %vm471_vm0, %v431_v47  ;;  %v433_v48 = vld [vmem:[%s6808_s17 + $0xa8] sm:$0xff]  ;;  %v434_v3 = vld [vmem:[%s6808_s17 + $0xb0] sm:$0xff] }
 0x665   : > { %v1469_v5 = vpop.permute.xlu1 %1468  ;;  %v7049_v55 = vpop.eup %6246  ;;  %v1446_v61 = vmul.f32 %v7045_v7, %v6942_v44 }
 0x666   : > { %v1487_v53 = vmul.f32 %v7041_v52, %v1469_v5  ;;  %1502 = vrot.lane.b32.xlu0 %v1484_v51, %s6648_s26  ;;  %v7053_v60 = vpop.eup %6248  ;;  %v1449_v30 = vmul.f32 %v7049_v55, %v6944_v46  ;;  %v435_v51 = vld [vmem:[%s6808_s17 + $0xb8] sm:$0xff] }
 0x667   : > { %v1467_v54 = vpop.permute.xlu0 %1466  ;;  %v6251_v8 = vpop.eup %6250  ;;  %v1448_v6 = vmul.f32 %v7053_v60, %v6949_v49 }
 0x668   : > { %v1486_v1 = vmul.f32 %v7045_v7, %v1467_v54  ;;  %1508 = vrot.lane.b32.xlu1 %v1487_v53, %s6648_s26  ;;  %v6253_v36 = vpop.eup %6252  ;;  %v1756_v11 = vadd.f32 1.0, %v6251_v8 }
 0x669   : > { %v1473_v56 = vpop.permute.xlu1 %1472  ;;  %v1755_v12 = vadd.f32 1.0, %v6253_v36 }
 0x66a   : > { %v1489_v57 = vmul.f32 %v7049_v55, %v1473_v56  ;;  %1506 = vrot.lane.b32.xlu0 %v1486_v1, %s6648_s26  ;;  %6254 = vrcp.f32 %v1756_v11  ;;  %v436_v1 = vld [vmem:[%s6808_s17 + $0xc0] sm:$0xff]  ;;  %v437_v56 = vld [vmem:[%s6808_s17 + $0xc8] sm:$0xff] }
 0x66b   : > { %v1471_v62 = vpop.permute.xlu0 %1470  ;;  %6256 = vrcp.f32 %v1755_v12 }
 0x66c   : > { %v1488_v2 = vmul.f32 %v7053_v60, %v1471_v62  ;;  %1512 = vrot.lane.b32.xlu1 %v1489_v57, %s6648_s26 }
 0x66e   : > { %1510 = vrot.lane.b32.xlu0 %v1488_v2, %s6648_s26 }
 0x677   : > { %v7058_v15 = vpop.eup %6254 }
 0x678   : > { %v7061_v18 = vpop.eup %6256  ;;  %v1788_v35 = vmul.f32 %v7058_v15, %v6960_v59  ;;  %v432_v59 = vld [vmem:[%s6808_s17 + $0xa0] sm:$0xff] }
 0x679   : > { %v1787_v41 = vmul.f32 %v7061_v18, %v6965_v0  ;;  %5683 = vmatprep.mubr.msk.f32.mxu0 %vm471_vm0, %v432_v59 }
 0x67a   : > { %5684 = vmatmul.mubr.msk.f32.gmra.mxu0 %vm471_vm0, %v433_v48 }
 0x67b   : > { %5686 = vmatprep.mubr.msk.f32.mxu0 %vm471_vm0, %v434_v3 }
 0x67e   : > { %5687 = vmatmul.mubr.msk.f32.gmra.mxu0 %vm471_vm0, %v435_v51 }
 0x67f   : > { %5689 = vmatprep.mubr.msk.f32.mxu0 %vm471_vm0, %v436_v1 }
 0x682   : > { %5690 = vmatmul.mubr.msk.f32.gmra.mxu0 %vm471_vm0, %v437_v56 }
 0x6d2   : > { %v1806_v16 = vpop.permute.xlu1 %1805 }
 0x6d3   : > { %v1828_v17 = vmul.f32 %v7058_v15, %v1806_v16 }
 0x6d4   : > { %v1804_v19 = vpop.permute.xlu0 %1803 }
 0x6d5   : > { %1845 = vrot.lane.b32.xlu1 %v1828_v17, %s6648_s26  ;;  %v1827_v21 = vmul.f32 %v7061_v18, %v1804_v19 }
 0x6d6   : > { %v1505_v22 = vpop.permute.xlu1 %1504 }
 0x6d7   : > { %v7067_v23 = vadd.f32 %v1505_v22, %v1445_v20  ;;  %1843 = vrot.lane.b32.xlu0 %v1827_v21, %s6648_s26  ;;  %v7157_v22 = vld [vmem:[%s8395_s2 + $0x18] sm:$0xff] }
 0x6d8   : > { %v1503_v58 = vpop.permute.xlu0 %1502 }
 0x6d9   : > { %6258 = vtanh.f32 %v7067_v23  ;;  %v7073_v26 = vadd.f32 %v1503_v58, %v1444_v25  ;;  %v7163_v25 = vld [vmem:[%s8395_s2 + $0x10] sm:$0xff]  ;;  %v7170_v58 = vld [vmem:[%s8395_s2 + $0x8] sm:$0xff] }
 0x6da   : > { %v1509_v29 = vpop.permute.xlu1 %1508 }
 0x6db   : > { %6260 = vtanh.f32 %v7073_v26  ;;  %v7078_v32 = vadd.f32 %v1509_v29, %v1447_v28  ;;  %v7177_v28 = vld [vmem:[%s8395_s2] sm:$0xff] }
 0x6dc   : > { %v1507_v63 = vpop.permute.xlu0 %1506 }
 0x6dd   : > { %6262 = vtanh.f32 %v7078_v32  ;;  %v7083_v37 = vadd.f32 %v1507_v63, %v1446_v61 }
 0x6de   : > { %v1513_v31 = vpop.permute.xlu1 %1512 }
 0x6df   : > { %6264 = vtanh.f32 %v7083_v37  ;;  %v7088_v40 = vadd.f32 %v1513_v31, %v1449_v30  ;;  %v7185_v31 = vld [vmem:[%s8377_s3] ss:$0 sm:$0xff] }
 0x6e0   : > { %v1511_v33 = vpop.permute.xlu0 %1510 }
 0x6e1   : > { %6266 = vtanh.f32 %v7088_v40  ;;  %v7093_v44 = vadd.f32 %v1511_v33, %v1448_v6 }
 0x6e3   : > { %6268 = vtanh.f32 %v7093_v44 }
 0x6e6   : > { %v6259_v9 = vpop.eup %6258 }
 0x6e7   : > { %1552 = vrot.lane.b32.xlu1 %v6259_v9, %s8387_s20 }
 0x6e8   : > { %v6261_v34 = vpop.eup %6260 }
 0x6e9   : > { %1550 = vrot.lane.b32.xlu0 %v6261_v34, %s8387_s20 }
 0x6ea   : > { %v6263_v46 = vpop.eup %6262 }
 0x6eb   : > { %1556 = vrot.lane.b32.xlu1 %v6263_v46, %s8387_s20 }
 0x6ec   : > { %v6265_v14 = vpop.eup %6264 }
 0x6ed   : > { %1554 = vrot.lane.b32.xlu0 %v6265_v14, %s8387_s20 }
 0x6ee   : > { %v6267_v49 = vpop.eup %6266 }
 0x6ef   : > { %1560 = vrot.lane.b32.xlu1 %v6267_v49, %s8387_s20 }
 0x6f0   : > { %v6269_v24 = vpop.eup %6268 }
 0x6f1   : > { %1558 = vrot.lane.b32.xlu0 %v6269_v24, %s8387_s20 }
 0x724   : > { %v5682_v29 = vpop.f32.mrf.mxu0 }
 0x725   : > { %v778_v6 = vadd.f32 %v7185_v31, %v5682_v29 }
 0x726   : > { %v772_v61 = vpop.f32.mrf.mxu0 }
 0x727   : > { %v773_v33 = vadd.f32 %v7185_v31, %v772_v61 }
 0x73a   : > { %v5685_v63 = vpop.f32.mrf.mxu0 }
 0x73b   : > { %v788_v14 = vadd.f32 %v7185_v31, %v5685_v63 }
 0x73c   : > { %v782_v30 = vpop.f32.mrf.mxu0 }
 0x73e   : > { %v5688_v34 = vpop.f32.mrf.mxu0 }
 0x73f   : > { %v798_v45 = vadd.f32 %v7185_v31, %v5688_v34 }
 0x747   : > { %v1846_v27 = vpop.permute.xlu1 %1845 }
 0x748   : > { %v7104_v38 = vadd.f32 %v1846_v27, %v1788_v35  ;;  %v783_v35 = vadd.f32 %v7185_v31, %v782_v30 }
 0x749   : > { %v1844_v42 = vpop.permute.xlu0 %1843 }
 0x74a   : > { %6270 = vtanh.f32 %v7104_v38  ;;  %v7109_v13 = vadd.f32 %v1844_v42, %v1787_v41  ;;  %v792_v41 = vpop.f32.mrf.mxu0 }
 0x74b   : > { %v793_v48 = vadd.f32 %v7185_v31, %v792_v41 }
 0x74c   : > { %6272 = vtanh.f32 %v7109_v13 }
 0x757   : > { %v6271_v0 = vpop.eup %6270 }
 0x758   : > { %1893 = vrot.lane.b32.xlu1 %v6271_v0, %s8387_s20 }
 0x759   : > { %v1553_v5 = vpop.permute.xlu1 %1552  ;;  %v6273_v53 = vpop.eup %6272 }
 0x75a   : > { %v1573_v54 = vmul.f32 %v7033_v43, %v1553_v5  ;;  %1891 = vrot.lane.b32.xlu0 %v6273_v53, %s8387_s20 }
 0x75b   : > { %v1551_v57 = vpop.permute.xlu0 %1550 }
 0x75c   : > { %1592 = vrot.lane.b32.xlu1 %v1573_v54, %s6648_s26  ;;  %v1572_v62 = vmul.f32 %v7037_v50, %v1551_v57 }
 0x75d   : > { %v1557_v2 = vpop.permute.xlu1 %1556 }
 0x75e   : > { %v1575_v4 = vmul.f32 %v7041_v52, %v1557_v2  ;;  %1590 = vrot.lane.b32.xlu0 %v1572_v62, %s6648_s26 }
 0x75f   : > { %v1555_v39 = vpop.permute.xlu0 %1554 }
 0x760   : > { %v1574_v43 = vmul.f32 %v7045_v7, %v1555_v39  ;;  %1596 = vrot.lane.b32.xlu1 %v1575_v4, %s6648_s26 }
 0x761   : > { %v1561_v8 = vpop.permute.xlu1 %1560 }
 0x762   : > { %v1577_v36 = vmul.f32 %v7049_v55, %v1561_v8  ;;  %1594 = vrot.lane.b32.xlu0 %v1574_v43, %s6648_s26 }
 0x763   : > { %v1559_v11 = vpop.permute.xlu0 %1558 }
 0x764   : > { %v1576_v50 = vmul.f32 %v7053_v60, %v1559_v11  ;;  %1600 = vrot.lane.b32.xlu1 %v1577_v36, %s6648_s26  ;;  %v5691_v11 = vpop.f32.mrf.mxu0 }
 0x766   : > { %1598 = vrot.lane.b32.xlu0 %v1576_v50, %s6648_s26  ;;  %v808_v50 = vadd.f32 %v7185_v31, %v5691_v11 }
 0x7ca   : > { %v1894_v52 = vpop.permute.xlu1 %1893 }
 0x7cb   : > { %v1916_v12 = vmul.f32 %v7058_v15, %v1894_v52 }
 0x7cc   : > { %v1892_v16 = vpop.permute.xlu0 %1891 }
 0x7cd   : > { %1933 = vrot.lane.b32.xlu1 %v1916_v12, %s6648_s26  ;;  %v1915_v7 = vmul.f32 %v7061_v18, %v1892_v16  ;;  %v802_v12 = vpop.f32.mrf.mxu0 }
 0x7ce   : > { %v1593_v17 = vpop.permute.xlu1 %1592 }
 0x7cf   : > { %1931 = vrot.lane.b32.xlu0 %v1915_v7, %s6648_s26 }
 0x7d0   : > { %v1591_v55 = vpop.permute.xlu0 %1590 }
 0x7d1   : > { %5776 = vmatprep.mubr.msk.f32.mxu1 %vm471_vm0, %v1591_v55  ;;  %v803_v55 = vadd.f32 %v7185_v31, %v802_v12 }
 0x7d2   : > { %5777 = vmatmul.mubr.msk.f32.gmra.mxu1 %vm471_vm0, %v1593_v17  ;;  %v1597_v60 = vpop.permute.xlu1 %1596 }
 0x7d4   : > { %v1595_v19 = vpop.permute.xlu0 %1594 }
 0x7d5   : > { %5779 = vmatprep.mubr.msk.f32.mxu1 %vm471_vm0, %v1595_v19 }
 0x7d6   : > { %5780 = vmatmul.mubr.msk.f32.gmra.mxu1 %vm471_vm0, %v1597_v60  ;;  %v1601_v20 = vpop.permute.xlu1 %1600 }
 0x7d8   : > { %v1599_v15 = vpop.permute.xlu0 %1598 }
 0x7d9   : > { %5782 = vmatprep.mubr.msk.f32.mxu1 %vm471_vm0, %v1599_v15 }
 0x7da   : > { %5783 = vmatmul.mubr.msk.f32.gmra.mxu1 %vm471_vm0, %v1601_v20 }
 0x83f   : > { %v1934_v21 = vpop.permute.xlu1 %1933 }
 0x841   : > { %v1932_v18 = vpop.permute.xlu0 %1931 }
 0x842   : > { %5793 = vmatprep.mubr.msk.f32.mxu1 %vm471_vm0, %v1932_v18 }
 0x843   : > { %5794 = vmatmul.mubr.msk.f32.vlgmr.msra.gmra.mxu1 %vm471_vm0, %v1934_v21 }
 0x844   : > { %5806 = vmatpush3.msra.mxu1 %v7157_v22 }
 0x845   : > { %5807 = vmatprep.subr.mxu1 %v7163_v25 }
 0x846   : > { %5808 = vmatpush3.msra.mxu1 %v7163_v25 }
 0x847   : > { %5809 = vmatprep.subr.mxu1 %v7170_v58 }
 0x848   : > { %5810 = vmatpush3.msra.mxu1 %v7170_v58 }
 0x849   : > { %5811 = vmatprep.subr.mxu1 %v7177_v28 }
 0x84a   : > { %5812 = vmatpush3.msra.mxu1 %v7177_v28 }
 0x84b   : > { %5825 = vmatprep.subr.mxu1 %v7157_v22 }
 0x892   : > { %v5778_v9 = vpop.f32.mrf.mxu1 }
 0x893   : > { %v1726_v46 = vadd.f32 %v5778_v9, %v778_v6 }
 0x894   : > { %v1694_v49 = vpop.f32.mrf.mxu1 }
 0x895   : > { %6274 = vtanh.f32 %v1726_v46  ;;  %v1725_v24 = vadd.f32 %v1694_v49, %v773_v33  ;;  %v5164_v2 = vmul.f32 -1.442695, %v1726_v46 }
 0x896   : > { %v5781_v27 = vpop.f32.mrf.mxu1 }
 0x897   : > { %v1728_v42 = vadd.f32 %v5781_v27, %v788_v14  ;;  %6276 = vtanh.f32 %v1725_v24  ;;  %v5163_v4 = vmul.f32 -1.442695, %v1725_v24 }
 0x898   : > { %v1704_v47 = vpop.f32.mrf.mxu1 }
 0x899   : > { %v1727_v59 = vadd.f32 %v1704_v47, %v783_v35  ;;  %6278 = vtanh.f32 %v1728_v42  ;;  %v5166_v39 = vmul.f32 -1.442695, %v1728_v42 }
 0x89a   : > { %v5784_v0 = vpop.f32.mrf.mxu1 }
 0x89b   : > { %v1730_v3 = vadd.f32 %v5784_v0, %v798_v45  ;;  %6280 = vtanh.f32 %v1727_v59  ;;  %v5165_v43 = vmul.f32 -1.442695, %v1727_v59 }
 0x89c   : > { %v1714_v51 = vpop.f32.mrf.mxu1 }
 0x89d   : > { %v1729_v5 = vadd.f32 %v1714_v51, %v793_v48  ;;  %6282 = vtanh.f32 %v1730_v3  ;;  %v5168_v8 = vmul.f32 -1.442695, %v1730_v3 }
 0x89f   : > { %6284 = vtanh.f32 %v1729_v5  ;;  %v5167_v36 = vmul.f32 -1.442695, %v1729_v5 }
 0x8a0   : > { %6286 = vpow2.f32 %v5164_v2 }
 0x8a1   : > { %6288 = vpow2.f32 %v5163_v4 }
 0x8a2   : > { %v6275_v53 = vpop.eup %6274  ;;  %6290 = vpow2.f32 %v5166_v39 }
 0x8a3   : > { %1809 = vrot.lane.b32.xlu1 %v6275_v53, %s8387_s20  ;;  %6292 = vpow2.f32 %v5165_v43 }
 0x8a4   : > { %v6277_v54 = vpop.eup %6276  ;;  %6294 = vpow2.f32 %v5168_v8 }
 0x8a5   : > { %1807 = vrot.lane.b32.xlu0 %v6277_v54, %s8387_s20  ;;  %6296 = vpow2.f32 %v5167_v36 }
 0x8a6   : > { %v6279_v1 = vpop.eup %6278 }
 0x8a7   : > { %1813 = vrot.lane.b32.xlu1 %v6279_v1, %s8387_s20 }
 0x8a8   : > { %v6281_v56 = vpop.eup %6280 }
 0x8a9   : > { %1811 = vrot.lane.b32.xlu0 %v6281_v56, %s8387_s20 }
 0x8aa   : > { %v6283_v57 = vpop.eup %6282 }
 0x8ab   : > { %1817 = vrot.lane.b32.xlu1 %v6283_v57, %s8387_s20 }
 0x8ac   : > { %v6285_v62 = vpop.eup %6284 }
 0x8ad   : > { %1815 = vrot.lane.b32.xlu0 %v6285_v62, %s8387_s20  ;;  %v6287_v52 = vpop.eup %6286 }
 0x8ae   : > { %v6289_v7 = vpop.eup %6288  ;;  %v1758_v17 = vadd.f32 1.0, %v6287_v52 }
 0x8af   : > { %v6291_v15 = vpop.eup %6290  ;;  %v1757_v18 = vadd.f32 1.0, %v6289_v7 }
 0x8b0   : > { %v6293_v21 = vpop.eup %6292  ;;  %v1760_v29 = vadd.f32 1.0, %v6291_v15 }
 0x8b1   : > { %v6295_v61 = vpop.eup %6294  ;;  %v1759_v63 = vadd.f32 1.0, %v6293_v21 }
 0x8b2   : > { %v6297_v30 = vpop.eup %6296  ;;  %v1762_v6 = vadd.f32 1.0, %v6295_v61 }
 0x8b3   : > { %v1761_v33 = vadd.f32 1.0, %v6297_v30 }
 0x903   : > { %v5795_v16 = vpop.f32.mrf.mxu1 }
 0x904   : > { %v2069_v60 = vadd.f32 %v5795_v16, %v808_v50 }
 0x905   : > { %v2029_v19 = vpop.f32.mrf.mxu1 }
 0x906   : > { %6298 = vtanh.f32 %v2069_v60  ;;  %v2068_v20 = vadd.f32 %v2029_v19, %v803_v55  ;;  %v5178_v1 = vmul.f32 -1.442695, %v2069_v60 }
 0x907   : > { %6300 = vrcp.f32 %v1758_v17 }
 0x908   : > { %6302 = vtanh.f32 %v2068_v20  ;;  %v5177_v56 = vmul.f32 -1.442695, %v2068_v20 }
 0x909   : > { %6304 = vrcp.f32 %v1757_v18 }
 0x90a   : > { %6306 = vrcp.f32 %v1760_v29 }
 0x90b   : > { %6308 = vrcp.f32 %v1759_v63 }
 0x90c   : > { %6310 = vrcp.f32 %v1762_v6 }
 0x90d   : > { %6312 = vrcp.f32 %v1761_v33 }
 0x90e   : > { %6314 = vpow2.f32 %v5178_v1  ;;  %v444_v1 = vld [vmem:[%s6808_s17 + $0x100] sm:$0xff] }
 0x90f   : > { %6316 = vpow2.f32 %v5177_v56  ;;  %v445_v56 = vld [vmem:[%s6808_s17 + $0x108] sm:$0xff] }
 0x913   : > { %v6299_v9 = vpop.eup %6298 }
 0x914   : > { %2150 = vrot.lane.b32.xlu1 %v6299_v9, %s8387_s20  ;;  %v7202_v34 = vpop.eup %6300 }
 0x915   : > { %v1810_v46 = vpop.permute.xlu1 %1809  ;;  %v6303_v14 = vpop.eup %6302  ;;  %v1790_v50 = vmul.f32 %v7202_v34, %v7067_v23 }
 0x916   : > { %v1830_v49 = vmul.f32 %v7202_v34, %v1810_v46  ;;  %2148 = vrot.lane.b32.xlu0 %v6303_v14, %s8387_s20  ;;  %v7206_v24 = vpop.eup %6304 }
 0x917   : > { %v1808_v35 = vpop.permute.xlu0 %1807  ;;  %v7210_v41 = vpop.eup %6306  ;;  %v1789_v7 = vmul.f32 %v7206_v24, %v7073_v26 }
 0x918   : > { %1849 = vrot.lane.b32.xlu1 %v1830_v49, %s6648_s26  ;;  %v1829_v27 = vmul.f32 %v7206_v24, %v1808_v35  ;;  %v7214_v47 = vpop.eup %6308  ;;  %v1792_v60 = vmul.f32 %v7210_v41, %v7078_v32 }
 0x919   : > { %v1814_v42 = vpop.permute.xlu1 %1813  ;;  %v7218_v0 = vpop.eup %6310  ;;  %v1791_v15 = vmul.f32 %v7214_v47, %v7083_v37 }
 0x91a   : > { %v1832_v45 = vmul.f32 %v7210_v41, %v1814_v42  ;;  %1847 = vrot.lane.b32.xlu0 %v1829_v27, %s6648_s26  ;;  %v7222_v5 = vpop.eup %6312  ;;  %v1794_v18 = vmul.f32 %v7218_v0, %v7088_v40  ;;  %v438_v42 = vld [vmem:[%s6808_s17 + $0xd0] sm:$0xff] }
 0x91b   : > { %v1812_v59 = vpop.permute.xlu0 %1811  ;;  %v6315_v57 = vpop.eup %6314  ;;  %v1793_v29 = vmul.f32 %v7222_v5, %v7093_v44  ;;  %5692 = vmatprep.mubr.msk.f32.mxu0 %vm471_vm0, %v438_v42 }
 0x91c   : > { %v1831_v48 = vmul.f32 %v7214_v47, %v1812_v59  ;;  %1853 = vrot.lane.b32.xlu1 %v1832_v45, %s6648_s26  ;;  %v6317_v62 = vpop.eup %6316  ;;  %v2101_v2 = vadd.f32 1.0, %v6315_v57  ;;  %v439_v45 = vld [vmem:[%s6808_s17 + $0xd8] sm:$0xff]  ;;  %v441_v59 = vld [vmem:[%s6808_s17 + $0xe8] sm:$0xff] }
 0x91d   : > { %v1818_v3 = vpop.permute.xlu1 %1817  ;;  %v2100_v4 = vadd.f32 1.0, %v6317_v62  ;;  %5693 = vmatmul.mubr.msk.f32.gmra.mxu0 %vm471_vm0, %v439_v45 }
 0x91e   : > { %v1834_v51 = vmul.f32 %v7218_v0, %v1818_v3  ;;  %1851 = vrot.lane.b32.xlu0 %v1831_v48, %s6648_s26  ;;  %6318 = vrcp.f32 %v2101_v2  ;;  %v442_v48 = vld [vmem:[%s6808_s17 + $0xf0] sm:$0xff]  ;;  %v443_v3 = vld [vmem:[%s6808_s17 + $0xf8] sm:$0xff] }
 0x91f   : > { %v1816_v53 = vpop.permute.xlu0 %1815  ;;  %6320 = vrcp.f32 %v2100_v4 }
 0x920   : > { %v1833_v54 = vmul.f32 %v7222_v5, %v1816_v53  ;;  %1857 = vrot.lane.b32.xlu1 %v1834_v51, %s6648_s26 }
 0x922   : > { %1855 = vrot.lane.b32.xlu0 %v1833_v54, %s6648_s26 }
 0x92b   : > { %v7227_v39 = vpop.eup %6318 }
 0x92c   : > { %v7230_v36 = vpop.eup %6320  ;;  %v2133_v9 = vmul.f32 %v7227_v39, %v7104_v38  ;;  %v440_v38 = vld [vmem:[%s6808_s17 + $0xe0] sm:$0xff] }
 0x92d   : > { %v2132_v49 = vmul.f32 %v7230_v36, %v7109_v13  ;;  %5695 = vmatprep.mubr.msk.f32.mxu0 %vm471_vm0, %v440_v38 }
 0x92e   : > { %5696 = vmatmul.mubr.msk.f32.gmra.mxu0 %vm471_vm0, %v441_v59 }
 0x92f   : > { %5698 = vmatprep.mubr.msk.f32.mxu0 %vm471_vm0, %v442_v48 }
 0x932   : > { %5699 = vmatmul.mubr.msk.f32.gmra.mxu0 %vm471_vm0, %v443_v3 }
 0x933   : > { %5701 = vmatprep.mubr.msk.f32.mxu0 %vm471_vm0, %v444_v1 }
 0x936   : > { %5702 = vmatmul.mubr.msk.f32.gmra.mxu0 %vm471_vm0, %v445_v56 }
 0x986   : > { %v2151_v43 = vpop.permute.xlu1 %2150 }
 0x987   : > { %v2173_v8 = vmul.f32 %v7227_v39, %v2151_v43 }
 0x988   : > { %v2149_v11 = vpop.permute.xlu0 %2148 }
 0x989   : > { %2190 = vrot.lane.b32.xlu1 %v2173_v8, %s6648_s26  ;;  %v2172_v52 = vmul.f32 %v7230_v36, %v2149_v11 }
 0x98a   : > { %v1850_v12 = vpop.permute.xlu1 %1849 }
 0x98b   : > { %v7236_v16 = vadd.f32 %v1850_v12, %v1790_v50  ;;  %2188 = vrot.lane.b32.xlu0 %v2172_v52, %s6648_s26 }
 0x98c   : > { %v1848_v17 = vpop.permute.xlu0 %1847 }
 0x98d   : > { %6322 = vtanh.f32 %v7236_v16  ;;  %v7242_v55 = vadd.f32 %v1848_v17, %v1789_v7 }
 0x98e   : > { %v1854_v19 = vpop.permute.xlu1 %1853 }
 0x98f   : > { %6324 = vtanh.f32 %v7242_v55  ;;  %v7247_v23 = vadd.f32 %v1854_v19, %v1792_v60 }
 0x990   : > { %v1852_v20 = vpop.permute.xlu0 %1851 }
 0x991   : > { %6326 = vtanh.f32 %v7247_v23  ;;  %v7252_v26 = vadd.f32 %v1852_v20, %v1791_v15 }
 0x992   : > { %v1858_v21 = vpop.permute.xlu1 %1857 }
 0x993   : > { %6328 = vtanh.f32 %v7252_v26  ;;  %v7257_v32 = vadd.f32 %v1858_v21, %v1794_v18 }
 0x994   : > { %v1856_v61 = vpop.permute.xlu0 %1855 }
 0x995   : > { %6330 = vtanh.f32 %v7257_v32  ;;  %v7262_v37 = vadd.f32 %v1856_v61, %v1793_v29 }
 0x997   : > { %6332 = vtanh.f32 %v7262_v37 }
 0x99a   : > { %v6323_v63 = vpop.eup %6322 }
 0x99b   : > { %1897 = vrot.lane.b32.xlu1 %v6323_v63, %s8387_s20 }
 0x99c   : > { %v6325_v30 = vpop.eup %6324 }
 0x99d   : > { %1895 = vrot.lane.b32.xlu0 %v6325_v30, %s8387_s20 }
 0x99e   : > { %v6327_v40 = vpop.eup %6326 }
 0x99f   : > { %1901 = vrot.lane.b32.xlu1 %v6327_v40, %s8387_s20 }
 0x9a0   : > { %v6329_v6 = vpop.eup %6328 }
 0x9a1   : > { %1899 = vrot.lane.b32.xlu0 %v6329_v6, %s8387_s20 }
 0x9a2   : > { %v6331_v44 = vpop.eup %6330 }
 0x9a3   : > { %1905 = vrot.lane.b32.xlu1 %v6331_v44, %s8387_s20 }
 0x9a4   : > { %v6333_v33 = vpop.eup %6332 }
 0x9a5   : > { %1903 = vrot.lane.b32.xlu0 %v6333_v33, %s8387_s20 }
 0x9dd   : > { %v5694_v15 = vpop.f32.mrf.mxu0 }
 0x9df   : > { %v812_v20 = vpop.f32.mrf.mxu0 }
 0x9e0   : > { %v813_v29 = vadd.f32 %v7185_v31, %v812_v20 }
 0x9ee   : > { %v5697_v18 = vpop.f32.mrf.mxu0 }
 0x9ef   : > { %v828_v30 = vadd.f32 %v7185_v31, %v5697_v18 }
 0x9f0   : > { %v822_v21 = vpop.f32.mrf.mxu0 }
 0x9fb   : > { %v2191_v46 = vpop.permute.xlu1 %2190 }
 0x9fc   : > { %v7273_v14 = vadd.f32 %v2191_v46, %v2133_v9 }
 0x9fd   : > { %v2189_v35 = vpop.permute.xlu0 %2188 }
 0x9fe   : > { %6334 = vtanh.f32 %v7273_v14  ;;  %v7278_v27 = vadd.f32 %v2189_v35, %v2132_v49 }
 0xa00   : > { %6336 = vtanh.f32 %v7278_v27 }
 0xa0b   : > { %v6335_v13 = vpop.eup %6334 }
 0xa0c   : > { %2238 = vrot.lane.b32.xlu1 %v6335_v13, %s8387_s20 }
 0xa0d   : > { %v1898_v51 = vpop.permute.xlu1 %1897  ;;  %v6337_v53 = vpop.eup %6336 }
 0xa0e   : > { %v1918_v54 = vmul.f32 %v7202_v34, %v1898_v51  ;;  %2236 = vrot.lane.b32.xlu0 %v6337_v53, %s8387_s20 }
 0xa0f   : > { %v1896_v57 = vpop.permute.xlu0 %1895 }
 0xa10   : > { %1937 = vrot.lane.b32.xlu1 %v1918_v54, %s6648_s26  ;;  %v1917_v62 = vmul.f32 %v7206_v24, %v1896_v57 }
 0xa11   : > { %v1902_v2 = vpop.permute.xlu1 %1901 }
 0xa12   : > { %v1920_v4 = vmul.f32 %v7210_v41, %v1902_v2  ;;  %1935 = vrot.lane.b32.xlu0 %v1917_v62, %s6648_s26 }
 0xa13   : > { %v1900_v43 = vpop.permute.xlu0 %1899 }
 0xa14   : > { %v1919_v34 = vmul.f32 %v7214_v47, %v1900_v43  ;;  %1941 = vrot.lane.b32.xlu1 %v1920_v4, %s6648_s26 }
 0xa15   : > { %v1906_v8 = vpop.permute.xlu1 %1905 }
 0xa16   : > { %v1922_v11 = vmul.f32 %v7218_v0, %v1906_v8  ;;  %1939 = vrot.lane.b32.xlu0 %v1919_v34, %s6648_s26 }
 0xa17   : > { %v1904_v50 = vpop.permute.xlu0 %1903 }
 0xa18   : > { %v1921_v24 = vmul.f32 %v7222_v5, %v1904_v50  ;;  %1945 = vrot.lane.b32.xlu1 %v1922_v11, %s6648_s26 }
 0xa1a   : > { %1943 = vrot.lane.b32.xlu0 %v1921_v24, %s6648_s26 }
 0xa7e   : > { %v2239_v41 = vpop.permute.xlu1 %2238 }
 0xa7f   : > { %v2261_v52 = vmul.f32 %v7227_v39, %v2239_v41 }
 0xa80   : > { %v2237_v12 = vpop.permute.xlu0 %2236 }
 0xa81   : > { %2278 = vrot.lane.b32.xlu1 %v2261_v52, %s6648_s26  ;;  %v2260_v47 = vmul.f32 %v7230_v36, %v2237_v12 }
 0xa82   : > { %v1938_v7 = vpop.permute.xlu1 %1937 }
 0xa83   : > { %2276 = vrot.lane.b32.xlu0 %v2260_v47, %s6648_s26 }
 0xa84   : > { %v1936_v0 = vpop.permute.xlu0 %1935 }
 0xa85   : > { %5796 = vmatprep.mubr.msk.f32.mxu1 %vm471_vm0, %v1936_v0 }
 0xa86   : > { %5797 = vmatmul.mubr.msk.f32.gmra.mxu1 %vm471_vm0, %v1938_v7  ;;  %v1942_v5 = vpop.permute.xlu1 %1941 }
 0xa88   : > { %v1940_v17 = vpop.permute.xlu0 %1939 }
 0xa89   : > { %5799 = vmatprep.mubr.msk.f32.mxu1 %vm471_vm0, %v1940_v17 }
 0xa8a   : > { %5800 = vmatmul.mubr.msk.f32.gmra.mxu1 %vm471_vm0, %v1942_v5  ;;  %v1946_v60 = vpop.permute.xlu1 %1945 }
 0xa8c   : > { %v1944_v39 = vpop.permute.xlu0 %1943 }
 0xa8d   : > { %5802 = vmatprep.mubr.msk.f32.mxu1 %vm471_vm0, %v1944_v39 }
 0xa8e   : > { %5803 = vmatmul.mubr.msk.f32.gmra.mxu1 %vm471_vm0, %v1946_v60 }
 0xaf3   : > { %v2279_v19 = vpop.permute.xlu1 %2278 }
 0xaf5   : > { %v2277_v36 = vpop.permute.xlu0 %2276 }
 0xaf6   : > { %5813 = vmatprep.mubr.msk.f32.mxu1 %vm471_vm0, %v2277_v36 }
 0xaf7   : > { %5814 = vmatmul.mubr.msk.f32.vlgmr.msra.gmra.mxu1 %vm471_vm0, %v2279_v19 }
 0xaf8   : > { %5826 = vmatpush3.msra.mxu1 %v7157_v22  ;;  %v818_v22 = vadd.f32 %v7185_v31, %v5694_v15 }
 0xaf9   : > { %5827 = vmatprep.subr.mxu1 %v7163_v25 }
 0xafa   : > { %5828 = vmatpush3.msra.mxu1 %v7163_v25  ;;  %v5700_v25 = vpop.f32.mrf.mxu0 }
 0xafb   : > { %5829 = vmatprep.subr.mxu1 %v7170_v58  ;;  %v838_v9 = vadd.f32 %v7185_v31, %v5700_v25 }
 0xafc   : > { %5830 = vmatpush3.msra.mxu1 %v7170_v58  ;;  %v832_v44 = vpop.f32.mrf.mxu0 }
 0xafd   : > { %5831 = vmatprep.subr.mxu1 %v7177_v28  ;;  %v833_v35 = vadd.f32 %v7185_v31, %v832_v44 }
 0xafe   : > { %5832 = vmatpush3.msra.mxu1 %v7177_v28  ;;  %v823_v28 = vadd.f32 %v7185_v31, %v822_v21  ;;  %v5703_v43 = vpop.f32.mrf.mxu0 }
 0xaff   : > { %5865 = vmatprep.subr.mxu1 %v6646_v10  ;;  %v848_v34 = vadd.f32 %v7185_v31, %v5703_v43 }
 0xb00   : > { %v842_v11 = vpop.f32.mrf.mxu0 }
 0xb01   : > { %v843_v52 = vadd.f32 %v7185_v31, %v842_v11 }
 0xb46   : > { %v5798_v61 = vpop.f32.mrf.mxu1 }
 0xb47   : > { %v2071_v63 = vadd.f32 %v5798_v61, %v818_v22 }
 0xb48   : > { %v2039_v58 = vpop.f32.mrf.mxu1 }
 0xb49   : > { %6338 = vtanh.f32 %v2071_v63  ;;  %v2070_v40 = vadd.f32 %v2039_v58, %v813_v29  ;;  %v5180_v1 = vmul.f32 -1.442695, %v2071_v63 }
 0xb4a   : > { %v5801_v6 = vpop.f32.mrf.mxu1 }
 0xb4b   : > { %v2073_v33 = vadd.f32 %v5801_v6, %v828_v30  ;;  %6340 = vtanh.f32 %v2070_v40  ;;  %v5179_v56 = vmul.f32 -1.442695, %v2070_v40 }
 0xb4c   : > { %v2049_v46 = vpop.f32.mrf.mxu1 }
 0xb4d   : > { %v2072_v49 = vadd.f32 %v2049_v46, %v823_v28  ;;  %6342 = vtanh.f32 %v2073_v33  ;;  %v5182_v57 = vmul.f32 -1.442695, %v2073_v33 }
 0xb4e   : > { %v5804_v42 = vpop.f32.mrf.mxu1 }
 0xb4f   : > { %v2075_v45 = vadd.f32 %v5804_v42, %v838_v9  ;;  %6344 = vtanh.f32 %v2072_v49  ;;  %v5181_v62 = vmul.f32 -1.442695, %v2072_v49 }
 0xb50   : > { %v2059_v38 = vpop.f32.mrf.mxu1 }
 0xb51   : > { %v2074_v59 = vadd.f32 %v2059_v38, %v833_v35  ;;  %6346 = vtanh.f32 %v2075_v45  ;;  %v5184_v2 = vmul.f32 -1.442695, %v2075_v45 }
 0xb53   : > { %6348 = vtanh.f32 %v2074_v59  ;;  %v5183_v4 = vmul.f32 -1.442695, %v2074_v59 }
 0xb54   : > { %6350 = vpow2.f32 %v5180_v1 }
 0xb55   : > { %6352 = vpow2.f32 %v5179_v56 }
 0xb56   : > { %v6339_v13 = vpop.eup %6338  ;;  %6354 = vpow2.f32 %v5182_v57 }
 0xb57   : > { %2154 = vrot.lane.b32.xlu1 %v6339_v13, %s8387_s20  ;;  %6356 = vpow2.f32 %v5181_v62 }
 0xb58   : > { %v6341_v48 = vpop.eup %6340  ;;  %6358 = vpow2.f32 %v5184_v2 }
 0xb59   : > { %2152 = vrot.lane.b32.xlu0 %v6341_v48, %s8387_s20  ;;  %6360 = vpow2.f32 %v5183_v4 }
 0xb5a   : > { %v6343_v3 = vpop.eup %6342 }
 0xb5b   : > { %2158 = vrot.lane.b32.xlu1 %v6343_v3, %s8387_s20 }
 0xb5c   : > { %v6345_v51 = vpop.eup %6344 }
 0xb5d   : > { %2156 = vrot.lane.b32.xlu0 %v6345_v51, %s8387_s20 }
 0xb5e   : > { %v6347_v53 = vpop.eup %6346 }
 0xb5f   : > { %2162 = vrot.lane.b32.xlu1 %v6347_v53, %s8387_s20 }
 0xb60   : > { %v6349_v54 = vpop.eup %6348 }
 0xb61   : > { %2160 = vrot.lane.b32.xlu0 %v6349_v54, %s8387_s20  ;;  %v6351_v8 = vpop.eup %6350 }
 0xb62   : > { %v6353_v24 = vpop.eup %6352  ;;  %v2103_v41 = vadd.f32 1.0, %v6351_v8 }
 0xb63   : > { %v6355_v7 = vpop.eup %6354  ;;  %v2102_v5 = vadd.f32 1.0, %v6353_v24 }
 0xb64   : > { %v6357_v17 = vpop.eup %6356  ;;  %v2105_v39 = vadd.f32 1.0, %v6355_v7 }
 0xb65   : > { %v6359_v60 = vpop.eup %6358  ;;  %v2104_v36 = vadd.f32 1.0, %v6357_v17 }
 0xb66   : > { %v6361_v19 = vpop.eup %6360  ;;  %v2107_v15 = vadd.f32 1.0, %v6359_v60 }
 0xb67   : > { %v2106_v20 = vadd.f32 1.0, %v6361_v19 }
 0xbb7   : > { %v5815_v50 = vpop.f32.mrf.mxu1 }
 0xbb8   : > { %v2414_v12 = vadd.f32 %v5815_v50, %v848_v34 }
 0xbb9   : > { %v2374_v47 = vpop.f32.mrf.mxu1 }
 0xbba   : > { %6362 = vtanh.f32 %v2414_v12  ;;  %v2413_v0 = vadd.f32 %v2374_v47, %v843_v52  ;;  %v5194_v38 = vmul.f32 -1.442695, %v2414_v12 }
 0xbbb   : > { %6364 = vrcp.f32 %v2103_v41 }
 0xbbc   : > { %6366 = vtanh.f32 %v2413_v0  ;;  %v5193_v59 = vmul.f32 -1.442695, %v2413_v0 }
 0xbbd   : > { %6368 = vrcp.f32 %v2102_v5 }
 0xbbe   : > { %6370 = vrcp.f32 %v2105_v39 }
 0xbbf   : > { %6372 = vrcp.f32 %v2104_v36 }
 0xbc0   : > { %6374 = vrcp.f32 %v2107_v15 }
 0xbc1   : > { %6376 = vrcp.f32 %v2106_v20 }
 0xbc2   : > { %6378 = vpow2.f32 %v5194_v38 }
 0xbc3   : > { %6380 = vpow2.f32 %v5193_v59 }
 0xbc7   : > { %v6363_v18 = vpop.eup %6362 }
 0xbc8   : > { %2495 = vrot.lane.b32.xlu1 %v6363_v18, %s8387_s20  ;;  %v7346_v21 = vpop.eup %6364 }
 0xbc9   : > { %v2155_v22 = vpop.permute.xlu1 %2154  ;;  %v6367_v29 = vpop.eup %6366  ;;  %v2135_v62 = vmul.f32 %v7346_v21, %v7236_v16 }
 0xbca   : > { %v2175_v61 = vmul.f32 %v7346_v21, %v2155_v22  ;;  %2493 = vrot.lane.b32.xlu0 %v6367_v29, %s8387_s20  ;;  %v7350_v25 = vpop.eup %6368  ;;  %v446_v29 = vld [vmem:[%s6808_s17 + $0x110] sm:$0xff] }
 0xbcb   : > { %v2153_v63 = vpop.permute.xlu0 %2152  ;;  %v7354_v58 = vpop.eup %6370  ;;  %v2134_v34 = vmul.f32 %v7350_v25, %v7242_v55  ;;  %5704 = vmatprep.mubr.msk.f32.mxu0 %vm471_vm0, %v446_v29 }
 0xbcc   : > { %2194 = vrot.lane.b32.xlu1 %v2175_v61, %s6648_s26  ;;  %v2174_v30 = vmul.f32 %v7350_v25, %v2153_v63  ;;  %v7358_v6 = vpop.eup %6372  ;;  %v2137_v50 = vmul.f32 %v7354_v58, %v7247_v23  ;;  %v447_v61 = vld [vmem:[%s6808_s17 + $0x118] sm:$0xff]  ;;  %v449_v63 = vld [vmem:[%s6808_s17 + $0x128] sm:$0xff] }
 0xbcd   : > { %v2159_v40 = vpop.permute.xlu1 %2158  ;;  %v7362_v9 = vpop.eup %6374  ;;  %v2136_v41 = vmul.f32 %v7358_v6, %v7252_v26  ;;  %5705 = vmatmul.mubr.msk.f32.gmra.mxu0 %vm471_vm0, %v447_v61 }
 0xbce   : > { %v2177_v28 = vmul.f32 %v7354_v58, %v2159_v40  ;;  %2192 = vrot.lane.b32.xlu0 %v2174_v30, %s6648_s26  ;;  %v7366_v35 = vpop.eup %6376  ;;  %v2139_v12 = vmul.f32 %v7362_v9, %v7257_v32  ;;  %v450_v30 = vld [vmem:[%s6808_s17 + $0x130] sm:$0xff]  ;;  %v451_v40 = vld [vmem:[%s6808_s17 + $0x138] sm:$0xff] }
 0xbcf   : > { %v2157_v44 = vpop.permute.xlu0 %2156  ;;  %v6379_v13 = vpop.eup %6378  ;;  %v2138_v7 = vmul.f32 %v7366_v35, %v7262_v37 }
 0xbd0   : > { %v2176_v33 = vmul.f32 %v7358_v6, %v2157_v44  ;;  %2198 = vrot.lane.b32.xlu1 %v2177_v28, %s6648_s26  ;;  %v6381_v48 = vpop.eup %6380  ;;  %v2446_v3 = vadd.f32 1.0, %v6379_v13 }
 0xbd1   : > { %v2163_v46 = vpop.permute.xlu1 %2162  ;;  %v2445_v51 = vadd.f32 1.0, %v6381_v48 }
 0xbd2   : > { %v2179_v49 = vmul.f32 %v7362_v9, %v2163_v46  ;;  %2196 = vrot.lane.b32.xlu0 %v2176_v33, %s6648_s26  ;;  %6382 = vrcp.f32 %v2446_v3  ;;  %v452_v46 = vld [vmem:[%s6808_s17 + $0x140] sm:$0xff] }
 0xbd3   : > { %v2161_v42 = vpop.permute.xlu0 %2160  ;;  %6384 = vrcp.f32 %v2445_v51 }
 0xbd4   : > { %v2178_v45 = vmul.f32 %v7366_v35, %v2161_v42  ;;  %2202 = vrot.lane.b32.xlu1 %v2179_v49, %s6648_s26  ;;  %v453_v49 = vld [vmem:[%s6808_s17 + $0x148] sm:$0xff] }
 0xbd6   : > { %2200 = vrot.lane.b32.xlu0 %v2178_v45, %s6648_s26 }
 0xbdf   : > { %v7371_v53 = vpop.eup %6382 }
 0xbe0   : > { %v7374_v56 = vpop.eup %6384  ;;  %v2478_v36 = vmul.f32 %v7371_v53, %v7273_v14  ;;  %v448_v14 = vld [vmem:[%s6808_s17 + $0x120] sm:$0xff] }
 0xbe1   : > { %v2477_v20 = vmul.f32 %v7374_v56, %v7278_v27  ;;  %5707 = vmatprep.mubr.msk.f32.mxu0 %vm471_vm0, %v448_v14 }
 0xbe2   : > { %5708 = vmatmul.mubr.msk.f32.gmra.mxu0 %vm471_vm0, %v449_v63 }
 0xbe3   : > { %5710 = vmatprep.mubr.msk.f32.mxu0 %vm471_vm0, %v450_v30 }
 0xbe6   : > { %5711 = vmatmul.mubr.msk.f32.gmra.mxu0 %vm471_vm0, %v451_v40 }
 0xbe7   : > { %5713 = vmatprep.mubr.msk.f32.mxu0 %vm471_vm0, %v452_v46 }
 0xbea   : > { %5714 = vmatmul.mubr.msk.f32.gmra.mxu0 %vm471_vm0, %v453_v49 }
 0xc3a   : > { %v2496_v54 = vpop.permute.xlu1 %2495 }
 0xc3b   : > { %v2518_v1 = vmul.f32 %v7371_v53, %v2496_v54 }
 0xc3c   : > { %v2494_v57 = vpop.permute.xlu0 %2493 }
 0xc3d   : > { %2535 = vrot.lane.b32.xlu1 %v2518_v1, %s6648_s26  ;;  %v2517_v2 = vmul.f32 %v7374_v56, %v2494_v57 }
 0xc3e   : > { %v2195_v4 = vpop.permute.xlu1 %2194 }
 0xc3f   : > { %v7380_v43 = vadd.f32 %v2195_v4, %v2135_v62  ;;  %2533 = vrot.lane.b32.xlu0 %v2517_v2, %s6648_s26 }
 0xc40   : > { %v2193_v8 = vpop.permute.xlu0 %2192 }
 0xc41   : > { %6386 = vtanh.f32 %v7380_v43  ;;  %v7386_v11 = vadd.f32 %v2193_v8, %v2134_v34 }
 0xc42   : > { %v2199_v24 = vpop.permute.xlu1 %2198 }
 0xc43   : > { %6388 = vtanh.f32 %v7386_v11  ;;  %v7391_v16 = vadd.f32 %v2199_v24, %v2137_v50 }
 0xc44   : > { %v2197_v52 = vpop.permute.xlu0 %2196 }
 0xc45   : > { %6390 = vtanh.f32 %v7391_v16  ;;  %v7396_v55 = vadd.f32 %v2197_v52, %v2136_v41 }
 0xc46   : > { %v2203_v47 = vpop.permute.xlu1 %2202 }
 0xc47   : > { %6392 = vtanh.f32 %v7396_v55  ;;  %v7401_v23 = vadd.f32 %v2203_v47, %v2139_v12 }
 0xc48   : > { %v2201_v0 = vpop.permute.xlu0 %2200 }
 0xc49   : > { %6394 = vtanh.f32 %v7401_v23  ;;  %v7406_v26 = vadd.f32 %v2201_v0, %v2138_v7 }
 0xc4b   : > { %6396 = vtanh.f32 %v7406_v26 }
 0xc4e   : > { %v6387_v5 = vpop.eup %6386 }
 0xc4f   : > { %2242 = vrot.lane.b32.xlu1 %v6387_v5, %s8387_s20 }
 0xc50   : > { %v6389_v17 = vpop.eup %6388 }
 0xc51   : > { %2240 = vrot.lane.b32.xlu0 %v6389_v17, %s8387_s20 }
 0xc52   : > { %v6391_v32 = vpop.eup %6390 }
 0xc53   : > { %2246 = vrot.lane.b32.xlu1 %v6391_v32, %s8387_s20 }
 0xc54   : > { %v6393_v39 = vpop.eup %6392 }
 0xc55   : > { %2244 = vrot.lane.b32.xlu0 %v6393_v39, %s8387_s20 }
 0xc56   : > { %v6395_v37 = vpop.eup %6394 }
 0xc57   : > { %2250 = vrot.lane.b32.xlu1 %v6395_v37, %s8387_s20 }
 0xc58   : > { %v6397_v60 = vpop.eup %6396 }
 0xc59   : > { %2248 = vrot.lane.b32.xlu0 %v6397_v60, %s8387_s20 }
 0xc8d   : > { %v5706_v34 = vpop.f32.mrf.mxu0 }
 0xc8e   : > { %v858_v41 = vadd.f32 %v7185_v31, %v5706_v34 }
 0xc8f   : > { %v852_v8 = vpop.f32.mrf.mxu0 }
 0xc90   : > { %v853_v52 = vadd.f32 %v7185_v31, %v852_v8 }
 0xca2   : > { %v5709_v50 = vpop.f32.mrf.mxu0 }
 0xca3   : > { %v868_v0 = vadd.f32 %v7185_v31, %v5709_v50 }
 0xca4   : > { %v862_v24 = vpop.f32.mrf.mxu0 }
 0xca5   : > { %v863_v32 = vadd.f32 %v7185_v31, %v862_v24 }
 0xca6   : > { %v5712_v47 = vpop.f32.mrf.mxu0 }
 0xca7   : > { %v878_v29 = vadd.f32 %v7185_v31, %v5712_v47 }
 0xca8   : > { %v872_v37 = vpop.f32.mrf.mxu0 }
 0xcaf   : > { %v2536_v19 = vpop.permute.xlu1 %2535 }
 0xcb0   : > { %v7417_v15 = vadd.f32 %v2536_v19, %v2478_v36 }
 0xcb1   : > { %v2534_v18 = vpop.permute.xlu0 %2533 }
 0xcb2   : > { %6398 = vtanh.f32 %v7417_v15  ;;  %v7422_v22 = vadd.f32 %v2534_v18, %v2477_v20  ;;  %v873_v20 = vadd.f32 %v7185_v31, %v872_v37 }
 0xcb4   : > { %6400 = vtanh.f32 %v7422_v22 }
 0xcbf   : > { %v6399_v27 = vpop.eup %6398 }
 0xcc0   : > { %2583 = vrot.lane.b32.xlu1 %v6399_v27, %s8387_s20 }
 0xcc1   : > { %v2243_v28 = vpop.permute.xlu1 %2242  ;;  %v6401_v44 = vpop.eup %6400 }
 0xcc2   : > { %v2263_v33 = vmul.f32 %v7346_v21, %v2243_v28  ;;  %2581 = vrot.lane.b32.xlu0 %v6401_v44, %s8387_s20 }
 0xcc3   : > { %v2241_v42 = vpop.permute.xlu0 %2240 }
 0xcc4   : > { %2282 = vrot.lane.b32.xlu1 %v2263_v33, %s6648_s26  ;;  %v2262_v45 = vmul.f32 %v7350_v25, %v2241_v42 }
 0xcc5   : > { %v2247_v38 = vpop.permute.xlu1 %2246 }
 0xcc6   : > { %v2265_v59 = vmul.f32 %v7354_v58, %v2247_v38  ;;  %2280 = vrot.lane.b32.xlu0 %v2262_v45, %s6648_s26  ;;  %v5715_v38 = vpop.f32.mrf.mxu0 }
 0xcc7   : > { %v2245_v13 = vpop.permute.xlu0 %2244 }
 0xcc8   : > { %v2264_v21 = vmul.f32 %v7358_v6, %v2245_v13  ;;  %2286 = vrot.lane.b32.xlu1 %v2265_v59, %s6648_s26  ;;  %v882_v13 = vpop.f32.mrf.mxu0 }
 0xcc9   : > { %v2251_v48 = vpop.permute.xlu1 %2250 }
 0xcca   : > { %v2267_v3 = vmul.f32 %v7362_v9, %v2251_v48  ;;  %2284 = vrot.lane.b32.xlu0 %v2264_v21, %s6648_s26 }
 0xccb   : > { %v2249_v51 = vpop.permute.xlu0 %2248 }
 0xccc   : > { %v2266_v25 = vmul.f32 %v7366_v35, %v2249_v51  ;;  %2290 = vrot.lane.b32.xlu1 %v2267_v3, %s6648_s26  ;;  %v7482_v3 = vld [vmem:[%s8377_s3] ss:$0 sm:$0xff] }
 0xccd   : > { %v883_v51 = vadd.f32 %v7482_v3, %v882_v13 }
 0xcce   : > { %2288 = vrot.lane.b32.xlu0 %v2266_v25, %s6648_s26  ;;  %v888_v25 = vadd.f32 %v7482_v3, %v5715_v38 }
 0xd32   : > { %v2584_v58 = vpop.permute.xlu1 %2583 }
 0xd33   : > { %v2606_v54 = vmul.f32 %v7371_v53, %v2584_v58 }
 0xd34   : > { %v2582_v1 = vpop.permute.xlu0 %2581 }
 0xd35   : > { %2623 = vrot.lane.b32.xlu1 %v2606_v54, %s6648_s26  ;;  %v2605_v6 = vmul.f32 %v7374_v56, %v2582_v1 }
 0xd36   : > { %v2283_v57 = vpop.permute.xlu1 %2282 }
 0xd37   : > { %2621 = vrot.lane.b32.xlu0 %v2605_v6, %s6648_s26 }
 0xd38   : > { %v2281_v9 = vpop.permute.xlu0 %2280 }
 0xd39   : > { %5816 = vmatprep.mubr.msk.f32.mxu1 %vm471_vm0, %v2281_v9 }
 0xd3a   : > { %5817 = vmatmul.mubr.msk.f32.gmra.mxu1 %vm471_vm0, %v2283_v57  ;;  %v2287_v35 = vpop.permute.xlu1 %2286 }
 0xd3c   : > { %v2285_v62 = vpop.permute.xlu0 %2284 }
 0xd3d   : > { %5819 = vmatprep.mubr.msk.f32.mxu1 %vm471_vm0, %v2285_v62 }
 0xd3e   : > { %5820 = vmatmul.mubr.msk.f32.gmra.mxu1 %vm471_vm0, %v2287_v35  ;;  %v2291_v2 = vpop.permute.xlu1 %2290 }
 0xd40   : > { %v2289_v53 = vpop.permute.xlu0 %2288 }
 0xd41   : > { %5822 = vmatprep.mubr.msk.f32.mxu1 %vm471_vm0, %v2289_v53 }
 0xd42   : > { %5823 = vmatmul.mubr.msk.f32.gmra.mxu1 %vm471_vm0, %v2291_v2 }
 0xda7   : > { %v2624_v4 = vpop.permute.xlu1 %2623 }
 0xda9   : > { %v2622_v56 = vpop.permute.xlu0 %2621 }
 0xdaa   : > { %5833 = vmatprep.mubr.msk.f32.mxu1 %vm471_vm0, %v2622_v56 }
 0xdab   : > { %5834 = vmatmul.mubr.msk.f32.vlgmr.msra.gmra.mxu1 %vm471_vm0, %v2624_v4 }
 0xdfa   : > { %v5818_v12 = vpop.f32.mrf.mxu1 }
 0xdfb   : > { %v2416_v7 = vadd.f32 %v5818_v12, %v858_v41 }
 0xdfc   : > { %v2384_v5 = vpop.f32.mrf.mxu1 }
 0xdfd   : > { %6402 = vtanh.f32 %v2416_v7  ;;  %v2415_v17 = vadd.f32 %v2384_v5, %v853_v52  ;;  %v5196_v46 = vmul.f32 -1.442695, %v2416_v7 }
 0xdfe   : > { %v5821_v39 = vpop.f32.mrf.mxu1 }
 0xdff   : > { %v2418_v60 = vadd.f32 %v5821_v39, %v868_v0  ;;  %6404 = vtanh.f32 %v2415_v17  ;;  %v5195_v33 = vmul.f32 -1.442695, %v2415_v17 }
 0xe00   : > { %v2394_v36 = vpop.f32.mrf.mxu1 }
 0xe01   : > { %v2417_v19 = vadd.f32 %v2394_v36, %v863_v32  ;;  %6406 = vtanh.f32 %v2418_v60  ;;  %v5198_v42 = vmul.f32 -1.442695, %v2418_v60 }
 0xe02   : > { %v5824_v18 = vpop.f32.mrf.mxu1 }
 0xe03   : > { %6408 = vtanh.f32 %v2417_v19  ;;  %v2420_v63 = vadd.f32 %v5824_v18, %v878_v29  ;;  %v5197_v49 = vmul.f32 -1.442695, %v2417_v19 }
 0xe04   : > { %v2404_v61 = vpop.f32.mrf.mxu1 }
 0xe05   : > { %v2419_v14 = vadd.f32 %v2404_v61, %v873_v20  ;;  %v5200_v59 = vmul.f32 -1.442695, %v2420_v63 }
 0xe07   : > { %6410 = vtanh.f32 %v2419_v14  ;;  %v5199_v45 = vmul.f32 -1.442695, %v2419_v14 }
 0xe08   : > { %6412 = vtanh.f32 %v2420_v63 }
 0xe09   : > { %6414 = vpow2.f32 %v5195_v33 }
 0xe0a   : > { %v6403_v27 = vpop.eup %6402  ;;  %6416 = vpow2.f32 %v5196_v46 }
 0xe0b   : > { %2499 = vrot.lane.b32.xlu1 %v6403_v27, %s8387_s20  ;;  %6418 = vpow2.f32 %v5197_v49 }
 0xe0c   : > { %v6405_v30 = vpop.eup %6404  ;;  %6420 = vpow2.f32 %v5198_v42 }
 0xe0d   : > { %2497 = vrot.lane.b32.xlu0 %v6405_v30, %s8387_s20  ;;  %6422 = vpow2.f32 %v5199_v45 }
 0xe0e   : > { %v6407_v40 = vpop.eup %6406  ;;  %6424 = vpow2.f32 %v5200_v59 }
 0xe0f   : > { %2503 = vrot.lane.b32.xlu1 %v6407_v40, %s8387_s20 }
 0xe10   : > { %v6409_v28 = vpop.eup %6408 }
 0xe11   : > { %2501 = vrot.lane.b32.xlu0 %v6409_v28, %s8387_s20 }
 0xe14   : > { %v6411_v44 = vpop.eup %6410 }
 0xe15   : > { %2505 = vrot.lane.b32.xlu0 %v6411_v44, %s8387_s20  ;;  %v6413_v31 = vpop.eup %6412 }
 0xe16   : > { %v6415_v48 = vpop.eup %6414 }
 0xe17   : > { %v6417_v1 = vpop.eup %6416  ;;  %v2447_v6 = vadd.f32 1.0, %v6415_v48 }
 0xe18   : > { %v6419_v57 = vpop.eup %6418  ;;  %v2448_v35 = vadd.f32 1.0, %v6417_v1 }
 0xe19   : > { %2507 = vrot.lane.b32.xlu0 %v6413_v31, %s8387_s20  ;;  %v6421_v62 = vpop.eup %6420  ;;  %v2449_v53 = vadd.f32 1.0, %v6419_v57 }
 0xe1a   : > { %v6423_v2 = vpop.eup %6422  ;;  %v2450_v56 = vadd.f32 1.0, %v6421_v62 }
 0xe1b   : > { %v2451_v4 = vadd.f32 1.0, %v6423_v2  ;;  %v6425_v34 = vpop.eup %6424 }
 0xe1c   : > { %v2452_v8 = vadd.f32 1.0, %v6425_v34 }
 0xe6b   : > { %v5835_v21 = vpop.f32.mrf.mxu1 }
 0xe6c   : > { %v2759_v9 = vadd.f32 %v5835_v21, %v888_v25 }
 0xe6d   : > { %v2719_v58 = vpop.f32.mrf.mxu1 }
 0xe6e   : > { %v2758_v54 = vadd.f32 %v2719_v58, %v883_v51  ;;  %v5210_v63 = vmul.f32 -1.442695, %v2759_v9 }
 0xe70   : > { %6426 = vtanh.f32 %v2758_v54  ;;  %v5209_v14 = vmul.f32 -1.442695, %v2758_v54 }
 0xe71   : > { %6428 = vrcp.f32 %v2447_v6 }
 0xe72   : > { %6430 = vtanh.f32 %v2759_v9 }
 0xe73   : > { %6432 = vrcp.f32 %v2448_v35 }
 0xe74   : > { %6434 = vrcp.f32 %v2449_v53 }
 0xe75   : > { %6436 = vrcp.f32 %v2450_v56 }
 0xe76   : > { %6438 = vrcp.f32 %v2451_v4 }
 0xe77   : > { %6440 = vrcp.f32 %v2452_v8 }
 0xe78   : > { %6442 = vpow2.f32 %v5209_v14 }
 0xe79   : > { %6444 = vpow2.f32 %v5210_v63  ;;  %v2959_v63 = vld [vmem:[%s8378_s4 + $0x8] sm:$0xff] }
 0xe7d   : > { %v6427_v50 = vpop.eup %6426  ;;  %v2500_v41 = vpop.permute.xlu1 %2499 }
 0xe7e   : > { %2838 = vrot.lane.b32.xlu1 %v6427_v50, %s8387_s20  ;;  %v7487_v24 = vpop.eup %6428 }
 0xe7f   : > { %v2498_v52 = vpop.permute.xlu0 %2497  ;;  %v6431_v47 = vpop.eup %6430  ;;  %v2479_v46 = vmul.f32 %v7487_v24, %v7386_v11 }
 0xe80   : > { %v2519_v12 = vmul.f32 %v7487_v24, %v2498_v52  ;;  %v7490_v7 = vpop.eup %6432  ;;  %v454_v52 = vld [vmem:[%s6808_s17 + $0x150] sm:$0xff] }
 0xe81   : > { %v7494_v0 = vpop.eup %6434  ;;  %v2520_v17 = vmul.f32 %v7490_v7, %v2500_v41  ;;  %v2504_v39 = vpop.permute.xlu1 %2503  ;;  %v2480_v13 = vmul.f32 %v7490_v7, %v7380_v43  ;;  %5716 = vmatprep.mubr.msk.f32.mxu0 %vm471_vm0, %v454_v52 }
 0xe82   : > { %2840 = vrot.lane.b32.xlu1 %v6431_v47, %s8387_s20  ;;  %2537 = vrot.lane.b32.xlu0 %v2519_v12, %s6648_s26  ;;  %v7498_v37 = vpop.eup %6436  ;;  %v2481_v21 = vmul.f32 %v7494_v0, %v7396_v55  ;;  %v455_v12 = vld [vmem:[%s6808_s17 + $0x158] sm:$0xff]  ;;  %v456_v47 = vld [vmem:[%s6808_s17 + $0x160] sm:$0xff] }
 0xe83   : > { %v2502_v5 = vpop.permute.xlu0 %2501  ;;  %v7502_v60 = vpop.eup %6438  ;;  %v2522_v19 = vmul.f32 %v7498_v37, %v2504_v39  ;;  %v2482_v58 = vmul.f32 %v7498_v37, %v7391_v16  ;;  %5717 = vmatmul.mubr.msk.f32.gmra.mxu0 %vm471_vm0, %v455_v12 }
 0xe84   : > { %v2521_v32 = vmul.f32 %v7494_v0, %v2502_v5  ;;  %v7508_v18 = vpop.eup %6440  ;;  %v2483_v54 = vmul.f32 %v7502_v60, %v7406_v26  ;;  %5719 = vmatprep.mubr.msk.f32.mxu0 %vm471_vm0, %v456_v47 }
 0xe85   : > { %v6443_v27 = vpop.eup %6442  ;;  %v2484_v57 = vmul.f32 %v7508_v18, %v7401_v23 }
 0xe86   : > { %2539 = vrot.lane.b32.xlu1 %v2520_v17, %s6648_s26  ;;  %2541 = vrot.lane.b32.xlu0 %v2521_v32, %s6648_s26  ;;  %v2790_v30 = vadd.f32 1.0, %v6443_v27  ;;  %v6445_v40 = vpop.eup %6444  ;;  %v458_v17 = vld [vmem:[%s6808_s17 + $0x170] sm:$0xff] }
 0xe87   : > { %v2506_v36 = vpop.permute.xlu0 %2505  ;;  %v2791_v28 = vadd.f32 1.0, %v6445_v40 }
 0xe88   : > { %v2523_v20 = vmul.f32 %v7502_v60, %v2506_v36  ;;  %6446 = vrcp.f32 %v2790_v30  ;;  %v7597_v30 = vld [vmem:[%s8379_s5 + $0x10] sm:$0xff] }
 0xe89   : > { %6448 = vrcp.f32 %v2791_v28 }
 0xe8a   : > { %2543 = vrot.lane.b32.xlu1 %v2522_v19, %s6648_s26  ;;  %2545 = vrot.lane.b32.xlu0 %v2523_v20, %s6648_s26  ;;  %v2961_v19 = vld [vmem:[%s8378_s4 + $0x18] sm:$0xff]  ;;  %v2960_v20 = vld [vmem:[%s8378_s4 + $0x10] sm:$0xff] }
 0xe8b   : > { %v2508_v29 = vpop.permute.xlu0 %2507  ;;  %5845 = vmatprep.subr.mxu0 %v2961_v19 }
 0xe8c   : > { %v2524_v61 = vmul.f32 %v7508_v18, %v2508_v29  ;;  %5846 = vmatpush3.msra.mxu0 %v2961_v19 }
 0xe8d   : > { %5847 = vmatprep.subr.mxu0 %v2960_v20 }
 0xe8e   : > { %2547 = vrot.lane.b32.xlu0 %v2524_v61, %s6648_s26  ;;  %v7585_v61 = vld [vmem:[%s8379_s5 + $0x18] sm:$0xff]  ;;  %5848 = vmatpush3.msra.mxu0 %v2960_v20 }
 0xe8f   : > { %5866 = vmatpush3.msra.mxu1 %v7585_v61  ;;  %5849 = vmatprep.subr.mxu0 %v2959_v63 }
 0xe90   : > { %5867 = vmatprep.subr.mxu1 %v6646_v10  ;;  %5850 = vmatpush3.msra.mxu0 %v2959_v63 }
 0xe91   : > { %5868 = vmatpush3.msra.mxu1 %v7597_v30 }
 0xe92   : > { %5869 = vmatprep.subr.mxu1 %v6646_v10 }
 0xe95   : > { %v7512_v44 = vpop.eup %6446 }
 0xe96   : > { %v7518_v49 = vpop.eup %6448  ;;  %v2822_v56 = vmul.f32 %v7512_v44, %v7422_v22  ;;  %v457_v22 = vld [vmem:[%s6808_s17 + $0x168] sm:$0xff] }
 0xe97   : > { %v2823_v8 = vmul.f32 %v7518_v49, %v7417_v15  ;;  %5720 = vmatmul.mubr.msk.f32.gmra.mxu0 %vm471_vm0, %v457_v22  ;;  %v459_v15 = vld [vmem:[%s6808_s17 + $0x178] sm:$0xff] }
 0xe98   : > { %5722 = vmatprep.mubr.msk.f32.mxu0 %vm471_vm0, %v458_v17 }
 0xe9b   : > { %5723 = vmatmul.mubr.msk.f32.gmra.mxu0 %vm471_vm0, %v459_v15 }
 0xef0   : > { %v2839_v31 = vpop.permute.xlu1 %2838 }
 0xef1   : > { %v2862_v33 = vmul.f32 %v7512_v44, %v2839_v31 }
 0xef3   : > { %2878 = vrot.lane.b32.xlu1 %v2862_v33, %s6648_s26 }
 0xef4   : > { %v2841_v42 = vpop.permute.xlu1 %2840  ;;  %v2538_v45 = vpop.permute.xlu0 %2537 }
 0xef5   : > { %v2863_v38 = vmul.f32 %v7518_v49, %v2841_v42  ;;  %v7521_v59 = vadd.f32 %v2538_v45, %v2479_v46 }
 0xef7   : > { %6450 = vtanh.f32 %v7521_v59  ;;  %2880 = vrot.lane.b32.xlu1 %v2863_v38, %s6648_s26 }
 0xef8   : > { %v2540_v48 = vpop.permute.xlu1 %2539  ;;  %v2542_v11 = vpop.permute.xlu0 %2541 }
 0xef9   : > { %v7529_v51 = vadd.f32 %v2540_v48, %v2480_v13  ;;  %v7531_v25 = vadd.f32 %v2542_v11, %v2481_v21 }
 0xefb   : > { %6452 = vtanh.f32 %v7529_v51 }
 0xefc   : > { %6454 = vtanh.f32 %v7531_v25  ;;  %v2544_v43 = vpop.permute.xlu1 %2543  ;;  %v2546_v1 = vpop.permute.xlu0 %2545 }
 0xefd   : > { %v7539_v6 = vadd.f32 %v2544_v43, %v2482_v58  ;;  %v7541_v55 = vadd.f32 %v2546_v1, %v2483_v54 }
 0xeff   : > { %6456 = vtanh.f32 %v7539_v6 }
 0xf00   : > { %6458 = vtanh.f32 %v7541_v55  ;;  %v2548_v9 = vpop.permute.xlu0 %2547 }
 0xf01   : > { %v7547_v16 = vadd.f32 %v2548_v9, %v2484_v57 }
 0xf03   : > { %6460 = vtanh.f32 %v7547_v16 }
 0xf04   : > { %v6451_v26 = vpop.eup %6450 }
 0xf05   : > { %2585 = vrot.lane.b32.xlu0 %v6451_v26, %s8387_s20 }
 0xf08   : > { %v6453_v35 = vpop.eup %6452 }
 0xf09   : > { %v6455_v62 = vpop.eup %6454  ;;  %2587 = vrot.lane.b32.xlu1 %v6453_v35, %s8387_s20 }
 0xf0a   : > { %2589 = vrot.lane.b32.xlu0 %v6455_v62, %s8387_s20 }
 0xf0c   : > { %v6457_v53 = vpop.eup %6456 }
 0xf0d   : > { %v6459_v23 = vpop.eup %6458  ;;  %2591 = vrot.lane.b32.xlu1 %v6457_v53, %s8387_s20 }
 0xf0e   : > { %2593 = vrot.lane.b32.xlu0 %v6459_v23, %s8387_s20 }
 0xf10   : > { %v6461_v2 = vpop.eup %6460 }
 0xf12   : > { %2595 = vrot.lane.b32.xlu0 %v6461_v2, %s8387_s20 }
 0xf43   : > { %v5718_v43 = vpop.f32.mrf.mxu0 }
 0xf44   : > { %v898_v9 = vadd.f32 %v7482_v3, %v5718_v43 }
 0xf45   : > { %v892_v1 = vpop.f32.mrf.mxu0 }
 0xf46   : > { %v893_v26 = vadd.f32 %v7482_v3, %v892_v1 }
 0xf57   : > { %v5721_v57 = vpop.f32.mrf.mxu0 }
 0xf58   : > { %v908_v23 = vadd.f32 %v7482_v3, %v5721_v57 }
 0xf59   : > { %v902_v35 = vpop.f32.mrf.mxu0 }
 0xf65   : > { %v2879_v4 = vpop.permute.xlu1 %2878 }
 0xf66   : > { %v2902_v34 = vadd.f32 %v2879_v4, %v2822_v56  ;;  %v903_v4 = vadd.f32 %v7482_v3, %v902_v35 }
 0xf68   : > { %6462 = vtanh.f32 %v2902_v34  ;;  %v5724_v34 = vpop.f32.mrf.mxu0 }
 0xf69   : > { %v2881_v50 = vpop.permute.xlu1 %2880 }
 0xf6a   : > { %v2903_v41 = vadd.f32 %v2881_v50, %v2823_v8 }
 0xf6c   : > { %6464 = vtanh.f32 %v2903_v41  ;;  %v918_v41 = vadd.f32 %v7482_v3, %v5724_v34 }
 0xf75   : > { %v6463_v5 = vpop.eup %6462 }
 0xf76   : > { %2926 = vrot.lane.b32.xlu1 %v6463_v5, %s8387_s20 }
 0xf77   : > { %v2586_v32 = vpop.permute.xlu0 %2585 }
 0xf78   : > { %v2607_v39 = vmul.f32 %v7487_v24, %v2586_v32  ;;  %v912_v32 = vpop.f32.mrf.mxu0 }
 0xf79   : > { %v6465_v36 = vpop.eup %6464 }
 0xf7a   : > { %2928 = vrot.lane.b32.xlu1 %v6465_v36, %s8387_s20  ;;  %2625 = vrot.lane.b32.xlu0 %v2607_v39, %s6648_s26  ;;  %v7676_v36 = vld [vmem:[%s8380_s6] ss:$0 sm:$0xff] }
 0xf7b   : > { %v2588_v29 = vpop.permute.xlu1 %2587 }
 0xf7c   : > { %v2608_v24 = vmul.f32 %v7490_v7, %v2588_v29  ;;  %v2590_v14 = vpop.permute.xlu0 %2589  ;;  %v2958_v7 = vld [vmem:[%s8378_s4] sm:$0xff] }
 0xf7d   : > { %v2609_v27 = vmul.f32 %v7494_v0, %v2590_v14  ;;  %5851 = vmatprep.subr.mxu0 %v2958_v7 }
 0xf7e   : > { %2627 = vrot.lane.b32.xlu1 %v2608_v24, %s6648_s26  ;;  %5852 = vmatpush3.msra.mxu0 %v2958_v7 }
 0xf7f   : > { %2629 = vrot.lane.b32.xlu0 %v2609_v27, %s6648_s26  ;;  %v2592_v40 = vpop.permute.xlu1 %2591  ;;  %5887 = vmatprep.subr.mxu0 %v6646_v10 }
 0xf80   : > { %v2610_v0 = vmul.f32 %v7498_v37, %v2592_v40  ;;  %v2594_v28 = vpop.permute.xlu0 %2593  ;;  %v7616_v37 = vld [vmem:[%s8379_s5 + $0x8] sm:$0xff] }
 0xf81   : > { %v2611_v31 = vmul.f32 %v7502_v60, %v2594_v28  ;;  %5870 = vmatpush3.msra.mxu1 %v7616_v37  ;;  %v7623_v60 = vld [vmem:[%s8379_s5] sm:$0xff] }
 0xf82   : > { %2631 = vrot.lane.b32.xlu1 %v2610_v0, %s6648_s26  ;;  %5871 = vmatprep.subr.mxu1 %v6646_v10 }
 0xf83   : > { %2633 = vrot.lane.b32.xlu0 %v2611_v31, %s6648_s26  ;;  %5872 = vmatpush3.msra.mxu1 %v7623_v60 }
 0xf84   : > { %v2596_v33 = vpop.permute.xlu0 %2595  ;;  %5876 = vmatprep.subr.mxu1 %v6646_v10 }
 0xf85   : > { %v2612_v46 = vmul.f32 %v7508_v18, %v2596_v33 }
 0xf87   : > { %2635 = vrot.lane.b32.xlu0 %v2612_v46, %s6648_s26  ;;  %v913_v46 = vadd.f32 %v7482_v3, %v912_v32 }
 0xfe8   : > { %v2927_v18 = vpop.permute.xlu1 %2926 }
 0xfe9   : > { %v2950_v42 = vmul.f32 %v7512_v44, %v2927_v18 }
 0xfeb   : > { %2977 = vrot.lane.b32.xlu1 %v2950_v42, %s6648_s26 }
 0xfec   : > { %v2929_v45 = vpop.permute.xlu1 %2928  ;;  %v2626_v38 = vpop.permute.xlu0 %2625 }
 0xfed   : > { %v2951_v13 = vmul.f32 %v7518_v49, %v2929_v45  ;;  %5836 = vmatprep.mubr.msk.f32.mxu1 %vm471_vm0, %v2626_v38 }
 0xfef   : > { %2979 = vrot.lane.b32.xlu1 %v2951_v13, %s6648_s26 }
 0xff0   : > { %v2628_v21 = vpop.permute.xlu1 %2627 }
 0xff1   : > { %v2630_v48 = vpop.permute.xlu0 %2629  ;;  %5837 = vmatmul.mubr.msk.f32.gmra.mxu1 %vm471_vm0, %v2628_v21 }
 0xff2   : > { %5839 = vmatprep.mubr.msk.f32.mxu1 %vm471_vm0, %v2630_v48 }
 0xff4   : > { %v2632_v11 = vpop.permute.xlu1 %2631 }
 0xff5   : > { %v2634_v58 = vpop.permute.xlu0 %2633  ;;  %5840 = vmatmul.mubr.msk.f32.gmra.mxu1 %vm471_vm0, %v2632_v11 }
 0xff6   : > { %5842 = vmatprep.mubr.msk.f32.mxu1 %vm471_vm0, %v2634_v58 }
 0xff9   : > { %v2636_v44 = vpop.permute.xlu0 %2635 }
 0xffa   : > { %5843 = vmatmul.mubr.msk.f32.gmra.mxu1 %vm471_vm0, %v2636_v44 }
 0xffb   : > { %5873 = vmatprep.mubr.msk.f32.mxu1 %vm6649_vm1, %v6646_v10 }
 0xffe   : > { %5874 = vmatmul.mubr.f32.vlgmr.msra.gmra.mxu1 %v6646_v10 }
 0xfff   : > { %5877 = vmatpush3.msra.mxu1 %v7585_v61  ;;  %5884 = vmatprep.mubr.msk.f32.mxu1 %vm6649_vm1, %v6646_v10 }
0x1000   : > { %5878 = vmatprep.subr.mxu1 %v6646_v10 }
0x1001   : > { %5879 = vmatpush3.msra.mxu1 %v7597_v30 }
0x1002   : > { %5880 = vmatprep.subr.mxu1 %v6646_v10 }
0x1003   : > { %5881 = vmatpush3.msra.mxu1 %v7616_v37 }
0x1004   : > { %5882 = vmatprep.subr.mxu1 %v6646_v10 }
0x1005   : > { %5883 = vmatpush3.msra.mxu1 %v7623_v60 }
0x1006   : > { %5898 = vmatprep.subr.mxu1 %v6646_v10 }
0x105d   : > { %v2978_v49 = vpop.permute.xlu1 %2977 }
0x105e   : > { %5853 = vmatprep.mubr.msk.f32.mxu0 %vm471_vm0, %v2978_v49 }
0x1061   : > { %v2980_v54 = vpop.permute.xlu1 %2979 }
0x1062   : > { %5854 = vmatmul.mubr.msk.f32.vlgmr.msra.gmra.mxu0 %vm471_vm0, %v2980_v54 }
0x1063   : > { %5888 = vmatpush3.msra.mxu0 %v7585_v61 }
0x1064   : > { %5889 = vmatprep.subr.mxu0 %v6646_v10 }
0x1065   : > { %5890 = vmatpush3.msra.mxu0 %v7597_v30 }
0x1066   : > { %5891 = vmatprep.subr.mxu0 %v6646_v10 }
0x1067   : > { %5892 = vmatpush3.msra.mxu0 %v7616_v37 }
0x1068   : > { %5893 = vmatprep.subr.mxu0 %v6646_v10 }
0x1069   : > { %5894 = vmatpush3.msra.mxu0 %v7623_v60 }
0x106a   : > { %5909 = vmatprep.subr.mxu0 %v6646_v10 }
0x10b1   : > { %v5838_v62 = vpop.f32.mrf.mxu1 }
0x10b2   : > { %v7662_v53 = vadd.f32 %v5838_v62, %v898_v9 }
0x10b3   : > { %v2729_v2 = vpop.f32.mrf.mxu1 }
0x10b4   : > { %v2760_v56 = vadd.f32 %v2729_v2, %v893_v26 }
0x10b5   : > { %v5841_v8 = vpop.f32.mrf.mxu1 }
0x10b6   : > { %v7666_v50 = vadd.f32 %v5841_v8, %v908_v23  ;;  %v5211_v21 = vmul.f32 -1.442695, %v2760_v56 }
0x10b7   : > { %v2739_v52 = vpop.f32.mrf.mxu1 }
0x10b8   : > { %v2762_v12 = vadd.f32 %v2739_v52, %v903_v4 }
0x10ba   : > { %v5844_v47 = vpop.f32.mrf.mxu1  ;;  %v5213_v48 = vmul.f32 -1.442695, %v2762_v12 }
0x10bb   : > { %v7669_v22 = vadd.f32 %v5844_v47, %v918_v41  ;;  %v5212_v47 = vmul.f32 -1.442695, %v7662_v53 }
0x10bc   : > { %v2749_v5 = vpop.f32.mrf.mxu1 }
0x10bd   : > { %v2764_v18 = vadd.f32 %v2749_v5, %v913_v46  ;;  %v5214_v5 = vmul.f32 -1.442695, %v7666_v50 }
0x10be   : > { %v3184_v17 = vpop.f32.mrf.mxu1 }
0x10bf   : > { %v5215_v3 = vmul.f32 -1.442695, %v2764_v18 }
0x10c0   : > { %v5875_v15 = vpop.f32.mrf.mxu1 }
0x1122   : > { %v7671_v39 = vpop.f32.mrf.mxu0 }
0x1124   : > { %v3075_v19 = vpop.f32.mrf.mxu0 }
0x1125   : > { %v3076_v20 = vadd.f32 %v7676_v36, %v3075_v19 }
0x1127   : > { %v3188_v29 = vadd.f32 %v3184_v17, %v3076_v20  ;;  %v5216_v17 = vmul.f32 -1.442695, %v7669_v22  ;;  %v3081_v20 = vadd.f32 %v7671_v39, %v7676_v36 }
0x1129   : > { %6466 = vtanh.f32 %v3188_v29  ;;  %v5226_v14 = vmul.f32 -1.442695, %v3188_v29 }
0x112b   : > { %6468 = vpow2.f32 %v5226_v14 }
0x1136   : > { %v6467_v24 = vpop.eup %6466 }
0x1137   : > { %3198 = vrot.lane.b32.xlu0 %v6467_v24, %s8397_s15 }
0x1138   : > { %v6469_v63 = vpop.eup %6468 }
0x1139   : > { %v3192_v27 = vadd.f32 1.0, %v6469_v63 }
0x113b   : > { %6470 = vrcp.f32 %v3192_v27 }
0x1148   : > { %v6471_v7 = vpop.eup %6470 }
0x1149   : > { %v3196_v28 = vmul.f32 0.0, %v6471_v7 }
0x11a9   : > { %v3199_v40 = vpop.permute.xlu0 %3198 }
0x11aa   : > { %v3201_v0 = vmul.f32 %v6471_v7, %v3199_v40 }
0x11ac   : > { %3203 = vrot.lane.b32.xlu1 %v3201_v0, %s6648_s26 }
0x121e   : > { %v3204_v31 = vpop.permute.xlu1 %3203 }
0x121f   : > { %v7681_v33 = vadd.f32 %v3204_v31, %v3196_v28 }
0x1221   : > { %6472 = vtanh.f32 %v7681_v33 }
0x1222   : > { %6474 = vtanh.f32 %v2760_v56 }
0x1223   : > { %6476 = vtanh.f32 %v2762_v12 }
0x1224   : > { %6478 = vtanh.f32 %v2764_v18 }
0x1225   : > { %6480 = vpow2.f32 %v5211_v21 }
0x1226   : > { %6482 = vpow2.f32 %v5213_v48 }
0x1227   : > { %6484 = vpow2.f32 %v5215_v3 }
0x1228   : > { %6486 = vtanh.f32 %v7662_v53 }
0x1229   : > { %6488 = vtanh.f32 %v7666_v50 }
0x122a   : > { %6490 = vtanh.f32 %v7669_v22 }
0x122e   : > { %v6473_v42 = vpop.eup %6472 }
0x122f   : > { %3209 = vrot.lane.b32.xlu0 %v6473_v42, %s8397_s15  ;;  %v6475_v45 = vpop.eup %6474 }
0x1230   : > { %v6477_v38 = vpop.eup %6476 }
0x1231   : > { %v6479_v13 = vpop.eup %6478 }
0x1232   : > { %v6481_v11 = vpop.eup %6480 }
0x1233   : > { %2842 = vrot.lane.b32.xlu0 %v6475_v45, %s8397_s15  ;;  %v2792_v58 = vadd.f32 1.0, %v6481_v11  ;;  %v6483_v44 = vpop.eup %6482 }
0x1234   : > { %v2794_v43 = vadd.f32 1.0, %v6483_v44  ;;  %v6485_v1 = vpop.eup %6484 }
0x1235   : > { %6492 = vrcp.f32 %v2792_v58  ;;  %v6487_v57 = vpop.eup %6486  ;;  %v2796_v9 = vadd.f32 1.0, %v6485_v1 }
0x1236   : > { %6494 = vrcp.f32 %v2794_v43  ;;  %v6489_v26 = vpop.eup %6488 }
0x1237   : > { %2846 = vrot.lane.b32.xlu0 %v6477_v38, %s8397_s15  ;;  %6496 = vrcp.f32 %v2796_v9  ;;  %v6491_v62 = vpop.eup %6490 }
0x1238   : > { %6498 = vpow2.f32 %v5212_v47 }
0x1239   : > { %6500 = vpow2.f32 %v5214_v5 }
0x123a   : > { %6502 = vpow2.f32 %v5216_v17 }
0x123b   : > { %2850 = vrot.lane.b32.xlu0 %v6479_v13, %s8397_s15 }
0x1242   : > { %v7696_v23 = vpop.eup %6492 }
0x1243   : > { %v7700_v4 = vpop.eup %6494  ;;  %v2824_v0 = vmul.f32 %v7696_v23, %v7521_v59 }
0x1244   : > { %v7704_v41 = vpop.eup %6496  ;;  %v2826_v46 = vmul.f32 %v7700_v4, %v7531_v25 }
0x1245   : > { %v6499_v19 = vpop.eup %6498  ;;  %v2828_v13 = vmul.f32 %v7704_v41, %v7541_v55 }
0x1246   : > { %v2793_v24 = vadd.f32 1.0, %v6499_v19  ;;  %v6501_v63 = vpop.eup %6500 }
0x1247   : > { %v2795_v53 = vadd.f32 1.0, %v6501_v63  ;;  %v6503_v50 = vpop.eup %6502 }
0x1248   : > { %v2797_v22 = vadd.f32 1.0, %v6503_v50 }
0x12a1   : > { %v3210_v49 = vpop.permute.xlu0 %3209 }
0x12a2   : > { %v3212_v54 = vmul.f32 %v6471_v7, %v3210_v49 }
0x12a4   : > { %3214 = vrot.lane.b32.xlu1 %v3212_v54, %s6648_s26 }
0x12a5   : > { %v2843_v35 = vpop.permute.xlu0 %2842 }
0x12a6   : > { %v2864_v56 = vmul.f32 %v7696_v23, %v2843_v35 }
0x12a8   : > { %2844 = vrot.lane.b32.xlu1 %v6487_v57, %s8397_s15 }
0x12a9   : > { %v2847_v2 = vpop.permute.xlu0 %2846 }
0x12aa   : > { %v2866_v34 = vmul.f32 %v7700_v4, %v2847_v2 }
0x12ac   : > { %2848 = vrot.lane.b32.xlu1 %v6489_v26, %s8397_s15 }
0x12ad   : > { %v2851_v8 = vpop.permute.xlu0 %2850 }
0x12ae   : > { %v2868_v52 = vmul.f32 %v7704_v41, %v2851_v8 }
0x12b0   : > { %2852 = vrot.lane.b32.xlu1 %v6491_v62, %s8397_s15 }
0x12b4   : > { %2882 = vrot.lane.b32.xlu1 %v2864_v56, %s6648_s26 }
0x12b8   : > { %2886 = vrot.lane.b32.xlu1 %v2866_v34, %s6648_s26 }
0x12bc   : > { %2890 = vrot.lane.b32.xlu1 %v2868_v52, %s6648_s26 }
0x1316   : > { %v7708_v12 = vpop.permute.xlu1 %3214 }
0x1317   : > { %5885 = vmatmul.mubr.msk.f32.vlgmr.msra.gmra.mxu1 %vm471_vm0, %v7708_v12 }
0x1318   : > { %5899 = vmatpush3.msra.mxu1 %v7585_v61  ;;  %5906 = vmatprep.mubr.msk.f32.mxu1 %vm6649_vm1, %v6646_v10 }
0x1319   : > { %5900 = vmatprep.subr.mxu1 %v6646_v10 }
0x131a   : > { %5901 = vmatpush3.msra.mxu1 %v7597_v30  ;;  %v2845_v15 = vpop.permute.xlu1 %2844 }
0x131b   : > { %5902 = vmatprep.subr.mxu1 %v6646_v10 }
0x131c   : > { %5903 = vmatpush3.msra.mxu1 %v7616_v37 }
0x131d   : > { %5904 = vmatprep.subr.mxu1 %v6646_v10 }
0x131e   : > { %5905 = vmatpush3.msra.mxu1 %v7623_v60  ;;  %v2849_v32 = vpop.permute.xlu1 %2848 }
0x131f   : > { %5920 = vmatprep.subr.mxu1 %v6646_v10 }
0x1322   : > { %v2853_v27 = vpop.permute.xlu1 %2852 }
0x1326   : > { %v2883_v40 = vpop.permute.xlu1 %2882 }
0x1327   : > { %v2904_v31 = vadd.f32 %v2883_v40, %v2824_v0 }
0x132a   : > { %v2887_v28 = vpop.permute.xlu1 %2886 }
0x132b   : > { %v2906_v45 = vadd.f32 %v2887_v28, %v2826_v46 }
0x132e   : > { %v2891_v38 = vpop.permute.xlu1 %2890 }
0x132f   : > { %v2908_v48 = vadd.f32 %v2891_v38, %v2828_v13 }
0x13d7   : > { %v3284_v29 = vpop.f32.mrf.mxu1 }
0x13d8   : > { %v3288_v14 = vadd.f32 %v3284_v29, %v3081_v20 }
0x13d9   : > { %v5886_v7 = vpop.f32.mrf.mxu1 }
0x13da   : > { %6504 = vtanh.f32 %v3288_v14  ;;  %v5228_v44 = vmul.f32 -1.442695, %v3288_v14 }
0x13db   : > { %6506 = vrcp.f32 %v2793_v24 }
0x13dc   : > { %6508 = vrcp.f32 %v2795_v53 }
0x13dd   : > { %6510 = vrcp.f32 %v2797_v22 }
0x13de   : > { %6512 = vtanh.f32 %v2904_v31 }
0x13df   : > { %6514 = vtanh.f32 %v2906_v45 }
0x13e0   : > { %6516 = vtanh.f32 %v2908_v48 }
0x13e1   : > { %6518 = vpow2.f32 %v5228_v44 }
0x13e7   : > { %v6505_v39 = vpop.eup %6504 }
0x13e8   : > { %3298 = vrot.lane.b32.xlu0 %v6505_v39, %s8397_s15  ;;  %v7732_v18 = vpop.eup %6506 }
0x13e9   : > { %v2865_v42 = vmul.f32 %v7732_v18, %v2845_v15  ;;  %v6509_v59 = vpop.eup %6508  ;;  %v2825_v9 = vmul.f32 %v7732_v18, %v7529_v51 }
0x13ea   : > { %v2867_v21 = vmul.f32 %v6509_v59, %v2849_v32  ;;  %v6511_v25 = vpop.eup %6510  ;;  %v2827_v62 = vmul.f32 %v6509_v59, %v7539_v6 }
0x13eb   : > { %v2869_v3 = vmul.f32 %v6511_v25, %v2853_v27  ;;  %v6513_v11 = vpop.eup %6512  ;;  %v2829_v34 = vmul.f32 %v6511_v25, %v7547_v16 }
0x13ec   : > { %2884 = vrot.lane.b32.xlu0 %v2865_v42, %s6648_s26  ;;  %v6515_v58 = vpop.eup %6514 }
0x13ed   : > { %v6517_v55 = vpop.eup %6516 }
0x13ee   : > { %v6519_v49 = vpop.eup %6518 }
0x13ef   : > { %v3292_v54 = vadd.f32 1.0, %v6519_v49 }
0x13f0   : > { %2888 = vrot.lane.b32.xlu0 %v2867_v21, %s6648_s26 }
0x13f1   : > { %6520 = vrcp.f32 %v3292_v54 }
0x13f4   : > { %2892 = vrot.lane.b32.xlu0 %v2869_v3, %s6648_s26 }
0x13f8   : > { %2930 = vrot.lane.b32.xlu0 %v6513_v11, %s8397_s15 }
0x13fc   : > { %2934 = vrot.lane.b32.xlu0 %v6515_v58, %s8397_s15 }
0x13fe   : > { %v6521_v43 = vpop.eup %6520 }
0x13ff   : > { %v3296_v20 = vmul.f32 %v6521_v43, %v7681_v33 }
0x1400   : > { %2938 = vrot.lane.b32.xlu0 %v6517_v55, %s8397_s15 }
0x145a   : > { %v3299_v1 = vpop.permute.xlu0 %3298 }
0x145b   : > { %v3301_v57 = vmul.f32 %v6521_v43, %v3299_v1 }
0x145d   : > { %3303 = vrot.lane.b32.xlu1 %v3301_v57, %s6648_s26 }
0x145e   : > { %v2885_v26 = vpop.permute.xlu0 %2884 }
0x145f   : > { %v2905_v35 = vadd.f32 %v2885_v26, %v2825_v9 }
0x1461   : > { %6522 = vtanh.f32 %v2905_v35 }
0x1462   : > { %v2889_v2 = vpop.permute.xlu0 %2888 }
0x1463   : > { %v2907_v56 = vadd.f32 %v2889_v2, %v2827_v62 }
0x1465   : > { %6524 = vtanh.f32 %v2907_v56 }
0x1466   : > { %v2893_v8 = vpop.permute.xlu0 %2892 }
0x1467   : > { %v2909_v52 = vadd.f32 %v2893_v8, %v2829_v34 }
0x1469   : > { %6526 = vtanh.f32 %v2909_v52 }
0x146a   : > { %v2931_v17 = vpop.permute.xlu0 %2930 }
0x146b   : > { %v2952_v6 = vmul.f32 %v7696_v23, %v2931_v17 }
0x146e   : > { %v6523_v47 = vpop.eup %6522  ;;  %v2935_v15 = vpop.permute.xlu0 %2934 }
0x146f   : > { %2932 = vrot.lane.b32.xlu1 %v6523_v47, %s8397_s15  ;;  %v2954_v16 = vmul.f32 %v7700_v4, %v2935_v15 }
0x1472   : > { %v6525_v5 = vpop.eup %6524  ;;  %v2939_v32 = vpop.permute.xlu0 %2938 }
0x1473   : > { %2936 = vrot.lane.b32.xlu1 %v6525_v5, %s8397_s15  ;;  %v2956_v19 = vmul.f32 %v7704_v41, %v2939_v32 }
0x1476   : > { %v6527_v51 = vpop.eup %6526 }
0x1477   : > { %2940 = vrot.lane.b32.xlu1 %v6527_v51, %s8397_s15 }
0x147b   : > { %2981 = vrot.lane.b32.xlu1 %v2952_v6, %s6648_s26 }
0x147f   : > { %2985 = vrot.lane.b32.xlu1 %v2954_v16, %s6648_s26 }
0x1483   : > { %2989 = vrot.lane.b32.xlu1 %v2956_v19, %s6648_s26 }
0x14cf   : > { %v3304_v29 = vpop.permute.xlu1 %3303 }
0x14d0   : > { %v3306_v24 = vadd.f32 %v3304_v29, %v3296_v20 }
0x14d2   : > { %6528 = vtanh.f32 %v3306_v24 }
0x14df   : > { %v6529_v14 = vpop.eup %6528 }
0x14e0   : > { %3309 = vrot.lane.b32.xlu0 %v6529_v14, %s8397_s15 }
0x14e1   : > { %v2933_v23 = vpop.permute.xlu1 %2932 }
0x14e2   : > { %v2953_v63 = vmul.f32 %v7732_v18, %v2933_v23 }
0x14e4   : > { %2983 = vrot.lane.b32.xlu0 %v2953_v63, %s6648_s26 }
0x14e5   : > { %v2937_v4 = vpop.permute.xlu1 %2936 }
0x14e6   : > { %v2955_v27 = vmul.f32 %v6509_v59, %v2937_v4 }
0x14e8   : > { %2987 = vrot.lane.b32.xlu0 %v2955_v27, %s6648_s26 }
0x14e9   : > { %v2941_v41 = vpop.permute.xlu1 %2940 }
0x14ea   : > { %v2957_v7 = vmul.f32 %v6511_v25, %v2941_v41 }
0x14ec   : > { %2991 = vrot.lane.b32.xlu0 %v2957_v7, %s6648_s26 }
0x14ed   : > { %v2982_v33 = vpop.permute.xlu1 %2981 }
0x14ee   : > { %5856 = vmatprep.mubr.msk.f32.mxu0 %vm471_vm0, %v2982_v33 }
0x14f1   : > { %v2986_v40 = vpop.permute.xlu1 %2985 }
0x14f5   : > { %v2990_v28 = vpop.permute.xlu1 %2989 }
0x1552   : > { %v3310_v53 = vpop.permute.xlu0 %3309 }
0x1553   : > { %v3312_v50 = vmul.f32 %v6521_v43, %v3310_v53 }
0x1555   : > { %3314 = vrot.lane.b32.xlu1 %v3312_v50, %s6648_s26 }
0x1556   : > { %v2984_v22 = vpop.permute.xlu0 %2983 }
0x1557   : > { %5857 = vmatmul.mubr.msk.f32.gmra.mxu0 %vm471_vm0, %v2984_v22 }
0x1558   : > { %5859 = vmatprep.mubr.msk.f32.mxu0 %vm471_vm0, %v2986_v40 }
0x155a   : > { %v2988_v0 = vpop.permute.xlu0 %2987 }
0x155b   : > { %5860 = vmatmul.mubr.msk.f32.gmra.mxu0 %vm471_vm0, %v2988_v0 }
0x155c   : > { %5862 = vmatprep.mubr.msk.f32.mxu0 %vm471_vm0, %v2990_v28 }
0x155e   : > { %v2992_v31 = vpop.permute.xlu0 %2991 }
0x155f   : > { %5863 = vmatmul.mubr.msk.f32.gmra.mxu0 %vm471_vm0, %v2992_v31 }
0x1560   : > { %5895 = vmatprep.mubr.msk.f32.mxu0 %vm6649_vm1, %v6646_v10 }
0x15c7   : > { %v7772_v39 = vpop.permute.xlu1 %3314 }
0x15c8   : > { %5896 = vmatmul.mubr.msk.f32.vlgmr.msra.gmra.mxu0 %vm471_vm0, %v7772_v39 }
0x15c9   : > { %5910 = vmatpush3.msra.mxu0 %v7585_v61  ;;  %5917 = vmatprep.mubr.msk.f32.mxu0 %vm6649_vm1, %v6646_v10 }
0x15ca   : > { %5911 = vmatprep.subr.mxu0 %v6646_v10 }
0x15cb   : > { %5912 = vmatpush3.msra.mxu0 %v7597_v30 }
0x15cc   : > { %5913 = vmatprep.subr.mxu0 %v6646_v10 }
0x15cd   : > { %5914 = vmatpush3.msra.mxu0 %v7616_v37 }
0x15ce   : > { %5915 = vmatprep.subr.mxu0 %v6646_v10 }
0x15cf   : > { %5916 = vmatpush3.msra.mxu0 %v7623_v60 }
0x15d0   : > { %5931 = vmatprep.subr.mxu0 %v6646_v10 }
0x1617   : > { %v5858_v46 = vpop.f32.mrf.mxu0 }
0x1618   : > { %v3091_v2 = vadd.f32 %v5858_v46, %v7676_v36 }
0x1619   : > { %v3085_v18 = vpop.f32.mrf.mxu0 }
0x161a   : > { %v3086_v59 = vadd.f32 %v7676_v36, %v3085_v18 }
0x161b   : > { %v7786_v42 = vpop.f32.mrf.mxu0 }
0x161d   : > { %v7788_v45 = vpop.f32.mrf.mxu0 }
0x161e   : > { %v3096_v23 = vadd.f32 %v7676_v36, %v7788_v45 }
0x161f   : > { %v7790_v38 = vpop.f32.mrf.mxu0 }
0x1621   : > { %v7792_v13 = vpop.f32.mrf.mxu0 }
0x1688   : > { %v3384_v21 = vpop.f32.mrf.mxu0 }
0x1689   : > { %v3388_v48 = vadd.f32 %v3384_v21, %v3086_v59  ;;  %v3101_v21 = vadd.f32 %v7786_v42, %v7676_v36 }
0x168a   : > { %v5897_v25 = vpop.f32.mrf.mxu0 }
0x168b   : > { %6530 = vtanh.f32 %v3388_v48  ;;  %v5230_v11 = vmul.f32 -1.442695, %v3388_v48 }
0x168d   : > { %6532 = vpow2.f32 %v5230_v11 }
0x1698   : > { %v6531_v3 = vpop.eup %6530 }
0x1699   : > { %3398 = vrot.lane.b32.xlu0 %v6531_v3, %s8397_s15 }
0x169a   : > { %v6533_v58 = vpop.eup %6532 }
0x169b   : > { %v3392_v55 = vadd.f32 1.0, %v6533_v58 }
0x169d   : > { %6534 = vrcp.f32 %v3392_v55 }
0x16aa   : > { %v6535_v44 = vpop.eup %6534 }
0x16ab   : > { %v3396_v43 = vmul.f32 %v6535_v44, %v3306_v24 }
0x170b   : > { %v3399_v49 = vpop.permute.xlu0 %3398 }
0x170c   : > { %v3401_v54 = vmul.f32 %v6535_v44, %v3399_v49  ;;  %v3916_v49 = vld [vmem:[%s8381_s7 + $0x18] sm:$0xff] }
0x170e   : > { %3403 = vrot.lane.b32.xlu1 %v3401_v54, %s6648_s26 }
0x1780   : > { %v3404_v1 = vpop.permute.xlu1 %3403 }
0x1781   : > { %v3406_v57 = vadd.f32 %v3404_v1, %v3396_v43 }
0x1783   : > { %6536 = vtanh.f32 %v3406_v57 }
0x1790   : > { %v6537_v9 = vpop.eup %6536 }
0x1791   : > { %3409 = vrot.lane.b32.xlu0 %v6537_v9, %s8397_s15  ;;  %v3915_v9 = vld [vmem:[%s8381_s7 + $0x10] sm:$0xff] }
0x1803   : > { %v3410_v26 = vpop.permute.xlu0 %3409 }
0x1804   : > { %v3412_v35 = vmul.f32 %v6535_v44, %v3410_v26  ;;  %v3914_v26 = vld [vmem:[%s8381_s7 + $0x8] sm:$0xff] }
0x1806   : > { %3414 = vrot.lane.b32.xlu1 %v3412_v35, %s6648_s26  ;;  %v3913_v35 = vld [vmem:[%s8381_s7] sm:$0xff] }
0x1878   : > { %v7799_v62 = vpop.permute.xlu1 %3414 }
0x1879   : > { %5907 = vmatmul.mubr.msk.f32.vlgmr.msra.gmra.mxu1 %vm471_vm0, %v7799_v62 }
0x187a   : > { %5921 = vmatpush3.msra.mxu1 %v7585_v61  ;;  %5928 = vmatprep.mubr.msk.f32.mxu1 %vm6649_vm1, %v6646_v10 }
0x187b   : > { %5922 = vmatprep.subr.mxu1 %v6646_v10 }
0x187c   : > { %5923 = vmatpush3.msra.mxu1 %v7597_v30 }
0x187d   : > { %5924 = vmatprep.subr.mxu1 %v6646_v10 }
0x187e   : > { %5925 = vmatpush3.msra.mxu1 %v7616_v37 }
0x187f   : > { %5926 = vmatprep.subr.mxu1 %v6646_v10 }
0x1880   : > { %5927 = vmatpush3.msra.mxu1 %v7623_v60 }
0x1881   : > { %5942 = vmatprep.subr.mxu1 %v6646_v10 }
0x1939   : > { %v3484_v56 = vpop.f32.mrf.mxu1 }
0x193a   : > { %v3488_v34 = vadd.f32 %v3484_v56, %v3091_v2 }
0x193b   : > { %v5908_v8 = vpop.f32.mrf.mxu1 }
0x193c   : > { %6538 = vtanh.f32 %v3488_v34  ;;  %v5232_v47 = vmul.f32 -1.442695, %v3488_v34 }
0x193e   : > { %6540 = vpow2.f32 %v5232_v47 }
0x1949   : > { %v6539_v52 = vpop.eup %6538 }
0x194a   : > { %3498 = vrot.lane.b32.xlu0 %v6539_v52, %s8397_s15 }
0x194b   : > { %v6541_v5 = vpop.eup %6540 }
0x194c   : > { %v3492_v17 = vadd.f32 1.0, %v6541_v5 }
0x194e   : > { %6542 = vrcp.f32 %v3492_v17 }
0x195b   : > { %v6543_v51 = vpop.eup %6542 }
0x195c   : > { %v3496_v16 = vmul.f32 %v6543_v51, %v3406_v57 }
0x19bc   : > { %v3499_v15 = vpop.permute.xlu0 %3498 }
0x19bd   : > { %v3501_v6 = vmul.f32 %v6543_v51, %v3499_v15 }
0x19bf   : > { %3503 = vrot.lane.b32.xlu1 %v3501_v6, %s6648_s26 }
0x1a31   : > { %v3504_v32 = vpop.permute.xlu1 %3503 }
0x1a32   : > { %v3506_v19 = vadd.f32 %v3504_v32, %v3496_v16 }
0x1a34   : > { %6544 = vtanh.f32 %v3506_v19 }
0x1a41   : > { %v6545_v20 = vpop.eup %6544 }
0x1a42   : > { %3509 = vrot.lane.b32.xlu0 %v6545_v20, %s8397_s15  ;;  %v3111_v20 = vadd.f32 %v7790_v38, %v7676_v36 }
0x1ab4   : > { %v3510_v29 = vpop.permute.xlu0 %3509 }
0x1ab5   : > { %v3512_v24 = vmul.f32 %v6543_v51, %v3510_v29 }
0x1ab7   : > { %3514 = vrot.lane.b32.xlu1 %v3512_v24, %s6648_s26 }
0x1b29   : > { %v7818_v14 = vpop.permute.xlu1 %3514 }
0x1b2a   : > { %5918 = vmatmul.mubr.msk.f32.vlgmr.msra.gmra.mxu0 %vm471_vm0, %v7818_v14 }
0x1b2b   : > { %5932 = vmatpush3.msra.mxu0 %v7585_v61  ;;  %5939 = vmatprep.mubr.msk.f32.mxu0 %vm6649_vm1, %v6646_v10 }
0x1b2c   : > { %5933 = vmatprep.subr.mxu0 %v6646_v10 }
0x1b2d   : > { %5934 = vmatpush3.msra.mxu0 %v7597_v30 }
0x1b2e   : > { %5935 = vmatprep.subr.mxu0 %v6646_v10 }
0x1b2f   : > { %5936 = vmatpush3.msra.mxu0 %v7616_v37 }
0x1b30   : > { %5937 = vmatprep.subr.mxu0 %v6646_v10 }
0x1b31   : > { %5938 = vmatpush3.msra.mxu0 %v7623_v60 }
0x1b32   : > { %5953 = vmatprep.subr.mxu0 %v3916_v49 }
0x1bea   : > { %v3584_v63 = vpop.f32.mrf.mxu0 }
0x1beb   : > { %v3588_v4 = vadd.f32 %v3584_v63, %v3096_v23 }
0x1bec   : > { %v5919_v27 = vpop.f32.mrf.mxu0 }
0x1bed   : > { %6546 = vtanh.f32 %v3588_v4  ;;  %v5234_v7 = vmul.f32 -1.442695, %v3588_v4 }
0x1bef   : > { %6548 = vpow2.f32 %v5234_v7 }
0x1bfa   : > { %v6547_v41 = vpop.eup %6546 }
0x1bfb   : > { %3598 = vrot.lane.b32.xlu0 %v6547_v41, %s8397_s15 }
0x1bfc   : > { %v6549_v33 = vpop.eup %6548 }
0x1bfd   : > { %v3592_v53 = vadd.f32 1.0, %v6549_v33 }
0x1bff   : > { %6550 = vrcp.f32 %v3592_v53 }
0x1c0c   : > { %v6551_v50 = vpop.eup %6550 }
0x1c0d   : > { %v3596_v0 = vmul.f32 %v6551_v50, %v3506_v19 }
0x1c6d   : > { %v3599_v40 = vpop.permute.xlu0 %3598 }
0x1c6e   : > { %v3601_v22 = vmul.f32 %v6551_v50, %v3599_v40  ;;  %v5249_v40 = vld [vmem:[%s8382_s8] ss:$0 sm:$0xff] }
0x1c70   : > { %3603 = vrot.lane.b32.xlu1 %v3601_v22, %s6648_s26 }
0x1ce2   : > { %v3604_v28 = vpop.permute.xlu1 %3603 }
0x1ce3   : > { %v3606_v31 = vadd.f32 %v3604_v28, %v3596_v0  ;;  %v4207_v0 = vld [vmem:[%s8383_s9 + $0x18] sm:$0xff]  ;;  %v4206_v28 = vld [vmem:[%s8383_s9 + $0x10] sm:$0xff] }
0x1ce5   : > { %6552 = vtanh.f32 %v3606_v31 }
0x1cf2   : > { %v6553_v46 = vpop.eup %6552 }
0x1cf3   : > { %3609 = vrot.lane.b32.xlu0 %v6553_v46, %s8397_s15  ;;  %v4205_v46 = vld [vmem:[%s8383_s9 + $0x8] sm:$0xff] }
0x1d65   : > { %v3610_v18 = vpop.permute.xlu0 %3609 }
0x1d66   : > { %v3612_v45 = vmul.f32 %v6551_v50, %v3610_v18  ;;  %v4204_v18 = vld [vmem:[%s8383_s9] sm:$0xff] }
0x1d68   : > { %3614 = vrot.lane.b32.xlu1 %v3612_v45, %s6648_s26 }
0x1dda   : > { %v3615_v59 = vpop.permute.xlu1 %3614 }
0x1ddb   : > { %5929 = vmatmul.mubr.msk.f32.vlgmr.msra.gmra.mxu1 %vm471_vm0, %v3615_v59 }
0x1ddc   : > { %5943 = vmatpush3.msra.mxu1 %v7585_v61  ;;  %5950 = vmatprep.mubr.msk.f32.mxu1 %vm6649_vm1, %v6646_v10 }
0x1ddd   : > { %5944 = vmatprep.subr.mxu1 %v6646_v10 }
0x1dde   : > { %5945 = vmatpush3.msra.mxu1 %v7597_v30 }
0x1ddf   : > { %5946 = vmatprep.subr.mxu1 %v6646_v10 }
0x1de0   : > { %5947 = vmatpush3.msra.mxu1 %v7616_v37 }
0x1de1   : > { %5948 = vmatprep.subr.mxu1 %v6646_v10 }
0x1de2   : > { %5949 = vmatpush3.msra.mxu1 %v7623_v60 }
0x1de3   : > { %6077 = vmatprep.subr.mxu1 %v4207_v0 }
0x1e9b   : > { %v3684_v48 = vpop.f32.mrf.mxu1 }
0x1e9c   : > { %v3688_v61 = vadd.f32 %v3684_v48, %v3101_v21 }
0x1e9d   : > { %v5930_v25 = vpop.f32.mrf.mxu1 }
0x1e9e   : > { %6554 = vtanh.f32 %v3688_v61  ;;  %v5236_v11 = vmul.f32 -1.442695, %v3688_v61 }
0x1ea0   : > { %6556 = vpow2.f32 %v5236_v11 }
0x1eab   : > { %v6555_v3 = vpop.eup %6554 }
0x1eac   : > { %3698 = vrot.lane.b32.xlu0 %v6555_v3, %s8397_s15 }
0x1ead   : > { %v6557_v30 = vpop.eup %6556 }
0x1eae   : > { %v3692_v58 = vadd.f32 1.0, %v6557_v30 }
0x1eb0   : > { %6558 = vrcp.f32 %v3692_v58 }
0x1ebd   : > { %v6559_v37 = vpop.eup %6558 }
0x1ebe   : > { %v3696_v60 = vmul.f32 %v6559_v37, %v3606_v31 }
0x1f1e   : > { %v3699_v55 = vpop.permute.xlu0 %3698 }
0x1f1f   : > { %v3701_v10 = vmul.f32 %v6559_v37, %v3699_v55 }
0x1f21   : > { %3703 = vrot.lane.b32.xlu1 %v3701_v10, %s6648_s26 }
0x1f93   : > { %v3704_v44 = vpop.permute.xlu1 %3703 }
0x1f94   : > { %v3706_v42 = vadd.f32 %v3704_v44, %v3696_v60 }
0x1f96   : > { %6560 = vtanh.f32 %v3706_v42 }
0x1fa3   : > { %v6561_v54 = vpop.eup %6560 }
0x1fa4   : > { %3709 = vrot.lane.b32.xlu0 %v6561_v54, %s8397_s15 }
0x2016   : > { %v3710_v43 = vpop.permute.xlu0 %3709 }
0x2017   : > { %v3712_v1 = vmul.f32 %v6559_v37, %v3710_v43 }
0x2019   : > { %3714 = vrot.lane.b32.xlu1 %v3712_v1, %s6648_s26 }
0x208b   : > { %v3715_v57 = vpop.permute.xlu1 %3714 }
0x208c   : > { %5940 = vmatmul.mubr.msk.f32.vlgmr.msra.gmra.mxu0 %vm471_vm0, %v3715_v57 }
0x208d   : > { %5954 = vmatpush3.msra.mxu0 %v3916_v49  ;;  %5961 = vmatprep.mubr.msk.f32.mxu0 %vm471_vm0, %v7708_v12  ;;  %v3106_v12 = vadd.f32 %v7676_v36, %v7792_v13 }
0x208e   : > { %5955 = vmatprep.subr.mxu0 %v3915_v9 }
0x208f   : > { %5956 = vmatpush3.msra.mxu0 %v3915_v9 }
0x2090   : > { %5957 = vmatprep.subr.mxu0 %v3914_v26 }
0x2091   : > { %5958 = vmatpush3.msra.mxu0 %v3914_v26 }
0x2092   : > { %5959 = vmatprep.subr.mxu0 %v3913_v35 }
0x2093   : > { %5960 = vmatpush3.msra.mxu0 %v3913_v35 }
0x2094   : > { %5962 = vmatmul.mubr.msk.f32.vlgmr.msra.gmra.mxu0 %vm471_vm0, %v7772_v39  ;;  %5973 = vmatprep.subr.mxu0 %v4207_v0 }
0x2095   : > { %5964 = vmatprep.mubr.msk.f32.mxu0 %vm471_vm0, %v7799_v62  ;;  %5974 = vmatpush3.msra.mxu0 %v4207_v0 }
0x2096   : > { %5975 = vmatprep.subr.mxu0 %v4206_v28 }
0x2097   : > { %5976 = vmatpush3.msra.mxu0 %v4206_v28 }
0x2098   : > { %5965 = vmatmul.mubr.msk.f32.gmra.mxu0 %vm471_vm0, %v7818_v14  ;;  %5977 = vmatprep.subr.mxu0 %v4205_v46 }
0x2099   : > { %5967 = vmatprep.mubr.msk.f32.mxu0 %vm471_vm0, %v3615_v59  ;;  %5978 = vmatpush3.msra.mxu0 %v4205_v46 }
0x209a   : > { %5979 = vmatprep.subr.mxu0 %v4204_v18 }
0x209b   : > { %5980 = vmatpush3.msra.mxu0 %v4204_v18 }
0x209c   : > { %5968 = vmatmul.mubr.msk.f32.gmra.mxu0 %vm471_vm0, %v3715_v57 }
0x214c   : > { %v3784_v2 = vpop.f32.mrf.mxu0 }
0x214d   : > { %v3788_v56 = vadd.f32 %v3784_v2, %v3106_v12 }
0x214e   : > { %v5941_v34 = vpop.f32.mrf.mxu0 }
0x214f   : > { %6562 = vtanh.f32 %v3788_v56  ;;  %v5238_v39 = vmul.f32 -1.442695, %v3788_v56 }
0x2151   : > { %6564 = vpow2.f32 %v5238_v39 }
0x2154   : > { %v7893_v22 = vpop.f32.mrf.mxu0 }
0x2156   : > { %v7901_v31 = vpop.f32.mrf.mxu0 }
0x2158   : > { %v7909_v45 = vpop.f32.mrf.mxu0 }
0x215a   : > { %v7911_v59 = vpop.f32.mrf.mxu0 }
0x215c   : > { %v6563_v8 = vpop.eup %6562  ;;  %v7914_v61 = vpop.f32.mrf.mxu0 }
0x215d   : > { %3798 = vrot.lane.b32.xlu0 %v6563_v8, %s8397_s15 }
0x215e   : > { %v6565_v62 = vpop.eup %6564  ;;  %v7920_v30 = vpop.f32.mrf.mxu0 }
0x215f   : > { %v3792_v52 = vadd.f32 1.0, %v6565_v62 }
0x2161   : > { %6566 = vrcp.f32 %v3792_v52 }
0x216e   : > { %v6567_v47 = vpop.eup %6566 }
0x216f   : > { %v3796_v51 = vmul.f32 %v6567_v47, %v3706_v42 }
0x21cf   : > { %v3799_v5 = vpop.permute.xlu0 %3798 }
0x21d0   : > { %v3801_v17 = vmul.f32 %v6567_v47, %v3799_v5 }
0x21d2   : > { %3803 = vrot.lane.b32.xlu1 %v3801_v17, %s6648_s26 }
0x2244   : > { %v3804_v15 = vpop.permute.xlu1 %3803 }
0x2245   : > { %v3806_v13 = vadd.f32 %v3804_v15, %v3796_v51 }
0x2247   : > { %6568 = vtanh.f32 %v3806_v13 }
0x2254   : > { %v6569_v6 = vpop.eup %6568 }
0x2255   : > { %3809 = vrot.lane.b32.xlu0 %v6569_v6, %s8397_s15 }
0x22c7   : > { %v3810_v16 = vpop.permute.xlu0 %3809 }
0x22c8   : > { %v3812_v32 = vmul.f32 %v6567_v47, %v3810_v16 }
0x22ca   : > { %3814 = vrot.lane.b32.xlu1 %v3812_v32, %s6648_s26 }
0x233c   : > { %v3815_v19 = vpop.permute.xlu1 %3814 }
0x233d   : > { %5951 = vmatmul.mubr.msk.f32.vlgmr.msra.gmra.mxu1 %vm471_vm0, %v3815_v19  ;;  %5970 = vmatprep.mubr.msk.f32.mxu0 %vm471_vm0, %v3815_v19 }
0x233e   : > { %6081 = vmatpush3.msra.mxu1 %v4207_v0 }
0x233f   : > { %6078 = vmatprep.subr.mxu1 %v4206_v28 }
0x2340   : > { %6082 = vmatpush3.msra.mxu1 %v4206_v28 }
0x2341   : > { %6079 = vmatprep.subr.mxu1 %v4205_v46 }
0x2342   : > { %6083 = vmatpush3.msra.mxu1 %v4205_v46 }
0x2343   : > { %6080 = vmatprep.subr.mxu1 %v4204_v18 }
0x2344   : > { %6084 = vmatpush3.msra.mxu1 %v4204_v18 }
0x23fd   : > { %v3884_v29 = vpop.f32.mrf.mxu1 }
0x23fe   : > { %v3888_v24 = vadd.f32 %v3884_v29, %v3111_v20 }
0x23ff   : > { %v5952_v14 = vpop.f32.mrf.mxu1 }
0x2400   : > { %6570 = vtanh.f32 %v3888_v24  ;;  %v5240_v63 = vmul.f32 -1.442695, %v3888_v24 }
0x2402   : > { %6572 = vpow2.f32 %v5240_v63 }
0x240d   : > { %v6571_v23 = vpop.eup %6570 }
0x240e   : > { %3898 = vrot.lane.b32.xlu0 %v6571_v23, %s8397_s15 }
0x240f   : > { %v6573_v4 = vpop.eup %6572 }
0x2410   : > { %v3892_v27 = vadd.f32 1.0, %v6573_v4 }
0x2412   : > { %6574 = vrcp.f32 %v3892_v27 }
0x241f   : > { %v6575_v41 = vpop.eup %6574 }
0x2420   : > { %v3896_v53 = vmul.f32 %v6575_v41, %v3806_v13 }
0x2480   : > { %v3899_v7 = vpop.permute.xlu0 %3898 }
0x2481   : > { %v3901_v33 = vmul.f32 %v6575_v41, %v3899_v7 }
0x2483   : > { %3903 = vrot.lane.b32.xlu1 %v3901_v33, %s6648_s26 }
0x24f5   : > { %v3904_v50 = vpop.permute.xlu1 %3903 }
0x24f6   : > { %v3906_v36 = vadd.f32 %v3904_v50, %v3896_v53 }
0x24f8   : > { %6576 = vtanh.f32 %v3906_v36 }
0x2505   : > { %v6577_v38 = vpop.eup %6576 }
0x2506   : > { %3909 = vrot.lane.b32.xlu0 %v6577_v38, %s8397_s15  ;;  %s406_s15 = scalar_lea.vmem [#allocation2], %s5078_s28  ;;  %s6590_s28 = scalar_lea.vmem %s6589_s25, 256 }
0x2507   : > { %s5015_s16 = sshll.u32 %s406_s15, 4  ;;  %s5016_s16 = int_to_ptr.vmem [resolvable:$true] %s5015_s16 }
0x2508   : > { %s6584_s0 = scalar_lea.vmem %s5016_s16, 128  ;;  %p6591_p0 = scmp.lt.s32.totalorder %s5016_s16, %s6589_s25 }
0x2509   : > { %p6585_p11 = scmp.ne.s32.totalorder %s5016_s16, %s6584_s0  ;;  %p6592_p1 = scmp.lt.s32.totalorder %s6590_s28, %s6584_s0 }
0x250a   : > { %4033 = vrot.lane.b32.xlu0 %v5249_v40, %s6648_s26 }
0x250b   : > { %p6586_p12 = pnand %p6585_p11, %p6755_p5  ;;  %p6593_p2 = por %p6592_p1, %p6591_p0 }
0x250d   : > { %p6587_p13 = pneg %p6586_p12 }
0x250f   : > { %p6594_p3 = pnand %p6593_p2, %p6587_p13 }
0x2578   : > { %v3910_v21 = vpop.permute.xlu0 %3909 }
0x2579   : > { %v3912_v48 = vmul.f32 %v6575_v41, %v3910_v21 }
0x257b   : > { %3918 = vrot.lane.b32.xlu1 %v3912_v48, %s6648_s26  ;;  %s5002_s26 = scalar_lea.sflag [#allocation3], %s404_s19 }
0x257c   : > { %v4034_v25 = vpop.permute.xlu0 %4033 }
0x257d   : > { %v4039_v3 = vadd.f32 %v7909_v45, %v4034_v25  ;;  %v4038_v11 = vadd.f32 %v4034_v25, %v7911_v59  ;;  %v4041_v58 = vadd.f32 %v7914_v61, %v4034_v25  ;;  %v4040_v37 = vadd.f32 %v4034_v25, %v7920_v30 }
0x257e   : > { %v4037_v8 = vadd.f32 %v7893_v22, %v4034_v25  ;;  %v4036_v39 = vadd.f32 %v4034_v25, %v7901_v31 }
0x257f   : > { %4058 = vrot.lane.b32.xlu0 %v4039_v3, %s6650_s18  ;;  %4056 = vrot.lane.b32.xlu1 %v4038_v11, %s6650_s18 }
0x2583   : > { %4062 = vrot.lane.b32.xlu0 %v4041_v58, %s6650_s18  ;;  %4060 = vrot.lane.b32.xlu1 %v4040_v37, %s6650_s18 }
0x25ed   : > { %v3919_v55 = vpop.permute.xlu1 %3918 }
0x25ee   : > { %5971 = vmatmul.mubr.msk.f32.gmra.mxu0 %vm471_vm0, %v3919_v55 }
0x25f1   : > { %v7927_v10 = vpop.permute.xlu0 %4058  ;;  %v7929_v60 = vpop.permute.xlu1 %4056 }
0x25f2   : > { %v4094_v44 = vadd.f32 %v7929_v60, %v7911_v59  ;;  %v4095_v42 = vadd.f32 %v7927_v10, %v7911_v59  ;;  %v4078_v20 = vadd.f32 %v7929_v60, %v7901_v31  ;;  %v4102_v29 = vadd.f32 %v7909_v45, %v7929_v60 }
0x25f3   : > { %v4079_v4 = vadd.f32 %v7927_v10, %v7901_v31  ;;  %v4103_v27 = vadd.f32 %v7909_v45, %v7927_v10 }
0x25f4   : > { %v4158_v49 = vmax.f32 %v4094_v44, 0.0  ;;  %v4159_v54 = vmax.f32 %v4095_v42, 0.0  ;;  %v4142_v41 = vmax.f32 %v4078_v20, 0.0  ;;  %v4166_v7 = vmax.f32 %v4102_v29, 0.0 }
0x25f5   : > { %v7935_v43 = vpop.permute.xlu0 %4062  ;;  %v7937_v1 = vpop.permute.xlu1 %4060  ;;  %v4143_v50 = vmax.f32 %v4079_v4, 0.0  ;;  %v4167_v36 = vmax.f32 %v4103_v27, 0.0 }
0x25f6   : > { %6008 = vmatprep.mubr.msk.f32.mxu1 %vm471_vm0, %v4158_v49  ;;  %v4096_v57 = vadd.f32 %v7937_v1, %v7911_v59  ;;  %v4097_v9 = vadd.f32 %v7935_v43, %v7911_v59  ;;  %v4080_v33 = vadd.f32 %v7937_v1, %v7901_v31  ;;  %v4104_v53 = vadd.f32 %v7909_v45, %v7937_v1 }
0x25f7   : > { %6009 = vmatmul.mubr.msk.f32.vlgmr.msra.gmra.mxu1 %vm471_vm0, %v4159_v54  ;;  %v4081_v38 = vadd.f32 %v7935_v43, %v7901_v31  ;;  %v4105_v40 = vadd.f32 %v7909_v45, %v7935_v43 }
0x25f8   : > { %v4160_v26 = vmax.f32 %v4096_v57, 0.0  ;;  %v4161_v35 = vmax.f32 %v4097_v9, 0.0  ;;  %v4144_v0 = vmax.f32 %v4080_v33, 0.0  ;;  %v4168_v28 = vmax.f32 %v4104_v53, 0.0 }
0x25f9   : > { %v4145_v21 = vmax.f32 %v4081_v38, 0.0  ;;  %v4169_v48 = vmax.f32 %v4105_v40, 0.0  ;;  %v4086_v57 = vadd.f32 %v7893_v22, %v7929_v60  ;;  %v4110_v9 = vadd.f32 %v7929_v60, %v7920_v30 }
0x25fa   : > { %6011 = vmatprep.mubr.msk.f32.mxu1 %vm471_vm0, %v4160_v26  ;;  %v4118_v38 = vadd.f32 %v7914_v61, %v7929_v60 }
0x25fb   : > { %6012 = vmatmul.mubr.msk.f32.gmra.mxu1 %vm471_vm0, %v4161_v35 }
0x26ae   : > { %v7947_v12 = vpop.f32.mrf.mxu0 }
0x26af   : > { %v4043_v2 = vadd.f32 %v7947_v12, %v4034_v25 }
0x26b0   : > { %v7950_v56 = vpop.f32.mrf.mxu0 }
0x26b1   : > { %4066 = vrot.lane.b32.xlu0 %v4043_v2, %s6650_s18  ;;  %v4042_v34 = vadd.f32 %v4034_v25, %v7950_v56  ;;  %v4087_v2 = vadd.f32 %v7893_v22, %v7927_v10 }
0x26b3   : > { %4064 = vrot.lane.b32.xlu1 %v4042_v34, %s6650_s18  ;;  %v4111_v34 = vadd.f32 %v7927_v10, %v7920_v30 }
0x26b5   : > { %4054 = vrot.lane.b32.xlu0 %v4037_v8, %s6650_s18  ;;  %v4150_v8 = vmax.f32 %v4086_v57, 0.0 }
0x26b7   : > { %4052 = vrot.lane.b32.xlu1 %v4036_v39, %s6650_s18  ;;  %v4174_v39 = vmax.f32 %v4110_v9, 0.0  ;;  %v4129_v9 = vadd.f32 %v7935_v43, %v7950_v56  ;;  %s5013_s18 = scalar_lea.hbm %s8386_s12, %s5316_s29 }
0x2723   : > { %v7959_v62 = vpop.permute.xlu0 %4066 }
0x2724   : > { %v4099_v47 = vadd.f32 %v7959_v62, %v7911_v59  ;;  %v4083_v25 = vadd.f32 %v7959_v62, %v7901_v31  ;;  %v4107_v3 = vadd.f32 %v7909_v45, %v7959_v62 }
0x2725   : > { %v7961_v52 = vpop.permute.xlu1 %4064 }
0x2726   : > { %v4098_v5 = vadd.f32 %v7961_v52, %v7911_v59  ;;  %v4163_v6 = vmax.f32 %v4099_v47, 0.0  ;;  %v4082_v46 = vadd.f32 %v7961_v52, %v7901_v31  ;;  %v4106_v18 = vadd.f32 %v7909_v45, %v7961_v52 }
0x2727   : > { %v7967_v17 = vpop.permute.xlu0 %4054  ;;  %v4171_v44 = vmax.f32 %v4107_v3, 0.0  ;;  %v4088_v47 = vadd.f32 %v7893_v22, %v7937_v1  ;;  %v4090_v20 = vadd.f32 %v7893_v22, %v7961_v52  ;;  %v4114_v29 = vadd.f32 %v7961_v52, %v7920_v30 }
0x2728   : > { %v4162_v51 = vmax.f32 %v4098_v5, 0.0  ;;  %v4077_v15 = vadd.f32 %v7967_v17, %v7901_v31  ;;  %v4101_v16 = vadd.f32 %v7909_v45, %v7967_v17  ;;  %v4146_v11 = vmax.f32 %v4082_v46, 0.0 }
0x2729   : > { %v7971_v13 = vpop.permute.xlu1 %4052  ;;  %v4170_v58 = vmax.f32 %v4106_v18, 0.0  ;;  %v4109_v42 = vadd.f32 %v7967_v17, %v7920_v30  ;;  %v4112_v5 = vadd.f32 %v7937_v1, %v7920_v30  ;;  %v4154_v4 = vmax.f32 %v4090_v20, 0.0 }
0x272a   : > { %6014 = vmatprep.mubr.msk.f32.mxu1 %vm471_vm0, %v4162_v51  ;;  %v4076_v32 = vadd.f32 %v7971_v13, %v7901_v31  ;;  %v4100_v19 = vadd.f32 %v7909_v45, %v7971_v13  ;;  %v4141_v23 = vmax.f32 %v4077_v15, 0.0  ;;  %v4165_v63 = vmax.f32 %v4101_v16, 0.0 }
0x272b   : > { %6015 = vmatmul.mubr.msk.f32.gmra.mxu1 %vm471_vm0, %v4163_v6  ;;  %v4084_v37 = vadd.f32 %v7893_v22, %v7971_v13  ;;  %v4108_v55 = vadd.f32 %v7971_v13, %v7920_v30  ;;  %v4147_v31 = vmax.f32 %v4083_v25, 0.0  ;;  %v4085_v45 = vadd.f32 %v7893_v22, %v7967_v17 }
0x272c   : > { %v4140_v24 = vmax.f32 %v4076_v32, 0.0  ;;  %v4164_v14 = vmax.f32 %v4100_v19, 0.0  ;;  %v4173_v35 = vmax.f32 %v4109_v42, 0.0  ;;  %v4151_v51 = vmax.f32 %v4087_v2, 0.0 }
0x272d   : > { %v4148_v49 = vmax.f32 %v4084_v37, 0.0  ;;  %v4172_v54 = vmax.f32 %v4108_v55, 0.0  ;;  %v4149_v26 = vmax.f32 %v4085_v45, 0.0  ;;  %v4175_v15 = vmax.f32 %v4111_v34, 0.0 }
0x272e   : > { %5981 = vmatprep.mubr.msk.f32.mxu0 %vm471_vm0, %v4140_v24  ;;  %6017 = vmatprep.mubr.msk.f32.mxu1 %vm471_vm0, %v4164_v14  ;;  %v4089_v6 = vadd.f32 %v7893_v22, %v7935_v43  ;;  %v4113_v16 = vadd.f32 %v7935_v43, %v7920_v30  ;;  %v4152_v32 = vmax.f32 %v4088_v47, 0.0  ;;  %v4176_v19 = vmax.f32 %v4112_v5, 0.0 }
0x272f   : > { %5982 = vmatmul.mubr.msk.f32.vlgmr.msra.gmra.mxu0 %vm471_vm0, %v4141_v23  ;;  %6018 = vmatmul.mubr.msk.f32.gmra.mxu1 %vm471_vm0, %v4165_v63  ;;  %v4091_v23 = vadd.f32 %v7893_v22, %v7959_v62  ;;  %v4115_v63 = vadd.f32 %v7959_v62, %v7920_v30  ;;  %v4178_v27 = vmax.f32 %v4114_v29, 0.0  ;;  %v4093_v30 = vadd.f32 %v7967_v17, %v7911_v59 }
0x2730   : > { %5984 = vmatprep.mubr.msk.f32.mxu0 %vm471_vm0, %v4142_v41  ;;  %6020 = vmatprep.mubr.msk.f32.mxu1 %vm471_vm0, %v4166_v7  ;;  %v4153_v24 = vmax.f32 %v4089_v6, 0.0  ;;  %v4177_v14 = vmax.f32 %v4113_v16, 0.0  ;;  %v4092_v41 = vadd.f32 %v7971_v13, %v7911_v59  ;;  %v4116_v7 = vadd.f32 %v7914_v61, %v7971_v13 }
0x2731   : > { %v4155_v22 = vmax.f32 %v4091_v23, 0.0  ;;  %v4179_v33 = vmax.f32 %v4115_v63, 0.0  ;;  %v4117_v53 = vadd.f32 %v7914_v61, %v7967_v17  ;;  %v4157_v40 = vmax.f32 %v4093_v30, 0.0 }
0x2732   : > { %v4119_v59 = vadd.f32 %v7914_v61, %v7927_v10  ;;  %v4120_v46 = vadd.f32 %v7914_v61, %v7937_v1  ;;  %v4122_v25 = vadd.f32 %v7914_v61, %v7961_v52  ;;  %v4124_v37 = vadd.f32 %v7971_v13, %v7950_v56 }
0x2733   : > { %5985 = vmatmul.mubr.msk.f32.gmra.mxu0 %vm471_vm0, %v4143_v50  ;;  %6021 = vmatmul.mubr.msk.f32.gmra.mxu1 %vm471_vm0, %v4167_v36  ;;  %v4156_v50 = vmax.f32 %v4092_v41, 0.0  ;;  %v4180_v36 = vmax.f32 %v4116_v7, 0.0  ;;  %v4126_v45 = vadd.f32 %v7929_v60, %v7950_v56  ;;  %v4127_v42 = vadd.f32 %v7927_v10, %v7950_v56 }
0x2734   : > { %5987 = vmatprep.mubr.msk.f32.mxu0 %vm471_vm0, %v4144_v0  ;;  %6023 = vmatprep.mubr.msk.f32.mxu1 %vm471_vm0, %v4168_v28  ;;  %v4181_v0 = vmax.f32 %v4117_v53, 0.0  ;;  %v4182_v28 = vmax.f32 %v4118_v38, 0.0  ;;  %v4183_v18 = vmax.f32 %v4119_v59, 0.0  ;;  %v4193_v2 = vmax.f32 %v4129_v9, 0.0 }
0x2735   : > { %v4191_v57 = vmax.f32 %v4127_v42, 0.0  ;;  %v4131_v34 = vadd.f32 %v7959_v62, %v7950_v56  ;;  %v4133_v5 = vadd.f32 %v7947_v12, %v7967_v17  ;;  %v4136_v16 = vadd.f32 %v7947_v12, %v7937_v1 }
0x2737   : > { %5988 = vmatmul.mubr.msk.f32.gmra.mxu0 %vm471_vm0, %v4145_v21  ;;  %6024 = vmatmul.mubr.msk.f32.gmra.mxu1 %vm471_vm0, %v4169_v48  ;;  %v4121_v21 = vadd.f32 %v7914_v61, %v7935_v43  ;;  %v4184_v48 = vmax.f32 %v4120_v46, 0.0  ;;  %v4195_v47 = vmax.f32 %v4131_v34, 0.0 }
0x2738   : > { %5990 = vmatprep.mubr.msk.f32.mxu0 %vm471_vm0, %v4146_v11  ;;  %6026 = vmatprep.mubr.msk.f32.mxu1 %vm471_vm0, %v4170_v58  ;;  %v4123_v11 = vadd.f32 %v7914_v61, %v7959_v62  ;;  %v4186_v58 = vmax.f32 %v4122_v25, 0.0 }
0x2739   : > { %v4185_v3 = vmax.f32 %v4121_v21, 0.0 }
0x273a   : > { %v4187_v55 = vmax.f32 %v4123_v11, 0.0 }
0x273b   : > { %5991 = vmatmul.mubr.msk.f32.gmra.mxu0 %vm471_vm0, %v4147_v31  ;;  %6027 = vmatmul.mubr.msk.f32.gmra.mxu1 %vm471_vm0, %v4171_v44  ;;  %v4125_v31 = vadd.f32 %v7967_v17, %v7950_v56  ;;  %v4188_v44 = vmax.f32 %v4124_v37, 0.0 }
0x273c   : > { %5993 = vmatprep.mubr.msk.f32.mxu0 %vm471_vm0, %v4148_v49  ;;  %6029 = vmatprep.mubr.msk.f32.mxu1 %vm471_vm0, %v4172_v54  ;;  %v4190_v49 = vmax.f32 %v4126_v45, 0.0  ;;  %v4128_v54 = vadd.f32 %v7937_v1, %v7950_v56  ;;  %v4139_v1 = vadd.f32 %v7947_v12, %v7959_v62 }
0x273d   : > { %v4189_v61 = vmax.f32 %v4125_v31, 0.0 }
0x273e   : > { %v4203_v29 = vmax.f32 %v4139_v1, 0.0 }
0x273f   : > { %5994 = vmatmul.mubr.msk.f32.gmra.mxu0 %vm471_vm0, %v4149_v26  ;;  %6030 = vmatmul.mubr.msk.f32.gmra.mxu1 %vm471_vm0, %v4173_v35  ;;  %v4192_v26 = vmax.f32 %v4128_v54, 0.0  ;;  %v4130_v35 = vadd.f32 %v7961_v52, %v7950_v56  ;;  %v4197_v56 = vmax.f32 %v4133_v5, 0.0 }
0x2740   : > { %5996 = vmatprep.mubr.msk.f32.mxu0 %vm471_vm0, %v4150_v8  ;;  %6032 = vmatprep.mubr.msk.f32.mxu1 %vm471_vm0, %v4174_v39  ;;  %v4132_v39 = vadd.f32 %v7947_v12, %v7971_v13  ;;  %v4135_v13 = vadd.f32 %v7947_v12, %v7927_v10 }
0x2741   : > { %v4194_v8 = vmax.f32 %v4130_v35, 0.0 }
0x2742   : > { %v4199_v17 = vmax.f32 %v4135_v13, 0.0 }
0x2743   : > { %5997 = vmatmul.mubr.msk.f32.gmra.mxu0 %vm471_vm0, %v4151_v51  ;;  %6033 = vmatmul.mubr.msk.f32.gmra.mxu1 %vm471_vm0, %v4175_v15  ;;  %v4196_v51 = vmax.f32 %v4132_v39, 0.0  ;;  %v4134_v15 = vadd.f32 %v7947_v12, %v7929_v60  ;;  %v4137_v60 = vadd.f32 %v7947_v12, %v7935_v43  ;;  %v4857_v43 = vld [vmem:[%s8385_s11 + $0x8] sm:$0xff] }
0x2744   : > { %5999 = vmatprep.mubr.msk.f32.mxu0 %vm471_vm0, %v4152_v32  ;;  %6035 = vmatprep.mubr.msk.f32.mxu1 %vm471_vm0, %v4176_v19  ;;  %v4200_v32 = vmax.f32 %v4136_v16, 0.0  ;;  %v4138_v19 = vadd.f32 %v7947_v12, %v7961_v52  ;;  %v8150_v52 = vpop.f32.mrf.mxu1 }
0x2745   : > { %v4198_v6 = vmax.f32 %v4134_v15, 0.0  ;;  %v4201_v10 = vmax.f32 %v4137_v60, 0.0 }
0x2746   : > { %v4202_v20 = vmax.f32 %v4138_v19, 0.0 }
0x2747   : > { %6000 = vmatmul.mubr.msk.f32.gmra.mxu0 %vm471_vm0, %v4153_v24  ;;  %6036 = vmatmul.mubr.msk.f32.gmra.mxu1 %vm471_vm0, %v4177_v14  ;;  %v8152_v24 = vpop.f32.mrf.mxu1 }
0x2748   : > { %6002 = vmatprep.mubr.msk.f32.mxu0 %vm471_vm0, %v4154_v4  ;;  %6038 = vmatprep.mubr.msk.f32.mxu1 %vm471_vm0, %v4178_v27 }
0x2749   : > { %v8154_v14 = vpop.f32.mrf.mxu1 }
0x274b   : > { %6003 = vmatmul.mubr.msk.f32.gmra.mxu0 %vm471_vm0, %v4155_v22  ;;  %6039 = vmatmul.mubr.msk.f32.gmra.mxu1 %vm471_vm0, %v4179_v33  ;;  %v8156_v12 = vpop.f32.mrf.mxu1 }
0x274c   : > { %6005 = vmatprep.mubr.msk.f32.mxu0 %vm471_vm0, %v4156_v50  ;;  %6041 = vmatprep.mubr.msk.f32.mxu1 %vm471_vm0, %v4180_v36 }
0x274f   : > { %6006 = vmatmul.mubr.msk.f32.gmra.mxu0 %vm471_vm0, %v4157_v40  ;;  %6042 = vmatmul.mubr.msk.f32.gmra.mxu1 %vm471_vm0, %v4181_v0  ;;  %v8179_v40 = vld [vmem:[%s8384_s10] ss:$0 sm:$0xff] }
0x2750   : > { %6044 = vmatprep.mubr.msk.f32.mxu1 %vm471_vm0, %v4182_v28  ;;  %4924 = vmatprep.mubr.f32.mxu0 %v4857_v43 }
0x2753   : > { %6045 = vmatmul.mubr.msk.f32.gmra.mxu1 %vm471_vm0, %v4183_v18 }
0x2754   : > { %6047 = vmatprep.mubr.msk.f32.mxu1 %vm471_vm0, %v4184_v48 }
0x2757   : > { %6048 = vmatmul.mubr.msk.f32.gmra.mxu1 %vm471_vm0, %v4185_v3 }
0x2758   : > { %6050 = vmatprep.mubr.msk.f32.mxu1 %vm471_vm0, %v4186_v58 }
0x275b   : > { %6051 = vmatmul.mubr.msk.f32.gmra.mxu1 %vm471_vm0, %v4187_v55 }
0x275c   : > { %6053 = vmatprep.mubr.msk.f32.mxu1 %vm471_vm0, %v4188_v44 }
0x275f   : > { %6054 = vmatmul.mubr.msk.f32.gmra.mxu1 %vm471_vm0, %v4189_v61 }
0x2760   : > { %6056 = vmatprep.mubr.msk.f32.mxu1 %vm471_vm0, %v4190_v49 }
0x2763   : > { %6057 = vmatmul.mubr.msk.f32.gmra.mxu1 %vm471_vm0, %v4191_v57 }
0x2764   : > { %6059 = vmatprep.mubr.msk.f32.mxu1 %vm471_vm0, %v4192_v26 }
0x2767   : > { %6060 = vmatmul.mubr.msk.f32.gmra.mxu1 %vm471_vm0, %v4193_v2 }
0x2768   : > { %6062 = vmatprep.mubr.msk.f32.mxu1 %vm471_vm0, %v4194_v8 }
0x276b   : > { %6063 = vmatmul.mubr.msk.f32.gmra.mxu1 %vm471_vm0, %v4195_v47 }
0x276c   : > { %6065 = vmatprep.mubr.msk.f32.mxu1 %vm471_vm0, %v4196_v51 }
0x276f   : > { %6066 = vmatmul.mubr.msk.f32.gmra.mxu1 %vm471_vm0, %v4197_v56 }
0x2770   : > { %6068 = vmatprep.mubr.msk.f32.mxu1 %vm471_vm0, %v4198_v6 }
0x2773   : > { %6069 = vmatmul.mubr.msk.f32.gmra.mxu1 %vm471_vm0, %v4199_v17 }
0x2774   : > { %6071 = vmatprep.mubr.msk.f32.mxu1 %vm471_vm0, %v4200_v32 }
0x2777   : > { %6072 = vmatmul.mubr.msk.f32.gmra.mxu1 %vm471_vm0, %v4201_v10 }
0x2778   : > { %6074 = vmatprep.mubr.msk.f32.mxu1 %vm471_vm0, %v4202_v20 }
0x277b   : > { %6075 = vmatmul.mubr.msk.f32.gmra.mxu1 %vm471_vm0, %v4203_v29 }
0x27eb   : > { %v8158_v62 = vpop.f32.mrf.mxu1 }
0x27ed   : > { %v8160_v23 = vpop.f32.mrf.mxu1 }
0x27ef   : > { %v8162_v63 = vpop.f32.mrf.mxu0  ;;  %v6019_v4 = vpop.f32.mrf.mxu1 }
0x27f0   : > { %v4599_v29 = vadd.f32 %v6019_v4, %v8179_v40  ;;  %v4589_v4 = vadd.f32 %v8158_v62, %v8179_v40 }
0x27f1   : > { %v8164_v27 = vpop.f32.mrf.mxu0  ;;  %v8166_v41 = vpop.f32.mrf.mxu1 }
0x27f3   : > { %v8168_v7 = vpop.f32.mrf.mxu0  ;;  %v6022_v22 = vpop.f32.mrf.mxu1 }
0x27f4   : > { %v4609_v13 = vadd.f32 %v6022_v22, %v8179_v40 }
0x27f5   : > { %v8170_v33 = vpop.f32.mrf.mxu0  ;;  %v4603_v30 = vpop.f32.mrf.mxu1 }
0x27f6   : > { %v4604_v32 = vadd.f32 %v8179_v40, %v4603_v30  ;;  %v4819_v43 = vmax.f32 %v4609_v13, 0.0  ;;  %v4594_v30 = vadd.f32 %v8179_v40, %v8166_v41  ;;  %v4584_v41 = vadd.f32 %v8179_v40, %v8160_v23 }
0x27f7   : > { %v8172_v53 = vpop.f32.mrf.mxu0  ;;  %v6025_v50 = vpop.f32.mrf.mxu1 }
0x27f8   : > { %v4619_v26 = vadd.f32 %v6025_v50, %v8179_v40 }
0x27f9   : > { %v8174_v36 = vpop.f32.mrf.mxu0  ;;  %v4613_v38 = vpop.f32.mrf.mxu1 }
0x27fa   : > { %v4614_v47 = vadd.f32 %v8179_v40, %v4613_v38  ;;  %v4821_v6 = vmax.f32 %v4619_v26, 0.0 }
0x27fb   : > { %v8181_v0 = vpop.f32.mrf.mxu0  ;;  %v6028_v59 = vpop.f32.mrf.mxu1 }
0x27fc   : > { %v4629_v28 = vadd.f32 %v6028_v59, %v8179_v40  ;;  %v4820_v19 = vmax.f32 %v4614_v47, 0.0  ;;  %v4818_v59 = vmax.f32 %v4604_v32, 0.0  ;;  %v4569_v47 = vadd.f32 %v8150_v52, %v8179_v40 }
0x27fd   : > { %v8184_v46 = vpop.f32.mrf.mxu0  ;;  %v4623_v18 = vpop.f32.mrf.mxu1 }
0x27fe   : > { %v4823_v21 = vmax.f32 %v4629_v28, 0.0  ;;  %v4624_v49 = vadd.f32 %v8179_v40, %v4623_v18 }
0x27ff   : > { %v5995_v48 = vpop.f32.mrf.mxu0  ;;  %v8186_v25 = vpop.f32.mrf.mxu1 }
0x2800   : > { %5575 = vmatprep.subr.mxu0 %v4823_v21  ;;  %v4822_v5 = vmax.f32 %v4624_v49, 0.0  ;;  %v4519_v50 = vadd.f32 %v5995_v48, %v8179_v40  ;;  %v4509_v48 = vadd.f32 %v8181_v0, %v8179_v40  ;;  %v4499_v0 = vadd.f32 %v8172_v53, %v8179_v40 }
0x2801   : > { %v4513_v3 = vpop.f32.mrf.mxu0  ;;  %v8188_v11 = vpop.f32.mrf.mxu1 }
0x2802   : > { %v4514_v18 = vadd.f32 %v8179_v40, %v4513_v3  ;;  %v4504_v3 = vadd.f32 %v8179_v40, %v8184_v46  ;;  %v4799_v23 = vmax.f32 %v4509_v48, 0.0  ;;  %v4494_v46 = vadd.f32 %v8179_v40, %v8174_v36 }
0x2803   : > { %v5998_v58 = vpop.f32.mrf.mxu0  ;;  %v8190_v37 = vpop.f32.mrf.mxu1 }
0x2804   : > { %v4529_v17 = vadd.f32 %v5998_v58, %v8179_v40  ;;  %v4817_v58 = vmax.f32 %v4599_v29, 0.0  ;;  %v4800_v62 = vmax.f32 %v4514_v18, 0.0  ;;  %v4796_v52 = vmax.f32 %v4494_v46, 0.0 }
0x2805   : > { %v4523_v55 = vpop.f32.mrf.mxu0  ;;  %v8192_v31 = vpop.f32.mrf.mxu1 }
0x2806   : > { %v4524_v1 = vadd.f32 %v8179_v40, %v4523_v55  ;;  %v4803_v38 = vmax.f32 %v4529_v17, 0.0 }
0x2807   : > { %v6001_v44 = vpop.f32.mrf.mxu0  ;;  %v8194_v45 = vpop.f32.mrf.mxu1 }
0x2808   : > { %v4539_v34 = vadd.f32 %v6001_v44, %v8179_v40  ;;  %v4802_v21 = vmax.f32 %v4524_v1, 0.0  ;;  %v4801_v44 = vmax.f32 %v4519_v50, 0.0 }
0x2809   : > { %v4533_v61 = vpop.f32.mrf.mxu0  ;;  %v8196_v42 = vpop.f32.mrf.mxu1 }
0x280a   : > { %v4534_v15 = vadd.f32 %v8179_v40, %v4533_v61  ;;  %v4805_v60 = vmax.f32 %v4539_v34, 0.0  ;;  %v4816_v61 = vmax.f32 %v4594_v30, 0.0  ;;  %v4814_v34 = vmax.f32 %v4584_v41, 0.0 }
0x280b   : > { %v6004_v54 = vpop.f32.mrf.mxu0  ;;  %v8199_v57 = vpop.f32.mrf.mxu1 }
0x280c   : > { %v4549_v9 = vadd.f32 %v6004_v54, %v8179_v40  ;;  %v4804_v20 = vmax.f32 %v4534_v15, 0.0  ;;  %v4579_v54 = vadd.f32 %v8154_v14, %v8179_v40  ;;  %v4798_v14 = vmax.f32 %v4504_v3, 0.0 }
0x280d   : > { %v4543_v35 = vpop.f32.mrf.mxu0  ;;  %v8203_v2 = vpop.f32.mrf.mxu1  ;;  %v4797_v15 = vmax.f32 %v4499_v0, 0.0 }
0x280e   : > { %v4807_v8 = vmax.f32 %v4549_v9, 0.0  ;;  %v4544_v39 = vadd.f32 %v8179_v40, %v4543_v35  ;;  %v4815_v9 = vmax.f32 %v4589_v4, 0.0  ;;  %v4574_v35 = vadd.f32 %v8179_v40, %v8156_v12 }
0x280f   : > { %v8208_v51 = vpop.f32.mrf.mxu1  ;;  %v4489_v12 = vadd.f32 %v8168_v7, %v8179_v40  ;;  %v4479_v7 = vadd.f32 %v8162_v63, %v8179_v40 }
0x2810   : > { %v4806_v56 = vmax.f32 %v4544_v39, 0.0  ;;  %5576 = vmatpush3.msra.mxu0 %v4807_v8  ;;  %v6007_v39 = vpop.f32.mrf.mxu0  ;;  %v4812_v13 = vmax.f32 %v4574_v35, 0.0 }
0x2811   : > { %v8212_v16 = vpop.f32.mrf.mxu1  ;;  %5577 = vmatprep.subr.mxu0 %v4822_v5  ;;  %v4813_v5 = vmax.f32 %v4579_v54, 0.0  ;;  %v4559_v32 = vadd.f32 %v6007_v39, %v8179_v40  ;;  %v4793_v30 = vmax.f32 %v4479_v7, 0.0 }
0x2812   : > { %5578 = vmatpush3.msra.mxu0 %v4806_v56  ;;  %v4564_v56 = vadd.f32 %v8179_v40, %v8152_v24  ;;  %v4553_v17 = vpop.f32.mrf.mxu0  ;;  %v4795_v24 = vmax.f32 %v4489_v12, 0.0 }
0x2813   : > { %v8216_v10 = vpop.f32.mrf.mxu1  ;;  %5579 = vmatprep.subr.mxu0 %v4821_v6  ;;  %v4484_v6 = vadd.f32 %v8179_v40, %v8170_v33  ;;  %v4474_v33 = vadd.f32 %v8179_v40, %v8164_v27  ;;  %v4809_v50 = vmax.f32 %v4559_v32, 0.0  ;;  %v4859_v27 = vld [vmem:[%s8385_s11 + $0x18] sm:$0xff]  ;;  %v4679_v32 = vadd.f32 %v8208_v51, %v8179_v40 }
0x2814   : > { %5580 = vmatpush3.msra.mxu0 %v4805_v60  ;;  %v4811_v60 = vmax.f32 %v4569_v47, 0.0  ;;  %v4810_v1 = vmax.f32 %v4564_v56, 0.0  ;;  %v4689_v56 = vadd.f32 %v8216_v10, %v8179_v40 }
0x2815   : > { %v8220_v22 = vpop.f32.mrf.mxu1  ;;  %5581 = vmatprep.subr.mxu0 %v4820_v19  ;;  %v4792_v18 = vmax.f32 %v4474_v33, 0.0 }
0x2816   : > { %5582 = vmatpush3.msra.mxu0 %v4804_v20  ;;  %v4554_v20 = vadd.f32 %v8179_v40, %v4553_v17  ;;  %v4835_v7 = vmax.f32 %v4689_v56, 0.0 }
0x2817   : > { %v8225_v28 = vpop.f32.mrf.mxu1  ;;  %5583 = vmatprep.subr.mxu0 %v4819_v43  ;;  %v4794_v43 = vmax.f32 %v4484_v6, 0.0 }
0x2818   : > { %5584 = vmatpush3.msra.mxu0 %v4803_v38  ;;  %v4808_v63 = vmax.f32 %v4554_v20, 0.0 }
0x2819   : > { %v8230_v55 = vpop.f32.mrf.mxu1  ;;  %5585 = vmatprep.subr.mxu0 %v4818_v59 }
0x281a   : > { %5586 = vmatpush3.msra.mxu0 %v4802_v21  ;;  %v4856_v21 = vld [vmem:[%s8385_s11] sm:$0xff] }
0x281b   : > { %v8236_v49 = vpop.f32.mrf.mxu1  ;;  %5587 = vmatprep.subr.mxu0 %v4817_v58 }
0x281c   : > { %5588 = vmatpush3.msra.mxu0 %v4801_v44 }
0x281d   : > { %v8242_v26 = vpop.f32.mrf.mxu1  ;;  %5589 = vmatprep.subr.mxu0 %v4816_v61 }
0x281e   : > { %5590 = vmatpush3.msra.mxu0 %v4800_v62  ;;  %v4709_v62 = vadd.f32 %v8236_v49, %v8179_v40  ;;  %v4704_v0 = vadd.f32 %v8179_v40, %v8242_v26  ;;  %v4694_v49 = vadd.f32 %v8179_v40, %v8230_v55 }
0x281f   : > { %v8248_v8 = vpop.f32.mrf.mxu1  ;;  %5591 = vmatprep.subr.mxu0 %v4815_v9 }
0x2820   : > { %5592 = vmatpush3.msra.mxu0 %v4799_v23  ;;  %v4839_v39 = vmax.f32 %v4709_v62, 0.0  ;;  %v4838_v12 = vmax.f32 %v4704_v0, 0.0  ;;  %v4836_v17 = vmax.f32 %v4694_v49, 0.0 }
0x2821   : > { %v8254_v53 = vpop.f32.mrf.mxu1  ;;  %5593 = vmatprep.subr.mxu0 %v4814_v34 }
0x2822   : > { %5594 = vmatpush3.msra.mxu0 %v4798_v14  ;;  %v4699_v14 = vadd.f32 %v8225_v28, %v8179_v40 }
0x2823   : > { %v8260_v36 = vpop.f32.mrf.mxu1  ;;  %5595 = vmatprep.subr.mxu0 %v4813_v5 }
0x2824   : > { %5596 = vmatpush3.msra.mxu0 %v4797_v15 }
0x2825   : > { %v8265_v19 = vpop.f32.mrf.mxu1  ;;  %5597 = vmatprep.subr.mxu0 %v4812_v13  ;;  %v4837_v13 = vmax.f32 %v4699_v14, 0.0 }
0x2826   : > { %5598 = vmatpush3.msra.mxu0 %v4796_v52  ;;  %v4684_v52 = vadd.f32 %v8179_v40, %v8220_v22 }
0x2827   : > { %v8270_v29 = vpop.f32.mrf.mxu1  ;;  %5599 = vmatprep.subr.mxu0 %v4811_v60 }
0x2828   : > { %5600 = vmatpush3.msra.mxu0 %v4795_v24  ;;  %v4834_v20 = vmax.f32 %v4684_v52, 0.0 }
0x2829   : > { %v8274_v38 = vpop.f32.mrf.mxu1  ;;  %5601 = vmatprep.subr.mxu0 %v4810_v1  ;;  %v4674_v1 = vadd.f32 %v8179_v40, %v8212_v16  ;;  %v4739_v16 = vadd.f32 %v8270_v29, %v8179_v40  ;;  %v4729_v29 = vadd.f32 %v8260_v36, %v8179_v40  ;;  %v4719_v36 = vadd.f32 %v8248_v8, %v8179_v40 }
0x282a   : > { %5602 = vmatpush3.msra.mxu0 %v4794_v43  ;;  %v4669_v43 = vadd.f32 %v8199_v57, %v8179_v40 }
0x282b   : > { %v6064_v59 = vpop.f32.mrf.mxu1  ;;  %5603 = vmatprep.subr.mxu0 %v4809_v50  ;;  %v4833_v50 = vmax.f32 %v4679_v32, 0.0  ;;  %v4841_v0 = vmax.f32 %v4719_v36, 0.0 }
0x282c   : > { %5604 = vmatpush3.msra.mxu0 %v4793_v30  ;;  %v4749_v22 = vadd.f32 %v6064_v59, %v8179_v40  ;;  %v4831_v57 = vmax.f32 %v4669_v43, 0.0 }
0x282d   : > { %v4743_v4 = vpop.f32.mrf.mxu1  ;;  %5605 = vmatprep.subr.mxu0 %v4808_v63  ;;  %v4664_v63 = vadd.f32 %v8179_v40, %v8203_v2  ;;  %v4654_v2 = vadd.f32 %v8179_v40, %v8196_v42  ;;  %v4644_v42 = vadd.f32 %v8179_v40, %v8192_v31  ;;  %v4634_v31 = vadd.f32 %v8179_v40, %v8188_v11 }
0x282e   : > { %5606 = vmatpush3.msra.mxu0 %v4792_v18  ;;  %v4744_v51 = vadd.f32 %v8179_v40, %v4743_v4  ;;  %v4832_v18 = vmax.f32 %v4674_v1, 0.0  ;;  %v4847_v59 = vmax.f32 %v4749_v22, 0.0  ;;  %v4734_v4 = vadd.f32 %v8179_v40, %v8274_v38 }
0x282f   : > { %v6067_v58 = vpop.f32.mrf.mxu1  ;;  %4925 = vmatmul.mubr.f32.vlgmr.msra.gmra.mxu0 %v4856_v21  ;;  %v4659_v21 = vadd.f32 %v8194_v45, %v8179_v40  ;;  %v4649_v45 = vadd.f32 %v8190_v37, %v8179_v40  ;;  %v4724_v38 = vadd.f32 %v8179_v40, %v8265_v19  ;;  %v4639_v37 = vadd.f32 %v8186_v25, %v8179_v40 }
0x2830   : > { %4994 = vmatprep.mubr.f32.mxu0 %v4859_v27  ;;  %v4759_v55 = vadd.f32 %v6067_v58, %v8179_v40  ;;  %v4846_v27 = vmax.f32 %v4744_v51, 0.0  ;;  %v4830_v58 = vmax.f32 %v4664_v63, 0.0  ;;  %v4714_v19 = vadd.f32 %v8179_v40, %v8254_v53  ;;  %v4858_v53 = vld [vmem:[%s8385_s11 + $0x10] sm:$0xff] }
0x2831   : > { %v4753_v48 = vpop.f32.mrf.mxu1  ;;  %v4827_v62 = vmax.f32 %v4649_v45, 0.0  ;;  %v4825_v8 = vmax.f32 %v4639_v37, 0.0  ;;  %v4824_v25 = vmax.f32 %v4634_v31, 0.0 }
0x2832   : > { %v4754_v10 = vadd.f32 %v8179_v40, %v4753_v48  ;;  %v4849_v33 = vmax.f32 %v4759_v55, 0.0  ;;  %v4845_v48 = vmax.f32 %v4739_v16, 0.0 }
0x2833   : > { %v6070_v44 = vpop.f32.mrf.mxu1 }
0x2834   : > { %v4769_v26 = vadd.f32 %v6070_v44, %v8179_v40  ;;  %v4848_v30 = vmax.f32 %v4754_v10, 0.0  ;;  %v4829_v44 = vmax.f32 %v4659_v21, 0.0 }
0x2835   : > { %v4763_v41 = vpop.f32.mrf.mxu1 }
0x2836   : > { %v4764_v28 = vadd.f32 %v8179_v40, %v4763_v41  ;;  %v4851_v60 = vmax.f32 %v4769_v26, 0.0  ;;  %v4844_v41 = vmax.f32 %v4734_v4, 0.0 }
0x2837   : > { %v6073_v61 = vpop.f32.mrf.mxu1 }
0x2838   : > { %v4779_v35 = vadd.f32 %v6073_v61, %v8179_v40  ;;  %v4850_v24 = vmax.f32 %v4764_v28, 0.0  ;;  %v4828_v61 = vmax.f32 %v4654_v2, 0.0 }
0x2839   : > { %v4773_v3 = vpop.f32.mrf.mxu1 }
0x283a   : > { %v4774_v47 = vadd.f32 %v8179_v40, %v4773_v3  ;;  %v4853_v15 = vmax.f32 %v4779_v35, 0.0  ;;  %v4843_v3 = vmax.f32 %v4729_v29, 0.0 }
0x283b   : > { %v6076_v54 = vpop.f32.mrf.mxu1 }
0x283c   : > { %v4789_v9 = vadd.f32 %v6076_v54, %v8179_v40  ;;  %v4852_v6 = vmax.f32 %v4774_v47, 0.0  ;;  %v4842_v54 = vmax.f32 %v4724_v38, 0.0 }
0x283d   : > { %v4783_v23 = vpop.f32.mrf.mxu1 }
0x283e   : > { %v4855_v34 = vmax.f32 %v4789_v9, 0.0  ;;  %v4784_v46 = vadd.f32 %v8179_v40, %v4783_v23  ;;  %v4826_v9 = vmax.f32 %v4644_v42, 0.0  ;;  %v4840_v23 = vmax.f32 %v4714_v19, 0.0 }
0x2840   : > { %v4854_v5 = vmax.f32 %v4784_v46, 0.0  ;;  %5610 = vmatprep.subr.mxu0 %v4855_v34 }
0x2841   : > { %5611 = vmatpush3.msra.mxu0 %v4839_v39 }
0x2842   : > { %5612 = vmatprep.subr.mxu0 %v4854_v5 }
0x2843   : > { %5613 = vmatpush3.msra.mxu0 %v4838_v12 }
0x2844   : > { %5614 = vmatprep.subr.mxu0 %v4853_v15 }
0x2845   : > { %5615 = vmatpush3.msra.mxu0 %v4837_v13 }
0x2846   : > { %5616 = vmatprep.subr.mxu0 %v4852_v6 }
0x2847   : > { %5617 = vmatpush3.msra.mxu0 %v4836_v17 }
0x2848   : > { %5618 = vmatprep.subr.mxu0 %v4851_v60 }
0x2849   : > { %5619 = vmatpush3.msra.mxu0 %v4835_v7 }
0x284a   : > { %5620 = vmatprep.subr.mxu0 %v4850_v24 }
0x284b   : > { %5621 = vmatpush3.msra.mxu0 %v4834_v20 }
0x284c   : > { %5622 = vmatprep.subr.mxu0 %v4849_v33 }
0x284d   : > { %5623 = vmatpush3.msra.mxu0 %v4833_v50 }
0x284e   : > { %5624 = vmatprep.subr.mxu0 %v4848_v30 }
0x284f   : > { %5625 = vmatpush3.msra.mxu0 %v4832_v18 }
0x2850   : > { %5626 = vmatprep.subr.mxu0 %v4847_v59 }
0x2851   : > { %5627 = vmatpush3.msra.mxu0 %v4831_v57 }
0x2852   : > { %5628 = vmatprep.subr.mxu0 %v4846_v27 }
0x2853   : > { %5629 = vmatpush3.msra.mxu0 %v4830_v58 }
0x2854   : > { %5630 = vmatprep.subr.mxu0 %v4845_v48 }
0x2855   : > { %5631 = vmatpush3.msra.mxu0 %v4829_v44 }
0x2856   : > { %5632 = vmatprep.subr.mxu0 %v4844_v41 }
0x2857   : > { %5633 = vmatpush3.msra.mxu0 %v4828_v61 }
0x2858   : > { %5634 = vmatprep.subr.mxu0 %v4843_v3 }
0x2859   : > { %5635 = vmatpush3.msra.mxu0 %v4827_v62 }
0x285a   : > { %5636 = vmatprep.subr.mxu0 %v4842_v54 }
0x285b   : > { %5637 = vmatpush3.msra.mxu0 %v4826_v9 }
0x285c   : > { %5638 = vmatprep.subr.mxu0 %v4841_v0 }
0x285d   : > { %5639 = vmatpush3.msra.mxu0 %v4825_v8 }
0x285e   : > { %5640 = vmatprep.subr.mxu0 %v4840_v23 }
0x285f   : > { %5641 = vmatpush3.msra.mxu0 %v4824_v25 }
0x2860   : > { %4995 = vmatmul.mubr.f32.vlgmr.msra.gmra.mxu0 %v4858_v53 }
0x28ef   : > { %v5607_v40 = vpop.f32.mrf.mxu0 }
0x28f1   : > { %v5608_v11 = vpop.f32.mrf.mxu0 }
0x28f2   : > { %v5609_v46 = vadd.f32 %v5608_v11, %v5607_v40 }
0x2920   : > { %v5642_v35 = vpop.f32.mrf.mxu0 }
0x2922   : > { %v5643_v34 = vpop.f32.mrf.mxu0 }
0x2923   : > { %v5644_v14 = vadd.f32 %v5643_v34, %v5642_v35 }
0x2925   : > { %v4997_v39 = vadd.f32 %v5644_v14, %v5609_v46 }
0x2927   : > { %5000 = vst.msk [vmem:[%s406_s15] sm:$0xff] %vm471_vm0, %v4997_v39 }
0x2928   : > { %6597 = shalt.err (!%p6594_p3)
}
0x2929   : > { %s6598_s20 = scalar_lea.hbm %s5013_s18, 128  ;;  %s6602_s15 = scalar_lea.hbm %s8386_s12, 256 }
0x292a   : > { %p6599_p4 = scmp.ne.s32.totalorder %s5013_s18, %s6598_s20  ;;  %p6603_p9 = scmp.lt.s32.totalorder %s5013_s18, %s8386_s12 }
0x292b   : > { %p6604_p10 = scmp.lt.s32.totalorder %s6602_s15, %s6598_s20 }
0x292c   : > { %p6600_p7 = pnand %p6599_p4, %p6755_p5 }
0x292d   : > { %p6605_p11 = por %p6604_p10, %p6603_p9 }
0x292e   : > { %p6601_p8 = pneg %p6600_p7 }
0x2930   : > { %p6606_p12 = pnand %p6605_p11, %p6601_p8 }
0x2932   : > { %6609 = shalt.err (!%p6606_p12)
}
0x2933   : > { %6086 = dma.vmem_to_hbm [thread:$0]  (%p6755_p5), %s5016_s16, 128, %s5013_s18, %s5002_s26  }
0x2934 PF: > { %p6092_p13 = scmp.ge.s32.totalorder %s6644_s24, 2  ;;  %s5027_s0 = sand.u32 1, %s6632_s21  }
0x2935   : > { %s5028_s1 = scalar_lea.sflag [#allocation3], %s5027_s0 }
0x2936   : > { %p6089_p0 = pnand %p6092_p13, %p6759_p6 }
0x2938   : > { %p6090_p1 = pneg %p6089_p0 }
0x293a   : > { %6627 = dma.done.wait (%p6090_p1), %s5028_s1, 128  }
0x293b   : > { %6629 = vsyncadd (%p6090_p1), %s5028_s1, 4294967168  ;;  %p22_p2 = scmp.ge.s32.totalorder %s6742_s27, 4   ;;  %s8398_s21 = smov %s6636_s22 }
0x293c   : > { %s8399_s22 = smov %s6640_s23  ;;  %s8400_s23 = smov %s6753_s30 }
0x293d   : > { %s8401_s24 = smov %s6742_s27  ;;  %24 = sbr.rel (!%p22_p2) target bundleno = 7 (0x7), region = 103 }
0x2942   :  { %5033 = vsyncpa [#allocation3], 1 }
0x2943   :  { %5035 = vsyncpa [#allocation3 + $0x1], 1 }

</bundles_post_ra>
